<compile_context>
chip_gen: v7x
topology: tpu7x:2x2x1
jax: 0.10.0
libtpu: 0.0.40
codegen_flags: <defaults>
</compile_context>

<pallas_src>
import functools

import jax
import jax.numpy as jnp
from jax.experimental import pallas as pl
from jax.experimental.pallas import tpu as pltpu


# ---------------------------------------------------------------- kernels ---

def _conv_bn_stats_kernel(xs_ref, w_ref, y_ref, psum_ref, psq_ref, *,
                          k, wo, stride):
    # xs_ref : (k, th, Wp, Cin)  bf16 -- k H-shifted input row bands
    # w_ref  : (k, k, Cin, Coutp) bf16 -- full weights, resident in VMEM
    # y_ref  : (th*Wo, Coutp)     f32  -- conv output tile
    # psum_ref / psq_ref : (8, Coutp) f32 -- per-tile BN partials (x8 rows)
    th = xs_ref.shape[1]
    cin = xs_ref.shape[3]
    coutp = w_ref.shape[3]

    acc = jnp.zeros((th * wo, coutp), jnp.float32)
    for kh in range(k):
        x_k = xs_ref[kh]                                        # (th, Wp, Cin)
        for kw in range(k):
            win = x_k[:, kw:kw + (wo - 1) * stride + 1:stride, :]   # (th, Wo, Cin)
            lhs = win.reshape(th * wo, cin)
            acc = acc + jnp.dot(lhs, w_ref[kh, kw],
                                preferred_element_type=jnp.float32)

    y_ref[...] = acc
    ps = jnp.sum(acc, axis=0, keepdims=True)                    # (1, Coutp)
    psq = jnp.sum(acc * acc, axis=0, keepdims=True)
    psum_ref[...] = jnp.broadcast_to(ps, (8, coutp))
    psq_ref[...] = jnp.broadcast_to(psq, (8, coutp))


def _bn_act_kernel(y_ref, scale_ref, shift_ref, o_ref):
    y = y_ref[...] * scale_ref[...] + shift_ref[...]
    o_ref[...] = jnp.maximum(y, 0.1 * y)                        # LeakyReLU(0.1)


# ---------------------------------------------------------------- wrapper ---

@functools.partial(jax.jit, static_argnames=("stride", "eps", "rows_per_tile"))
def conv_block(x_nchw, weight, gamma, beta, *, stride=1, eps=1e-5,
               rows_per_tile=None):
    N, Cin, H, W = x_nchw.shape
    Cout, _, k, _ = weight.shape
    pad = k // 2
    Ho = (H + 2 * pad - k) // stride + 1
    Wo = (W + 2 * pad - k) // stride + 1
    Wp = W + 2 * pad
    Coutp = ((Cout + 127) // 128) * 128

    # ---- layout prep (cheap XLA data movement, no FLOPs) -------------------
    xn = jnp.transpose(x_nchw, (0, 2, 3, 1))                    # NHWC
    xp = jnp.pad(xn, ((0, 0), (pad, pad), (pad, pad), (0, 0))).astype(jnp.bfloat16)
    # k H-shifted / H-strided views, stacked: (k, N, Ho, Wp, Cin)
    xs = jnp.stack(
        [xp[:, kh:kh + (Ho - 1) * stride + 1:stride, :, :] for kh in range(k)],
        axis=0)

    # weights (Cout, Cin, kh, kw) -> (kh, kw, Cin, Coutp), bf16, lane-dense
    wk = jnp.transpose(weight, (2, 3, 1, 0))
    wk = jnp.pad(wk, ((0, 0), (0, 0), (0, 0), (0, Coutp - Cout))).astype(jnp.bfloat16)

    # row tile: ~512 output pixels per matmul tile (sweep per TPU generation)
    th = rows_per_tile
    if th is None:
        th = max(1, min(Ho, 512 // max(1, Wo)))
    Ho_pad = ((Ho + th - 1) // th) * th
    if Ho_pad != Ho:
        xs = jnp.pad(xs, ((0, 0), (0, 0), (0, Ho_pad - Ho), (0, 0), (0, 0)))
    nt = Ho_pad // th
    grid = (N, nt)

    # ---- Pallas 1: fused conv (k*k bf16 MXU taps) + BN partial stats -------
    kernel1 = functools.partial(_conv_bn_stats_kernel, k=k, wo=Wo, stride=stride)
    y, psum, psq = pl.pallas_call(
        kernel1,
        out_shape=(jax.ShapeDtypeStruct((N, Ho_pad * Wo, Coutp), jnp.float32),
                   jax.ShapeDtypeStruct((N, nt * 8, Coutp), jnp.float32),
                   jax.ShapeDtypeStruct((N, nt * 8, Coutp), jnp.float32)),
        grid_spec=pltpu.PrefetchScalarGridSpec(
            num_scalar_prefetch=0, grid=grid,
            in_specs=[
                pl.BlockSpec((k, None, th, Wp, Cin),
                             lambda n, i: (0, n, i, 0, 0)),
                pl.BlockSpec((k, k, Cin, Coutp),
                             lambda n, i: (0, 0, 0, 0)),       # resident weights
            ],
            out_specs=(
                pl.BlockSpec((None, th * Wo, Coutp), lambda n, i: (n, i, 0)),
                pl.BlockSpec((None, 8, Coutp), lambda n, i: (n, i, 0)),
                pl.BlockSpec((None, 8, Coutp), lambda n, i: (n, i, 0)),
            )),
        compiler_params=pltpu.CompilerParams(
            dimension_semantics=("parallel", "parallel")),
    )(xs, wk)

    # ---- finish BN statistics (tiny cross-tile reduction, training-mode) ---
    M = N * Ho * Wo                    # zero-padded rows contribute 0 (no bias)
    sums = jnp.sum(psum, axis=(0, 1)) / 8.0
    sqs = jnp.sum(psq, axis=(0, 1)) / 8.0
    mean = sums / M
    var = jnp.maximum(sqs / M - mean * mean, 0.0)   # biased var, clamped >= 0
    inv_std = jax.lax.rsqrt(var + eps)
    gamma_p = jnp.pad(gamma.astype(jnp.float32), (0, Coutp - Cout))
    beta_p = jnp.pad(beta.astype(jnp.float32), (0, Coutp - Cout))
    scale = (gamma_p * inv_std).reshape(1, Coutp)
    shift = (beta_p - mean * gamma_p * inv_std).reshape(1, Coutp)

    # ---- Pallas 2: normalize + affine + LeakyReLU, in place on y -----------
    out = pl.pallas_call(
        _bn_act_kernel,
        out_shape=jax.ShapeDtypeStruct((N, Ho_pad * Wo, Coutp), jnp.float32),
        grid_spec=pltpu.PrefetchScalarGridSpec(
            num_scalar_prefetch=0, grid=grid,
            in_specs=[
                pl.BlockSpec((None, th * Wo, Coutp), lambda n, i: (n, i, 0)),
                pl.BlockSpec((1, Coutp), lambda n, i: (0, 0)),
                pl.BlockSpec((1, Coutp), lambda n, i: (0, 0)),
            ],
            out_specs=pl.BlockSpec((None, th * Wo, Coutp),
                                   lambda n, i: (n, i, 0))),
        compiler_params=pltpu.CompilerParams(
            dimension_semantics=("parallel", "parallel")),
        input_output_aliases={0: 0},
    )(y, scale, shift)

    # strip channel/row padding, back to NCHW (PyTorch interface parity)
    out = out.reshape(N, Ho_pad, Wo, Coutp)[:, :Ho, :, :Cout]
    return jnp.transpose(out, (0, 3, 1, 2))


# ---------------------------------------------------------------- reference -

def _reference(x, weight, gamma, beta, *, stride=1, eps=1e-5):
    k = weight.shape[2]
    y = jax.lax.conv_general_dilated(
        x, weight, window_strides=(stride, stride),
        padding=[(k // 2, k // 2), (k // 2, k // 2)],
        dimension_numbers=("NCHW", "OIHW", "NCHW"))
    mean = jnp.mean(y, axis=(0, 2, 3), keepdims=True)
    var = jnp.mean((y - mean) ** 2, axis=(0, 2, 3), keepdims=True)
    yh = (y - mean) * jax.lax.rsqrt(var + eps)
    yh = yh * gamma.reshape(1, -1, 1, 1) + beta.reshape(1, -1, 1, 1)
    return jnp.where(yh > 0, yh, 0.1 * yh)


# ------------------------------------------------------------------- main ---

if __name__ == "__main__":
    in_channels, out_channels, kernel_size, stride = 4, 8, 3, 1
    N, H, W = 2, 16, 16

    key = jax.random.PRNGKey(0)
    kx, kw = jax.random.split(key)

    x = jax.random.normal(kx, (N, in_channels, H, W), dtype=jnp.float32)
    weight = 0.1 * jax.random.normal(
        kw, (out_channels, in_channels, kernel_size, kernel_size),
        dtype=jnp.float32)
    gamma = jnp.ones((out_channels,), dtype=jnp.float32)    # BN default init
    beta = jnp.zeros((out_channels,), dtype=jnp.float32)

    out = conv_block(x, weight, gamma, beta, stride=stride)
    out = jax.block_until_ready(out)
    assert out.shape == (N, out_channels, H // stride, W // stride)

    ref = _reference(x, weight, gamma, beta, stride=stride)
    err = float(jnp.max(jnp.abs(out - ref)))
    assert err < 0.1, f"max abs err {err}"

    print("KERNEL_OK")
</pallas_src>

<mosaic_0001>
module attributes {stable_mosaic.version = 11 : i64} {
  func.func @_conv_bn_stats_kernel(%arg0: i32, %arg1: i32, %arg2: memref<3x1x16x18x4xbf16, #tpu.memory_space<vmem>>, %arg3: memref<3x3x4x128xbf16, #tpu.memory_space<vmem>>, %arg4: memref<1x256x128xf32, #tpu.memory_space<vmem>>, %arg5: memref<1x8x128xf32, #tpu.memory_space<vmem>>, %arg6: memref<1x8x128xf32, #tpu.memory_space<vmem>>) attributes {dimension_semantics = [#tpu.dimension_semantics<parallel>, #tpu.dimension_semantics<parallel>], iteration_bounds = array<i64: 2, 1>, scalar_prefetch = 0 : i64, scratch_operands = 0 : i64, tpu.core_type = #tpu.core_type<tc>, window_params = [{transform_indices = @transform_0, window_bounds = array<i64: 3, 1, 16, 18, 4>}, {pipeline_mode = #tpu.pipeline_mode<synchronous>, transform_indices = @transform_1, window_bounds = array<i64: 3, 3, 4, 128>}, {transform_indices = @transform_2, window_bounds = array<i64: 1, 256, 128>}, {transform_indices = @transform_3, window_bounds = array<i64: 1, 8, 128>}, {transform_indices = @transform_4, window_bounds = array<i64: 1, 8, 128>}]} {
    %cst = arith.constant 0.000000e+00 : f32
    %0 = vector.broadcast %cst : f32 to vector<256x128xf32>
    %c0 = arith.constant 0 : index
    %c0_0 = arith.constant 0 : index
    %c0_1 = arith.constant 0 : index
    %c0_2 = arith.constant 0 : index
    %c0_3 = arith.constant 0 : index
    %1 = vector.load %arg2[%c0, %c0_0, %c0_1, %c0_2, %c0_3] : memref<3x1x16x18x4xbf16, #tpu.memory_space<vmem>>, vector<1x1x16x18x4xbf16>
    %2 = vector.shape_cast %1 : vector<1x1x16x18x4xbf16> to vector<16x18x4xbf16>
    %3 = vector.extract_strided_slice %2 {offsets = [0, 0, 0], sizes = [16, 16, 4], strides = [1, 1, 1]} : vector<16x18x4xbf16> to vector<16x16x4xbf16>
    %4 = vector.shape_cast %3 : vector<16x16x4xbf16> to vector<256x4xbf16>
    %c0_4 = arith.constant 0 : index
    %c0_5 = arith.constant 0 : index
    %c0_6 = arith.constant 0 : index
    %c0_7 = arith.constant 0 : index
    %5 = vector.load %arg3[%c0_4, %c0_5, %c0_6, %c0_7] : memref<3x3x4x128xbf16, #tpu.memory_space<vmem>>, vector<1x1x4x128xbf16>
    %6 = vector.shape_cast %5 : vector<1x1x4x128xbf16> to vector<4x128xbf16>
    %cst_8 = arith.constant dense<0.000000e+00> : vector<256x128xf32>
    %7 = tpu.matmul %4, %6, %cst_8 {dimension_numbers = #tpu.dot_dimension_numbers<[1], [0], [0], [1], [0, 0, 1, 1], [], []>} : vector<256x4xbf16>, vector<4x128xbf16>, vector<256x128xf32> -> vector<256x128xf32>
    %8 = arith.addf %0, %7 : vector<256x128xf32>
    %9 = vector.extract_strided_slice %2 {offsets = [0, 1, 0], sizes = [16, 16, 4], strides = [1, 1, 1]} : vector<16x18x4xbf16> to vector<16x16x4xbf16>
    %10 = vector.shape_cast %9 : vector<16x16x4xbf16> to vector<256x4xbf16>
    %c0_9 = arith.constant 0 : index
    %c1 = arith.constant 1 : index
    %c0_10 = arith.constant 0 : index
    %c0_11 = arith.constant 0 : index
    %11 = vector.load %arg3[%c0_9, %c1, %c0_10, %c0_11] : memref<3x3x4x128xbf16, #tpu.memory_space<vmem>>, vector<1x1x4x128xbf16>
    %12 = vector.shape_cast %11 : vector<1x1x4x128xbf16> to vector<4x128xbf16>
    %cst_12 = arith.constant dense<0.000000e+00> : vector<256x128xf32>
    %13 = tpu.matmul %10, %12, %cst_12 {dimension_numbers = #tpu.dot_dimension_numbers<[1], [0], [0], [1], [0, 0, 1, 1], [], []>} : vector<256x4xbf16>, vector<4x128xbf16>, vector<256x128xf32> -> vector<256x128xf32>
    %14 = arith.addf %8, %13 : vector<256x128xf32>
    %15 = vector.extract_strided_slice %2 {offsets = [0, 2, 0], sizes = [16, 16, 4], strides = [1, 1, 1]} : vector<16x18x4xbf16> to vector<16x16x4xbf16>
    %16 = vector.shape_cast %15 : vector<16x16x4xbf16> to vector<256x4xbf16>
    %c0_13 = arith.constant 0 : index
    %c2 = arith.constant 2 : index
    %c0_14 = arith.constant 0 : index
    %c0_15 = arith.constant 0 : index
    %17 = vector.load %arg3[%c0_13, %c2, %c0_14, %c0_15] : memref<3x3x4x128xbf16, #tpu.memory_space<vmem>>, vector<1x1x4x128xbf16>
    %18 = vector.shape_cast %17 : vector<1x1x4x128xbf16> to vector<4x128xbf16>
    %cst_16 = arith.constant dense<0.000000e+00> : vector<256x128xf32>
    %19 = tpu.matmul %16, %18, %cst_16 {dimension_numbers = #tpu.dot_dimension_numbers<[1], [0], [0], [1], [0, 0, 1, 1], [], []>} : vector<256x4xbf16>, vector<4x128xbf16>, vector<256x128xf32> -> vector<256x128xf32>
    %20 = arith.addf %14, %19 : vector<256x128xf32>
    %c1_17 = arith.constant 1 : index
    %c0_18 = arith.constant 0 : index
    %c0_19 = arith.constant 0 : index
    %c0_20 = arith.constant 0 : index
    %c0_21 = arith.constant 0 : index
    %21 = vector.load %arg2[%c1_17, %c0_18, %c0_19, %c0_20, %c0_21] : memref<3x1x16x18x4xbf16, #tpu.memory_space<vmem>>, vector<1x1x16x18x4xbf16>
    %22 = vector.shape_cast %21 : vector<1x1x16x18x4xbf16> to vector<16x18x4xbf16>
    %23 = vector.extract_strided_slice %22 {offsets = [0, 0, 0], sizes = [16, 16, 4], strides = [1, 1, 1]} : vector<16x18x4xbf16> to vector<16x16x4xbf16>
    %24 = vector.shape_cast %23 : vector<16x16x4xbf16> to vector<256x4xbf16>
    %c1_22 = arith.constant 1 : index
    %c0_23 = arith.constant 0 : index
    %c0_24 = arith.constant 0 : index
    %c0_25 = arith.constant 0 : index
    %25 = vector.load %arg3[%c1_22, %c0_23, %c0_24, %c0_25] : memref<3x3x4x128xbf16, #tpu.memory_space<vmem>>, vector<1x1x4x128xbf16>
    %26 = vector.shape_cast %25 : vector<1x1x4x128xbf16> to vector<4x128xbf16>
    %cst_26 = arith.constant dense<0.000000e+00> : vector<256x128xf32>
    %27 = tpu.matmul %24, %26, %cst_26 {dimension_numbers = #tpu.dot_dimension_numbers<[1], [0], [0], [1], [0, 0, 1, 1], [], []>} : vector<256x4xbf16>, vector<4x128xbf16>, vector<256x128xf32> -> vector<256x128xf32>
    %28 = arith.addf %20, %27 : vector<256x128xf32>
    %29 = vector.extract_strided_slice %22 {offsets = [0, 1, 0], sizes = [16, 16, 4], strides = [1, 1, 1]} : vector<16x18x4xbf16> to vector<16x16x4xbf16>
    %30 = vector.shape_cast %29 : vector<16x16x4xbf16> to vector<256x4xbf16>
    %c1_27 = arith.constant 1 : index
    %c1_28 = arith.constant 1 : index
    %c0_29 = arith.constant 0 : index
    %c0_30 = arith.constant 0 : index
    %31 = vector.load %arg3[%c1_27, %c1_28, %c0_29, %c0_30] : memref<3x3x4x128xbf16, #tpu.memory_space<vmem>>, vector<1x1x4x128xbf16>
    %32 = vector.shape_cast %31 : vector<1x1x4x128xbf16> to vector<4x128xbf16>
    %cst_31 = arith.constant dense<0.000000e+00> : vector<256x128xf32>
    %33 = tpu.matmul %30, %32, %cst_31 {dimension_numbers = #tpu.dot_dimension_numbers<[1], [0], [0], [1], [0, 0, 1, 1], [], []>} : vector<256x4xbf16>, vector<4x128xbf16>, vector<256x128xf32> -> vector<256x128xf32>
    %34 = arith.addf %28, %33 : vector<256x128xf32>
    %35 = vector.extract_strided_slice %22 {offsets = [0, 2, 0], sizes = [16, 16, 4], strides = [1, 1, 1]} : vector<16x18x4xbf16> to vector<16x16x4xbf16>
    %36 = vector.shape_cast %35 : vector<16x16x4xbf16> to vector<256x4xbf16>
    %c1_32 = arith.constant 1 : index
    %c2_33 = arith.constant 2 : index
    %c0_34 = arith.constant 0 : index
    %c0_35 = arith.constant 0 : index
    %37 = vector.load %arg3[%c1_32, %c2_33, %c0_34, %c0_35] : memref<3x3x4x128xbf16, #tpu.memory_space<vmem>>, vector<1x1x4x128xbf16>
    %38 = vector.shape_cast %37 : vector<1x1x4x128xbf16> to vector<4x128xbf16>
    %cst_36 = arith.constant dense<0.000000e+00> : vector<256x128xf32>
    %39 = tpu.matmul %36, %38, %cst_36 {dimension_numbers = #tpu.dot_dimension_numbers<[1], [0], [0], [1], [0, 0, 1, 1], [], []>} : vector<256x4xbf16>, vector<4x128xbf16>, vector<256x128xf32> -> vector<256x128xf32>
    %40 = arith.addf %34, %39 : vector<256x128xf32>
    %c2_37 = arith.constant 2 : index
    %c0_38 = arith.constant 0 : index
    %c0_39 = arith.constant 0 : index
    %c0_40 = arith.constant 0 : index
    %c0_41 = arith.constant 0 : index
    %41 = vector.load %arg2[%c2_37, %c0_38, %c0_39, %c0_40, %c0_41] : memref<3x1x16x18x4xbf16, #tpu.memory_space<vmem>>, vector<1x1x16x18x4xbf16>
    %42 = vector.shape_cast %41 : vector<1x1x16x18x4xbf16> to vector<16x18x4xbf16>
    %43 = vector.extract_strided_slice %42 {offsets = [0, 0, 0], sizes = [16, 16, 4], strides = [1, 1, 1]} : vector<16x18x4xbf16> to vector<16x16x4xbf16>
    %44 = vector.shape_cast %43 : vector<16x16x4xbf16> to vector<256x4xbf16>
    %c2_42 = arith.constant 2 : index
    %c0_43 = arith.constant 0 : index
    %c0_44 = arith.constant 0 : index
    %c0_45 = arith.constant 0 : index
    %45 = vector.load %arg3[%c2_42, %c0_43, %c0_44, %c0_45] : memref<3x3x4x128xbf16, #tpu.memory_space<vmem>>, vector<1x1x4x128xbf16>
    %46 = vector.shape_cast %45 : vector<1x1x4x128xbf16> to vector<4x128xbf16>
    %cst_46 = arith.constant dense<0.000000e+00> : vector<256x128xf32>
    %47 = tpu.matmul %44, %46, %cst_46 {dimension_numbers = #tpu.dot_dimension_numbers<[1], [0], [0], [1], [0, 0, 1, 1], [], []>} : vector<256x4xbf16>, vector<4x128xbf16>, vector<256x128xf32> -> vector<256x128xf32>
    %48 = arith.addf %40, %47 : vector<256x128xf32>
    %49 = vector.extract_strided_slice %42 {offsets = [0, 1, 0], sizes = [16, 16, 4], strides = [1, 1, 1]} : vector<16x18x4xbf16> to vector<16x16x4xbf16>
    %50 = vector.shape_cast %49 : vector<16x16x4xbf16> to vector<256x4xbf16>
    %c2_47 = arith.constant 2 : index
    %c1_48 = arith.constant 1 : index
    %c0_49 = arith.constant 0 : index
    %c0_50 = arith.constant 0 : index
    %51 = vector.load %arg3[%c2_47, %c1_48, %c0_49, %c0_50] : memref<3x3x4x128xbf16, #tpu.memory_space<vmem>>, vector<1x1x4x128xbf16>
    %52 = vector.shape_cast %51 : vector<1x1x4x128xbf16> to vector<4x128xbf16>
    %cst_51 = arith.constant dense<0.000000e+00> : vector<256x128xf32>
    %53 = tpu.matmul %50, %52, %cst_51 {dimension_numbers = #tpu.dot_dimension_numbers<[1], [0], [0], [1], [0, 0, 1, 1], [], []>} : vector<256x4xbf16>, vector<4x128xbf16>, vector<256x128xf32> -> vector<256x128xf32>
    %54 = arith.addf %48, %53 : vector<256x128xf32>
    %55 = vector.extract_strided_slice %42 {offsets = [0, 2, 0], sizes = [16, 16, 4], strides = [1, 1, 1]} : vector<16x18x4xbf16> to vector<16x16x4xbf16>
    %56 = vector.shape_cast %55 : vector<16x16x4xbf16> to vector<256x4xbf16>
    %c2_52 = arith.constant 2 : index
    %c2_53 = arith.constant 2 : index
    %c0_54 = arith.constant 0 : index
    %c0_55 = arith.constant 0 : index
    %57 = vector.load %arg3[%c2_52, %c2_53, %c0_54, %c0_55] : memref<3x3x4x128xbf16, #tpu.memory_space<vmem>>, vector<1x1x4x128xbf16>
    %58 = vector.shape_cast %57 : vector<1x1x4x128xbf16> to vector<4x128xbf16>
    %cst_56 = arith.constant dense<0.000000e+00> : vector<256x128xf32>
    %59 = tpu.matmul %56, %58, %cst_56 {dimension_numbers = #tpu.dot_dimension_numbers<[1], [0], [0], [1], [0, 0, 1, 1], [], []>} : vector<256x4xbf16>, vector<4x128xbf16>, vector<256x128xf32> -> vector<256x128xf32>
    %60 = arith.addf %54, %59 : vector<256x128xf32>
    %c0_57 = arith.constant 0 : index
    %c0_58 = arith.constant 0 : index
    %c0_59 = arith.constant 0 : index
    %61 = vector.load %arg4[%c0_57, %c0_58, %c0_59] : memref<1x256x128xf32, #tpu.memory_space<vmem>>, vector<1x256x128xf32>
    %62 = vector.shape_cast %61 : vector<1x256x128xf32> to vector<256x128xf32>
    %63 = vector.shape_cast %60 : vector<256x128xf32> to vector<1x256x128xf32>
    tpu.vector_store %arg4[%c0_57, %c0_58, %c0_59], %63 {strides = array<i32>} : memref<1x256x128xf32, #tpu.memory_space<vmem>>, vector<1x256x128xf32>,
    %cst_60 = arith.constant dense<0.000000e+00> : vector<128xf32>
    %64 = vector.multi_reduction <add>, %60, %cst_60 [0] : vector<256x128xf32> to vector<128xf32>
    %65 = vector.shape_cast %64 : vector<128xf32> to vector<1x128xf32>
    %66 = arith.mulf %60, %60 : vector<256x128xf32>
    %cst_61 = arith.constant dense<0.000000e+00> : vector<128xf32>
    %67 = vector.multi_reduction <add>, %66, %cst_61 [0] : vector<256x128xf32> to vector<128xf32>
    %68 = vector.shape_cast %67 : vector<128xf32> to vector<1x128xf32>
    %69 = vector.shape_cast %65 : vector<1x128xf32> to vector<1x128xf32>
    %70 = vector.broadcast %69 : vector<1x128xf32> to vector<8x128xf32>
    %c0_62 = arith.constant 0 : index
    %c0_63 = arith.constant 0 : index
    %c0_64 = arith.constant 0 : index
    %71 = vector.load %arg5[%c0_62, %c0_63, %c0_64] : memref<1x8x128xf32, #tpu.memory_space<vmem>>, vector<1x8x128xf32>
    %72 = vector.shape_cast %71 : vector<1x8x128xf32> to vector<8x128xf32>
    %73 = vector.shape_cast %70 : vector<8x128xf32> to vector<1x8x128xf32>
    tpu.vector_store %arg5[%c0_62, %c0_63, %c0_64], %73 {strides = array<i32>} : memref<1x8x128xf32, #tpu.memory_space<vmem>>, vector<1x8x128xf32>,
    %74 = vector.shape_cast %68 : vector<1x128xf32> to vector<1x128xf32>
    %75 = vector.broadcast %74 : vector<1x128xf32> to vector<8x128xf32>
    %c0_65 = arith.constant 0 : index
    %c0_66 = arith.constant 0 : index
    %c0_67 = arith.constant 0 : index
    %76 = vector.load %arg6[%c0_65, %c0_66, %c0_67] : memref<1x8x128xf32, #tpu.memory_space<vmem>>, vector<1x8x128xf32>
    %77 = vector.shape_cast %76 : vector<1x8x128xf32> to vector<8x128xf32>
    %78 = vector.shape_cast %75 : vector<8x128xf32> to vector<1x8x128xf32>
    tpu.vector_store %arg6[%c0_65, %c0_66, %c0_67], %78 {strides = array<i32>} : memref<1x8x128xf32, #tpu.memory_space<vmem>>, vector<1x8x128xf32>,
    return
  }
  func.func @transform_0(%arg0: i32, %arg1: i32) -> (i32, i32, i32, i32, i32) {
    %c0_i32 = arith.constant 0 : i32
    %c0_i32_0 = arith.constant 0 : i32
    %c0_i32_1 = arith.constant 0 : i32
    %c0_i32_2 = arith.constant 0 : i32
    return %c0_i32, %arg0, %arg1, %c0_i32_0, %c0_i32_1 : i32, i32, i32, i32, i32
  }
  func.func @transform_1(%arg0: i32, %arg1: i32) -> (i32, i32, i32, i32) {
    %c0_i32 = arith.constant 0 : i32
    %c0_i32_0 = arith.constant 0 : i32
    %c0_i32_1 = arith.constant 0 : i32
    %c0_i32_2 = arith.constant 0 : i32
    %c0_i32_3 = arith.constant 0 : i32
    return %c0_i32, %c0_i32_0, %c0_i32_1, %c0_i32_2 : i32, i32, i32, i32
  }
  func.func @transform_2(%arg0: i32, %arg1: i32) -> (i32, i32, i32) {
    %c0_i32 = arith.constant 0 : i32
    %c0_i32_0 = arith.constant 0 : i32
    return %arg0, %arg1, %c0_i32 : i32, i32, i32
  }
  func.func @transform_3(%arg0: i32, %arg1: i32) -> (i32, i32, i32) {
    %c0_i32 = arith.constant 0 : i32
    %c0_i32_0 = arith.constant 0 : i32
    return %arg0, %arg1, %c0_i32 : i32, i32, i32
  }
  func.func @transform_4(%arg0: i32, %arg1: i32) -> (i32, i32, i32) {
    %c0_i32 = arith.constant 0 : i32
    %c0_i32_0 = arith.constant 0 : i32
    return %arg0, %arg1, %c0_i32 : i32, i32, i32
  }
}

module attributes {stable_mosaic.version = 11 : i64} {
  func.func @_bn_act_kernel(%arg0: i32, %arg1: i32, %arg2: memref<1x256x128xf32, #tpu.memory_space<vmem>>, %arg3: memref<1x128xf32, #tpu.memory_space<vmem>>, %arg4: memref<1x128xf32, #tpu.memory_space<vmem>>, %arg5: memref<1x256x128xf32, #tpu.memory_space<vmem>>) attributes {dimension_semantics = [#tpu.dimension_semantics<parallel>, #tpu.dimension_semantics<parallel>], iteration_bounds = array<i64: 2, 1>, scalar_prefetch = 0 : i64, scratch_operands = 0 : i64, tpu.core_type = #tpu.core_type<tc>, window_params = [{transform_indices = @transform_0, window_bounds = array<i64: 1, 256, 128>}, {pipeline_mode = #tpu.pipeline_mode<synchronous>, transform_indices = @transform_1, window_bounds = array<i64: 1, 128>}, {pipeline_mode = #tpu.pipeline_mode<synchronous>, transform_indices = @transform_2, window_bounds = array<i64: 1, 128>}, {transform_indices = @transform_3, window_bounds = array<i64: 1, 256, 128>}]} {
    %c0 = arith.constant 0 : index
    %c0_0 = arith.constant 0 : index
    %c0_1 = arith.constant 0 : index
    %0 = vector.load %arg2[%c0, %c0_0, %c0_1] : memref<1x256x128xf32, #tpu.memory_space<vmem>>, vector<1x256x128xf32>
    %1 = vector.shape_cast %0 : vector<1x256x128xf32> to vector<256x128xf32>
    %c0_2 = arith.constant 0 : index
    %c0_3 = arith.constant 0 : index
    %2 = vector.load %arg3[%c0_2, %c0_3] : memref<1x128xf32, #tpu.memory_space<vmem>>, vector<1x128xf32>
    %3 = vector.broadcast %2 : vector<1x128xf32> to vector<256x128xf32>
    %4 = arith.mulf %1, %3 : vector<256x128xf32>
    %c0_4 = arith.constant 0 : index
    %c0_5 = arith.constant 0 : index
    %5 = vector.load %arg4[%c0_4, %c0_5] : memref<1x128xf32, #tpu.memory_space<vmem>>, vector<1x128xf32>
    %6 = vector.broadcast %5 : vector<1x128xf32> to vector<256x128xf32>
    %7 = arith.addf %4, %6 : vector<256x128xf32>
    %cst = arith.constant 1.000000e-01 : f32
    %8 = vector.broadcast %cst : f32 to vector<256x128xf32>
    %9 = arith.mulf %8, %7 : vector<256x128xf32>
    %10 = arith.maximumf %7, %9 : vector<256x128xf32>
    %c0_6 = arith.constant 0 : index
    %c0_7 = arith.constant 0 : index
    %c0_8 = arith.constant 0 : index
    %11 = vector.load %arg5[%c0_6, %c0_7, %c0_8] : memref<1x256x128xf32, #tpu.memory_space<vmem>>, vector<1x256x128xf32>
    %12 = vector.shape_cast %11 : vector<1x256x128xf32> to vector<256x128xf32>
    %13 = vector.shape_cast %10 : vector<256x128xf32> to vector<1x256x128xf32>
    tpu.vector_store %arg5[%c0_6, %c0_7, %c0_8], %13 {strides = array<i32>} : memref<1x256x128xf32, #tpu.memory_space<vmem>>, vector<1x256x128xf32>,
    return
  }
  func.func @transform_0(%arg0: i32, %arg1: i32) -> (i32, i32, i32) {
    %c0_i32 = arith.constant 0 : i32
    %c0_i32_0 = arith.constant 0 : i32
    return %arg0, %arg1, %c0_i32 : i32, i32, i32
  }
  func.func @transform_1(%arg0: i32, %arg1: i32) -> (i32, i32) {
    %c0_i32 = arith.constant 0 : i32
    %c0_i32_0 = arith.constant 0 : i32
    %c0_i32_1 = arith.constant 0 : i32
    return %c0_i32, %c0_i32_0 : i32, i32
  }
  func.func @transform_2(%arg0: i32, %arg1: i32) -> (i32, i32) {
    %c0_i32 = arith.constant 0 : i32
    %c0_i32_0 = arith.constant 0 : i32
    %c0_i32_1 = arith.constant 0 : i32
    return %c0_i32, %c0_i32_0 : i32, i32
  }
  func.func @transform_3(%arg0: i32, %arg1: i32) -> (i32, i32, i32) {
    %c0_i32 = arith.constant 0 : i32
    %c0_i32_0 = arith.constant 0 : i32
    return %arg0, %arg1, %c0_i32 : i32, i32, i32
  }
}

</mosaic_0001>

<bundles_post_ra>
// kernel: conv_block.3
= control target key start
LH: loop header
LB: loop body
LE: loop exit
PB: predicated region body
PF: predicated region fallthrough
CT: control target
= control target key end

     0   :  { %s586_s12 = smov 0   ;;  %s588_s13 = smov 0   ;;  %s808_s0 = inlined_call_operand.vmem [shape: f32[2,256,128], index: 0, kind: input, shape index: {}, may-alias: {0,3}]   ;;  %s809_s1 = inlined_call_operand.vmem [shape: f32[1,128], index: 1, kind: input, shape index: {}]   ;;  %s810_s2 = inlined_call_operand.vmem [shape: f32[1,128], index: 2, kind: input, shape index: {}]   ;;  %s811_s3 = inlined_call_operand.vmem [shape: f32[2,256,128], index: 3, kind: output, shape index: {}, may-alias: {0,3}]  }
   0x1   :  { %s590_s14 = smov 0  }
   0x2 LB: > { %s25_s15 = sadd.s32 1, %s560_s13  ;;  %p507_p0 = scmp.ge.s32.totalorder %s564_s14, 1  ;;  %s564_s14 = sphi %s590_s14, %s13_s14   ;;  %s560_s13 = sphi %s588_s13, %s813_s13   ;;  %s556_s12 = sphi %s586_s12, %s812_s12  }
   0x3   : > { %p27_p1 = scmp.ge.s32.totalorder %s25_s15, 2  ;;  %p158_p2 = scmp.lt.s32.totalorder %s564_s14, 3 }
   0x5   : > { %s815_s15 = smov (%p27_p1, %s25_s15), 0  ;;  %p159_p3 = pnand %p507_p0, %p158_p2 }
   0x6   : > { %p191_p4 = scmp.lt.s32.totalorder (!%p159_p3), %s556_s12, 1  ;;  %v610_v0 = vld [vmem:[%s809_s1] ss:$0 sm:$0xff] (!%p159_p3) }
   0x7   : > { %162 = sbr.rel (%p159_p3) target bundleno = 55 (0x37), region = 32  ;;  %v622_v1 = vld [vmem:[%s810_s2] ss:$0 sm:$0xff] (!%p159_p3) }
   0xe   : > { %s817_s12 = smov (!%p191_p4, %s556_s12), 1 }
   0xf   : > { %s516_s16 = sshll.u32 %s817_s12, 8 }
  0x10   : > { %s617_s21 = scalar_lea.vmem %s808_s0, %s516_s16  ;;  %s668_s26 = scalar_lea.vmem %s811_s3, %s516_s16 }
  0x11   : > { %v210_v2 = vld [vmem:[%s617_s21] sm:$0xff]  ;;  %v211_v3 = vld [vmem:[%s617_s21 + $0x8] sm:$0xff]  ;;  %v212_v4 = vld [vmem:[%s617_s21 + $0x10] sm:$0xff] }
  0x12   : > { %v213_v5 = vld [vmem:[%s617_s21 + $0x18] sm:$0xff]  ;;  %v214_v6 = vld [vmem:[%s617_s21 + $0x20] sm:$0xff]  ;;  %v215_v7 = vld [vmem:[%s617_s21 + $0x28] sm:$0xff]  ;;  %v249_v8 = vmul.f32 %v610_v0, %v210_v2  ;;  %v250_v9 = vmul.f32 %v610_v0, %v211_v3  ;;  %v251_v10 = vmul.f32 %v610_v0, %v212_v4 }
  0x13   : > { %v216_v11 = vld [vmem:[%s617_s21 + $0x30] sm:$0xff]  ;;  %v217_v12 = vld [vmem:[%s617_s21 + $0x38] sm:$0xff]  ;;  %v218_v13 = vld [vmem:[%s617_s21 + $0x40] sm:$0xff]  ;;  %v252_v14 = vmul.f32 %v610_v0, %v213_v5  ;;  %v253_v15 = vmul.f32 %v610_v0, %v214_v6  ;;  %v254_v16 = vmul.f32 %v610_v0, %v215_v7 }
  0x14   : > { %v219_v17 = vld [vmem:[%s617_s21 + $0x48] sm:$0xff]  ;;  %v220_v18 = vld [vmem:[%s617_s21 + $0x50] sm:$0xff]  ;;  %v221_v19 = vld [vmem:[%s617_s21 + $0x58] sm:$0xff]  ;;  %v288_v20 = vadd.f32 %v622_v1, %v249_v8  ;;  %v289_v21 = vadd.f32 %v622_v1, %v250_v9  ;;  %v290_v22 = vadd.f32 %v622_v1, %v251_v10  ;;  %v255_v23 = vmul.f32 %v610_v0, %v216_v11 }
  0x15   : > { %v291_v24 = vadd.f32 %v622_v1, %v252_v14  ;;  %v292_v25 = vadd.f32 %v622_v1, %v253_v15  ;;  %v649_v26 = vadd.f32 %v622_v1, %v254_v16  ;;  %v256_v27 = vmul.f32 %v610_v0, %v217_v12  ;;  %v222_v32 = vld [vmem:[%s617_s21 + $0x60] sm:$0xff]  ;;  %v223_v33 = vld [vmem:[%s617_s21 + $0x68] sm:$0xff]  ;;  %v224_v38 = vld [vmem:[%s617_s21 + $0x70] sm:$0xff] }
  0x16   : > { %v320_v28 = vmul.f32 0.1, %v288_v20  ;;  %v294_v29 = vadd.f32 %v622_v1, %v255_v23  ;;  %v257_v30 = vmul.f32 %v610_v0, %v218_v13  ;;  %v258_v31 = vmul.f32 %v610_v0, %v219_v17  ;;  %v225_v43 = vld [vmem:[%s617_s21 + $0x78] sm:$0xff]  ;;  %v226_v44 = vld [vmem:[%s617_s21 + $0x80] sm:$0xff]  ;;  %v227_v45 = vld [vmem:[%s617_s21 + $0x88] sm:$0xff] }
  0x17   : > { %v321_v34 = vmul.f32 0.1, %v289_v21  ;;  %v295_v35 = vadd.f32 %v622_v1, %v256_v27  ;;  %v259_v36 = vmul.f32 %v610_v0, %v220_v18  ;;  %v260_v37 = vmul.f32 %v610_v0, %v221_v19  ;;  %v228_v46 = vld [vmem:[%s617_s21 + $0x90] sm:$0xff]  ;;  %v229_v47 = vld [vmem:[%s617_s21 + $0x98] sm:$0xff]  ;;  %v676_v48 = vld [vmem:[%s617_s21 + $0xa0] sm:$0xff] }
  0x18   : > { %v352_v39 = vmax.f32 %v288_v20, %v320_v28  ;;  %v322_v40 = vmul.f32 0.1, %v290_v22  ;;  %v296_v41 = vadd.f32 %v622_v1, %v257_v30  ;;  %v297_v42 = vadd.f32 %v622_v1, %v258_v31  ;;  %v679_v49 = vld [vmem:[%s617_s21 + $0xa8] sm:$0xff]  ;;  %v682_v50 = vld [vmem:[%s617_s21 + $0xb0] sm:$0xff]  ;;  %v685_v51 = vld [vmem:[%s617_s21 + $0xb8] sm:$0xff] }
  0x19   : > { %v688_v52 = vld [vmem:[%s617_s21 + $0xc0] sm:$0xff]  ;;  %v691_v53 = vld [vmem:[%s617_s21 + $0xc8] sm:$0xff]  ;;  %v694_v54 = vld [vmem:[%s617_s21 + $0xd0] sm:$0xff]  ;;  %v353_v55 = vmax.f32 %v289_v21, %v321_v34  ;;  %v323_v56 = vmul.f32 0.1, %v291_v24  ;;  %v298_v57 = vadd.f32 %v622_v1, %v259_v36  ;;  %v299_v58 = vadd.f32 %v622_v1, %v260_v37 }
  0x1a   : > { %v699_v59 = vld [vmem:[%s617_s21 + $0xd8] sm:$0xff]  ;;  %v702_v60 = vld [vmem:[%s617_s21 + $0xe0] sm:$0xff]  ;;  %v705_v61 = vld [vmem:[%s617_s21 + $0xe8] sm:$0xff]  ;;  %v354_v62 = vmax.f32 %v290_v22, %v322_v40  ;;  %v324_v63 = vmul.f32 0.1, %v292_v25  ;;  %v261_v2 = vmul.f32 %v610_v0, %v222_v32  ;;  %v262_v3 = vmul.f32 %v610_v0, %v223_v33 }
  0x1b   : > { %v710_v4 = vld [vmem:[%s617_s21 + $0xf0] sm:$0xff]  ;;  %v713_v5 = vld [vmem:[%s617_s21 + $0xf8] sm:$0xff]  ;;  %v355_v6 = vmax.f32 %v291_v24, %v323_v56  ;;  %v325_v7 = vmul.f32 0.1, %v649_v26  ;;  %v326_v8 = vmul.f32 0.1, %v294_v29  ;;  %v263_v9 = vmul.f32 %v610_v0, %v224_v38 }
  0x1c   : > { %384 = vst [vmem:[%s668_s26] sm:$0xff] %v352_v39  ;;  %385 = vst [vmem:[%s668_s26 + $0x8] sm:$0xff] %v353_v55  ;;  %v356_v10 = vmax.f32 %v292_v25, %v324_v63  ;;  %v327_v11 = vmul.f32 0.1, %v295_v35  ;;  %v328_v12 = vmul.f32 0.1, %v296_v41  ;;  %v300_v21 = vadd.f32 %v622_v1, %v261_v2 }
  0x1d   : > { %386 = vst [vmem:[%s668_s26 + $0x10] sm:$0xff] %v354_v62  ;;  %v329_v13 = vmul.f32 0.1, %v297_v42  ;;  %387 = vst [vmem:[%s668_s26 + $0x18] sm:$0xff] %v355_v6  ;;  %v357_v14 = vmax.f32 %v649_v26, %v325_v7  ;;  %v358_v15 = vmax.f32 %v294_v29, %v326_v8  ;;  %v330_v16 = vmul.f32 0.1, %v298_v57 }
  0x1e   : > { %v331_v17 = vmul.f32 0.1, %v299_v58  ;;  %388 = vst [vmem:[%s668_s26 + $0x20] sm:$0xff] %v356_v10  ;;  %v359_v18 = vmax.f32 %v295_v35, %v327_v11  ;;  %v360_v19 = vmax.f32 %v296_v41, %v328_v12  ;;  %v301_v24 = vadd.f32 %v622_v1, %v262_v3 }
  0x1f   : > { %v361_v20 = vmax.f32 %v297_v42, %v329_v13  ;;  %389 = vst [vmem:[%s668_s26 + $0x28] sm:$0xff] %v357_v14  ;;  %390 = vst [vmem:[%s668_s26 + $0x30] sm:$0xff] %v358_v15  ;;  %v362_v22 = vmax.f32 %v298_v57, %v330_v16  ;;  %v302_v25 = vadd.f32 %v622_v1, %v263_v9  ;;  %v332_v26 = vmul.f32 0.1, %v300_v21 }
  0x20   : > { %v363_v23 = vmax.f32 %v299_v58, %v331_v17  ;;  %391 = vst [vmem:[%s668_s26 + $0x38] sm:$0xff] %v359_v18  ;;  %392 = vst [vmem:[%s668_s26 + $0x40] sm:$0xff] %v360_v19  ;;  %v264_v27 = vmul.f32 %v610_v0, %v225_v43  ;;  %v265_v28 = vmul.f32 %v610_v0, %v226_v44  ;;  %v333_v30 = vmul.f32 0.1, %v301_v24 }
  0x21   : > { %393 = vst [vmem:[%s668_s26 + $0x48] sm:$0xff] %v361_v20  ;;  %v266_v29 = vmul.f32 %v610_v0, %v227_v45  ;;  %394 = vst [vmem:[%s668_s26 + $0x50] sm:$0xff] %v362_v22  ;;  %v334_v31 = vmul.f32 0.1, %v302_v25  ;;  %v267_v32 = vmul.f32 %v610_v0, %v228_v46  ;;  %v268_v33 = vmul.f32 %v610_v0, %v229_v47 }
  0x22   : > { %395 = vst [vmem:[%s668_s26 + $0x58] sm:$0xff] %v363_v23  ;;  %v364_v34 = vmax.f32 %v300_v21, %v332_v26  ;;  %v303_v35 = vadd.f32 %v622_v1, %v264_v27  ;;  %v304_v36 = vadd.f32 %v622_v1, %v265_v28  ;;  %v365_v38 = vmax.f32 %v301_v24, %v333_v30 }
  0x23   : > { %v305_v37 = vadd.f32 %v622_v1, %v266_v29  ;;  %v366_v39 = vmax.f32 %v302_v25, %v334_v31  ;;  %v306_v40 = vadd.f32 %v622_v1, %v267_v32  ;;  %v307_v41 = vadd.f32 %v622_v1, %v268_v33 }
  0x24   : > { %396 = vst [vmem:[%s668_s26 + $0x60] sm:$0xff] %v364_v34  ;;  %v335_v42 = vmul.f32 0.1, %v303_v35  ;;  %v336_v43 = vmul.f32 0.1, %v304_v36  ;;  %v269_v45 = vmul.f32 %v610_v0, %v676_v48  ;;  %397 = vst [vmem:[%s668_s26 + $0x68] sm:$0xff] %v365_v38  ;;  %v270_v55 = vmul.f32 %v610_v0, %v679_v49 }
  0x25   : > { %v337_v44 = vmul.f32 0.1, %v305_v37  ;;  %398 = vst [vmem:[%s668_s26 + $0x70] sm:$0xff] %v366_v39  ;;  %v338_v46 = vmul.f32 0.1, %v306_v40  ;;  %v271_v56 = vmul.f32 %v610_v0, %v682_v50  ;;  %v272_v50 = vmul.f32 %v610_v0, %v685_v51 }
  0x26   : > { %v339_v47 = vmul.f32 0.1, %v307_v41  ;;  %v367_v57 = vmax.f32 %v303_v35, %v335_v42  ;;  %v368_v58 = vmax.f32 %v304_v36, %v336_v43  ;;  %v308_v63 = vadd.f32 %v622_v1, %v269_v45 }
  0x27   : > { %v369_v62 = vmax.f32 %v305_v37, %v337_v44  ;;  %v370_v48 = vmax.f32 %v306_v40, %v338_v46  ;;  %v309_v3 = vadd.f32 %v622_v1, %v270_v55  ;;  %v310_v6 = vadd.f32 %v622_v1, %v271_v56 }
  0x28   : > { %v371_v2 = vmax.f32 %v307_v41, %v339_v47  ;;  %399 = vst [vmem:[%s668_s26 + $0x78] sm:$0xff] %v367_v57  ;;  %400 = vst [vmem:[%s668_s26 + $0x80] sm:$0xff] %v368_v58  ;;  %v340_v49 = vmul.f32 0.1, %v308_v63  ;;  %v273_v7 = vmul.f32 %v610_v0, %v688_v52  ;;  %v274_v8 = vmul.f32 %v610_v0, %v691_v53 }
  0x29   : > { %401 = vst [vmem:[%s668_s26 + $0x88] sm:$0xff] %v369_v62  ;;  %402 = vst [vmem:[%s668_s26 + $0x90] sm:$0xff] %v370_v48  ;;  %v341_v9 = vmul.f32 0.1, %v309_v3  ;;  %v342_v10 = vmul.f32 0.1, %v310_v6  ;;  %v275_v11 = vmul.f32 %v610_v0, %v694_v54  ;;  %v276_v12 = vmul.f32 %v610_v0, %v699_v59 }
  0x2a   : > { %403 = vst [vmem:[%s668_s26 + $0x98] sm:$0xff] %v371_v2  ;;  %v372_v51 = vmax.f32 %v308_v63, %v340_v49  ;;  %v311_v13 = vadd.f32 %v622_v1, %v272_v50  ;;  %v312_v52 = vadd.f32 %v622_v1, %v273_v7  ;;  %v313_v14 = vadd.f32 %v622_v1, %v274_v8 }
  0x2b   : > { %v373_v53 = vmax.f32 %v309_v3, %v341_v9  ;;  %v374_v15 = vmax.f32 %v310_v6, %v342_v10  ;;  %v314_v16 = vadd.f32 %v622_v1, %v275_v11  ;;  %v315_v17 = vadd.f32 %v622_v1, %v276_v12 }
  0x2c   : > { %404 = vst [vmem:[%s668_s26 + $0xa0] sm:$0xff] %v372_v51  ;;  %v343_v18 = vmul.f32 0.1, %v311_v13  ;;  %v344_v54 = vmul.f32 0.1, %v312_v52  ;;  %v277_v59 = vmul.f32 %v610_v0, %v702_v60  ;;  %v278_v22 = vmul.f32 %v610_v0, %v705_v61 }
  0x2d   : > { %v345_v19 = vmul.f32 0.1, %v313_v14  ;;  %405 = vst [vmem:[%s668_s26 + $0xa8] sm:$0xff] %v373_v53  ;;  %406 = vst [vmem:[%s668_s26 + $0xb0] sm:$0xff] %v374_v15  ;;  %v346_v20 = vmul.f32 0.1, %v314_v16  ;;  %v279_v23 = vmul.f32 %v610_v0, %v710_v4  ;;  %v280_v4 = vmul.f32 %v610_v0, %v713_v5 }
  0x2e   : > { %v347_v21 = vmul.f32 0.1, %v315_v17  ;;  %v375_v24 = vmax.f32 %v311_v13, %v343_v18  ;;  %v376_v25 = vmax.f32 %v312_v52, %v344_v54  ;;  %v316_v27 = vadd.f32 %v622_v1, %v277_v59 }
  0x2f   : > { %v377_v26 = vmax.f32 %v313_v14, %v345_v19  ;;  %v378_v60 = vmax.f32 %v314_v16, %v346_v20  ;;  %v317_v29 = vadd.f32 %v622_v1, %v278_v22  ;;  %v318_v30 = vadd.f32 %v622_v1, %v279_v23 }
  0x30   : > { %v379_v28 = vmax.f32 %v315_v17, %v347_v21  ;;  %407 = vst [vmem:[%s668_s26 + $0xb8] sm:$0xff] %v375_v24  ;;  %408 = vst [vmem:[%s668_s26 + $0xc0] sm:$0xff] %v376_v25  ;;  %v348_v61 = vmul.f32 0.1, %v316_v27  ;;  %v319_v34 = vadd.f32 %v622_v1, %v280_v4 }
  0x31   : > { %409 = vst [vmem:[%s668_s26 + $0xc8] sm:$0xff] %v377_v26  ;;  %410 = vst [vmem:[%s668_s26 + $0xd0] sm:$0xff] %v378_v60  ;;  %v349_v31 = vmul.f32 0.1, %v317_v29  ;;  %v350_v32 = vmul.f32 0.1, %v318_v30 }
  0x32   : > { %411 = vst [vmem:[%s668_s26 + $0xd8] sm:$0xff] %v379_v28  ;;  %v380_v33 = vmax.f32 %v316_v27, %v348_v61  ;;  %v351_v37 = vmul.f32 0.1, %v319_v34 }
  0x33   : > { %v381_v35 = vmax.f32 %v317_v29, %v349_v31  ;;  %v382_v36 = vmax.f32 %v318_v30, %v350_v32 }
  0x34   : > { %412 = vst [vmem:[%s668_s26 + $0xe0] sm:$0xff] %v380_v33  ;;  %v383_v38 = vmax.f32 %v319_v34, %v351_v37 }
  0x35   : > { %413 = vst [vmem:[%s668_s26 + $0xe8] sm:$0xff] %v381_v35  ;;  %414 = vst [vmem:[%s668_s26 + $0xf0] sm:$0xff] %v382_v36 }
  0x36   : > { %415 = vst [vmem:[%s668_s26 + $0xf8] sm:$0xff] %v383_v38 }
  0x37 PF: > { %s13_s14 = sadd.s32 1, %s564_s14   ;;  %s812_s12 = smov %s560_s13 }
  0x38   : > { %p10_p5 = scmp.ge.s32.totalorder %s13_s14, 4   ;;  %s813_s13 = smov %s815_s15 }
  0x3a   :  { %12 = sbr.rel (!%p10_p5) target bundleno = 2 (0x2), region = 62 }

// kernel: conv_block.2
= control target key start
LH: loop header
LB: loop body
LE: loop exit
PB: predicated region body
PF: predicated region fallthrough
CT: control target
= control target key end

     0   :  { %s7004_s15 = smov 0   ;;  %s7006_s16 = smov 0   ;;  %s9206_s0 = inlined_call_operand.vmem [shape: bf16[3,2,16,18,4], index: 0, kind: input, shape index: {}]   ;;  %s9207_s1 = inlined_call_operand.vmem [shape: bf16[3,3,4,128], index: 1, kind: input, shape index: {}]   ;;  %s9208_s2 = inlined_call_operand.vmem [shape: f32[2,256,128], index: 2, kind: output, shape index: {0}]   ;;  %s9209_s3 = inlined_call_operand.vmem [shape: f32[2,8,128], index: 3, kind: output, shape index: {1}]   ;;  %s9210_s4 = inlined_call_operand.vmem [shape: f32[2,8,128], index: 4, kind: output, shape index: {2}]  }
   0x1   :  { %s7008_s17 = smov 0   ;;  %s7010_s18 = smov 0  }
   0x2   :  { %s7012_s19 = smov 0  }
   0x3 LB: > { %s27_s20 = sadd.s32 1, %s6973_s18  ;;  %p43_p1 = scmp.ne.s32.totalorder %s6965_s16, %s6961_s15  ;;  %s6977_s19 = sphi %s7012_s19, %s15_s19   ;;  %s6973_s18 = sphi %s7010_s18, %s9329_s18   ;;  %s6969_s17 = sphi %s7008_s17, %s9328_s17   ;;  %s6965_s16 = sphi %s7006_s16, %s9327_s16   ;;  %s6961_s15 = sphi %s7004_s15, %s9326_s15  }
   0x4   : > { %p29_p0 = scmp.ge.s32.totalorder %s27_s20, 2  ;;  %p44_p2 = scmp.eq.s32.totalorder %s6977_s19, 0 }
   0x5   : > { %s36_s22 = sadd.s32 1, %s6965_s16  ;;  %p5561_p5 = scmp.ge.s32.totalorder %s6977_s19, 2 }
   0x6   : > { %s9331_s20 = smov (%p29_p0, %s27_s20), 0  ;;  %p45_p3 = por %p44_p2, %p43_p1 }
   0x7   : > { %s31_s21 = ssub.s32 %s6973_s18, %s9331_s20  ;;  %177 = sbr.rel (%p5561_p5) target bundleno = 55 (0x37), region = 20 }
   0x8   : > { %p34_p4 = scmp.eq.s32.totalorder %s31_s21, 0 }
   0xa   : > { %s7039_s23 = scalar_select %p34_p4, %s6965_s16, %s36_s22  }
   0xe   : > { %180 = sbr.rel (!%p45_p3) target bundleno = 55 (0x37), region = 24  ;;  %s182_s24 = sand.u32 (%p45_p3), 1, %s6965_s16  }
   0xf   : > { %s6739_s25 = smul.u32 (%p45_p3), 192, %s6973_s18 }
  0x10   : > { %s6738_s26 = smul.u32 (%p45_p3), 576, %s182_s24 }
  0x11   : > { %s7047_s29 = scalar_lea.vmem (%p45_p3), %s9206_s0, %s6739_s25 }
  0x12   : > { %v206_v0 = vld [vmem:[%s7047_s29] sm:$0xff] (%p45_p3)   ;;  %v210_v1 = vld [vmem:[%s7047_s29 + $0x8] sm:$0xff] (%p45_p3)   ;;  %v214_v2 = vld [vmem:[%s7047_s29 + $0x10] sm:$0xff] (%p45_p3)   ;;  %s7052_s30 = scalar_lea.vmem (%p45_p3), [#allocation2], %s6738_s26 }
  0x13   : > { %207 = vst [vmem:[%s7052_s30] sm:$0xff] (%p45_p3), %v206_v0   ;;  %211 = vst [vmem:[%s7052_s30 + $0x8] sm:$0xff] (%p45_p3), %v210_v1   ;;  %v218_v3 = vld [vmem:[%s7047_s29 + $0x18] sm:$0xff] (%p45_p3)   ;;  %v222_v4 = vld [vmem:[%s7047_s29 + $0x20] sm:$0xff] (%p45_p3)  }
  0x14   : > { %215 = vst [vmem:[%s7052_s30 + $0x10] sm:$0xff] (%p45_p3), %v214_v2   ;;  %v226_v5 = vld [vmem:[%s7047_s29 + $0x28] sm:$0xff] (%p45_p3)   ;;  %219 = vst [vmem:[%s7052_s30 + $0x18] sm:$0xff] (%p45_p3), %v218_v3   ;;  %v230_v6 = vld [vmem:[%s7047_s29 + $0x30] sm:$0xff] (%p45_p3)  }
  0x15   : > { %223 = vst [vmem:[%s7052_s30 + $0x20] sm:$0xff] %v222_v4   ;;  %227 = vst [vmem:[%s7052_s30 + $0x28] sm:$0xff] %v226_v5   ;;  %v234_v7 = vld [vmem:[%s7047_s29 + $0x38] sm:$0xff]   ;;  %v238_v8 = vld [vmem:[%s7047_s29 + $0x40] sm:$0xff]  }
  0x16   : > { %231 = vst [vmem:[%s7052_s30 + $0x30] sm:$0xff] %v230_v6   ;;  %235 = vst [vmem:[%s7052_s30 + $0x38] sm:$0xff] %v234_v7   ;;  %v242_v9 = vld [vmem:[%s7047_s29 + $0x48] sm:$0xff]   ;;  %v246_v10 = vld [vmem:[%s7047_s29 + $0x50] sm:$0xff]  }
  0x17   : > { %239 = vst [vmem:[%s7052_s30 + $0x40] sm:$0xff] %v238_v8   ;;  %v250_v11 = vld [vmem:[%s7047_s29 + $0x58] sm:$0xff]   ;;  %243 = vst [vmem:[%s7052_s30 + $0x48] sm:$0xff] %v242_v9   ;;  %v254_v12 = vld [vmem:[%s7047_s29 + $0x60] sm:$0xff]  }
  0x18   : > { %247 = vst [vmem:[%s7052_s30 + $0x50] sm:$0xff] %v246_v10   ;;  %251 = vst [vmem:[%s7052_s30 + $0x58] sm:$0xff] %v250_v11   ;;  %v258_v13 = vld [vmem:[%s7047_s29 + $0x68] sm:$0xff]   ;;  %v262_v14 = vld [vmem:[%s7047_s29 + $0x70] sm:$0xff]  }
  0x19   : > { %255 = vst [vmem:[%s7052_s30 + $0x60] sm:$0xff] %v254_v12   ;;  %259 = vst [vmem:[%s7052_s30 + $0x68] sm:$0xff] %v258_v13   ;;  %v266_v15 = vld [vmem:[%s7047_s29 + $0x78] sm:$0xff]   ;;  %v270_v16 = vld [vmem:[%s7047_s29 + $0x80] sm:$0xff]  }
  0x1a   : > { %263 = vst [vmem:[%s7052_s30 + $0x70] sm:$0xff] %v262_v14   ;;  %v274_v17 = vld [vmem:[%s7047_s29 + $0x88] sm:$0xff]   ;;  %267 = vst [vmem:[%s7052_s30 + $0x78] sm:$0xff] %v266_v15   ;;  %v278_v18 = vld [vmem:[%s7047_s29 + $0x90] sm:$0xff]  }
  0x1b   : > { %271 = vst [vmem:[%s7052_s30 + $0x80] sm:$0xff] %v270_v16   ;;  %275 = vst [vmem:[%s7052_s30 + $0x88] sm:$0xff] %v274_v17   ;;  %v282_v19 = vld [vmem:[%s7047_s29 + $0x98] sm:$0xff]   ;;  %v286_v20 = vld [vmem:[%s7047_s29 + $0xa0] sm:$0xff]  }
  0x1c   : > { %279 = vst [vmem:[%s7052_s30 + $0x90] sm:$0xff] %v278_v18   ;;  %283 = vst [vmem:[%s7052_s30 + $0x98] sm:$0xff] %v282_v19   ;;  %v290_v21 = vld [vmem:[%s7047_s29 + $0xa8] sm:$0xff]   ;;  %v294_v22 = vld [vmem:[%s7047_s29 + $0xb0] sm:$0xff]  }
  0x1d   : > { %287 = vst [vmem:[%s7052_s30 + $0xa0] sm:$0xff] %v286_v20   ;;  %v298_v23 = vld [vmem:[%s7047_s29 + $0xb8] sm:$0xff]   ;;  %291 = vst [vmem:[%s7052_s30 + $0xa8] sm:$0xff] %v290_v21   ;;  %v302_v24 = vld [vmem:[%s7047_s29 + $0x180] sm:$0xff]  }
  0x1e   : > { %295 = vst [vmem:[%s7052_s30 + $0xb0] sm:$0xff] %v294_v22   ;;  %299 = vst [vmem:[%s7052_s30 + $0xb8] sm:$0xff] %v298_v23   ;;  %v306_v25 = vld [vmem:[%s7047_s29 + $0x188] sm:$0xff]   ;;  %v310_v26 = vld [vmem:[%s7047_s29 + $0x190] sm:$0xff]  }
  0x1f   : > { %303 = vst [vmem:[%s7052_s30 + $0xc0] sm:$0xff] %v302_v24   ;;  %307 = vst [vmem:[%s7052_s30 + $0xc8] sm:$0xff] %v306_v25   ;;  %v314_v27 = vld [vmem:[%s7047_s29 + $0x198] sm:$0xff]   ;;  %v318_v28 = vld [vmem:[%s7047_s29 + $0x1a0] sm:$0xff]  }
  0x20   : > { %311 = vst [vmem:[%s7052_s30 + $0xd0] sm:$0xff] %v310_v26   ;;  %v322_v29 = vld [vmem:[%s7047_s29 + $0x1a8] sm:$0xff]   ;;  %315 = vst [vmem:[%s7052_s30 + $0xd8] sm:$0xff] %v314_v27   ;;  %v326_v30 = vld [vmem:[%s7047_s29 + $0x1b0] sm:$0xff]  }
  0x21   : > { %319 = vst [vmem:[%s7052_s30 + $0xe0] sm:$0xff] %v318_v28   ;;  %323 = vst [vmem:[%s7052_s30 + $0xe8] sm:$0xff] %v322_v29   ;;  %v330_v31 = vld [vmem:[%s7047_s29 + $0x1b8] sm:$0xff]   ;;  %v334_v32 = vld [vmem:[%s7047_s29 + $0x1c0] sm:$0xff]  }
  0x22   : > { %327 = vst [vmem:[%s7052_s30 + $0xf0] sm:$0xff] %v326_v30   ;;  %331 = vst [vmem:[%s7052_s30 + $0xf8] sm:$0xff] %v330_v31   ;;  %v338_v33 = vld [vmem:[%s7047_s29 + $0x1c8] sm:$0xff]   ;;  %v342_v34 = vld [vmem:[%s7047_s29 + $0x1d0] sm:$0xff]  }
  0x23   : > { %335 = vst [vmem:[%s7052_s30 + $0x100] sm:$0xff] %v334_v32   ;;  %v346_v35 = vld [vmem:[%s7047_s29 + $0x1d8] sm:$0xff]   ;;  %339 = vst [vmem:[%s7052_s30 + $0x108] sm:$0xff] %v338_v33   ;;  %v350_v36 = vld [vmem:[%s7047_s29 + $0x1e0] sm:$0xff]  }
  0x24   : > { %343 = vst [vmem:[%s7052_s30 + $0x110] sm:$0xff] %v342_v34   ;;  %347 = vst [vmem:[%s7052_s30 + $0x118] sm:$0xff] %v346_v35   ;;  %v354_v37 = vld [vmem:[%s7047_s29 + $0x1e8] sm:$0xff]   ;;  %v358_v38 = vld [vmem:[%s7047_s29 + $0x1f0] sm:$0xff]  }
  0x25   : > { %351 = vst [vmem:[%s7052_s30 + $0x120] sm:$0xff] %v350_v36   ;;  %355 = vst [vmem:[%s7052_s30 + $0x128] sm:$0xff] %v354_v37   ;;  %v362_v39 = vld [vmem:[%s7047_s29 + $0x1f8] sm:$0xff]   ;;  %v366_v40 = vld [vmem:[%s7047_s29 + $0x200] sm:$0xff]  }
  0x26   : > { %359 = vst [vmem:[%s7052_s30 + $0x130] sm:$0xff] %v358_v38   ;;  %v370_v41 = vld [vmem:[%s7047_s29 + $0x208] sm:$0xff]   ;;  %363 = vst [vmem:[%s7052_s30 + $0x138] sm:$0xff] %v362_v39   ;;  %v374_v42 = vld [vmem:[%s7047_s29 + $0x210] sm:$0xff]  }
  0x27   : > { %367 = vst [vmem:[%s7052_s30 + $0x140] sm:$0xff] %v366_v40   ;;  %371 = vst [vmem:[%s7052_s30 + $0x148] sm:$0xff] %v370_v41   ;;  %v378_v43 = vld [vmem:[%s7047_s29 + $0x218] sm:$0xff]   ;;  %v382_v44 = vld [vmem:[%s7047_s29 + $0x220] sm:$0xff]  }
  0x28   : > { %375 = vst [vmem:[%s7052_s30 + $0x150] sm:$0xff] %v374_v42   ;;  %379 = vst [vmem:[%s7052_s30 + $0x158] sm:$0xff] %v378_v43   ;;  %v386_v45 = vld [vmem:[%s7047_s29 + $0x228] sm:$0xff]   ;;  %v390_v46 = vld [vmem:[%s7047_s29 + $0x230] sm:$0xff]  }
  0x29   : > { %383 = vst [vmem:[%s7052_s30 + $0x160] sm:$0xff] %v382_v44   ;;  %v394_v47 = vld [vmem:[%s7047_s29 + $0x238] sm:$0xff]   ;;  %387 = vst [vmem:[%s7052_s30 + $0x168] sm:$0xff] %v386_v45   ;;  %v398_v48 = vld [vmem:[%s7047_s29 + $0x300] sm:$0xff]  }
  0x2a   : > { %391 = vst [vmem:[%s7052_s30 + $0x170] sm:$0xff] %v390_v46   ;;  %395 = vst [vmem:[%s7052_s30 + $0x178] sm:$0xff] %v394_v47   ;;  %v402_v49 = vld [vmem:[%s7047_s29 + $0x308] sm:$0xff]   ;;  %v406_v50 = vld [vmem:[%s7047_s29 + $0x310] sm:$0xff]  }
  0x2b   : > { %399 = vst [vmem:[%s7052_s30 + $0x180] sm:$0xff] %v398_v48   ;;  %403 = vst [vmem:[%s7052_s30 + $0x188] sm:$0xff] %v402_v49   ;;  %v410_v51 = vld [vmem:[%s7047_s29 + $0x318] sm:$0xff]   ;;  %v414_v52 = vld [vmem:[%s7047_s29 + $0x320] sm:$0xff]  }
  0x2c   : > { %407 = vst [vmem:[%s7052_s30 + $0x190] sm:$0xff] %v406_v50   ;;  %v418_v53 = vld [vmem:[%s7047_s29 + $0x328] sm:$0xff]   ;;  %411 = vst [vmem:[%s7052_s30 + $0x198] sm:$0xff] %v410_v51   ;;  %v422_v54 = vld [vmem:[%s7047_s29 + $0x330] sm:$0xff]  }
  0x2d   : > { %415 = vst [vmem:[%s7052_s30 + $0x1a0] sm:$0xff] %v414_v52   ;;  %419 = vst [vmem:[%s7052_s30 + $0x1a8] sm:$0xff] %v418_v53   ;;  %v426_v55 = vld [vmem:[%s7047_s29 + $0x338] sm:$0xff]   ;;  %v430_v56 = vld [vmem:[%s7047_s29 + $0x340] sm:$0xff]  }
  0x2e   : > { %423 = vst [vmem:[%s7052_s30 + $0x1b0] sm:$0xff] %v422_v54   ;;  %427 = vst [vmem:[%s7052_s30 + $0x1b8] sm:$0xff] %v426_v55   ;;  %v434_v57 = vld [vmem:[%s7047_s29 + $0x348] sm:$0xff]   ;;  %v438_v58 = vld [vmem:[%s7047_s29 + $0x350] sm:$0xff]  }
  0x2f   : > { %431 = vst [vmem:[%s7052_s30 + $0x1c0] sm:$0xff] %v430_v56   ;;  %v442_v59 = vld [vmem:[%s7047_s29 + $0x358] sm:$0xff]   ;;  %435 = vst [vmem:[%s7052_s30 + $0x1c8] sm:$0xff] %v434_v57   ;;  %v446_v60 = vld [vmem:[%s7047_s29 + $0x360] sm:$0xff]  }
  0x30   : > { %439 = vst [vmem:[%s7052_s30 + $0x1d0] sm:$0xff] %v438_v58   ;;  %443 = vst [vmem:[%s7052_s30 + $0x1d8] sm:$0xff] %v442_v59   ;;  %v450_v61 = vld [vmem:[%s7047_s29 + $0x368] sm:$0xff]   ;;  %v454_v62 = vld [vmem:[%s7047_s29 + $0x370] sm:$0xff]  }
  0x31   : > { %447 = vst [vmem:[%s7052_s30 + $0x1e0] sm:$0xff] %v446_v60   ;;  %451 = vst [vmem:[%s7052_s30 + $0x1e8] sm:$0xff] %v450_v61   ;;  %v458_v63 = vld [vmem:[%s7047_s29 + $0x378] sm:$0xff]   ;;  %v462_v0 = vld [vmem:[%s7047_s29 + $0x380] sm:$0xff]  }
  0x32   : > { %455 = vst [vmem:[%s7052_s30 + $0x1f0] sm:$0xff] %v454_v62   ;;  %v466_v1 = vld [vmem:[%s7047_s29 + $0x388] sm:$0xff]   ;;  %459 = vst [vmem:[%s7052_s30 + $0x1f8] sm:$0xff] %v458_v63   ;;  %v470_v2 = vld [vmem:[%s7047_s29 + $0x390] sm:$0xff]  }
  0x33   : > { %463 = vst [vmem:[%s7052_s30 + $0x200] sm:$0xff] %v462_v0   ;;  %467 = vst [vmem:[%s7052_s30 + $0x208] sm:$0xff] %v466_v1   ;;  %v474_v3 = vld [vmem:[%s7047_s29 + $0x398] sm:$0xff]   ;;  %v478_v4 = vld [vmem:[%s7047_s29 + $0x3a0] sm:$0xff]  }
  0x34   : > { %471 = vst [vmem:[%s7052_s30 + $0x210] sm:$0xff] %v470_v2   ;;  %475 = vst [vmem:[%s7052_s30 + $0x218] sm:$0xff] %v474_v3   ;;  %v482_v5 = vld [vmem:[%s7047_s29 + $0x3a8] sm:$0xff]   ;;  %v486_v6 = vld [vmem:[%s7047_s29 + $0x3b0] sm:$0xff]  }
  0x35   : > { %479 = vst [vmem:[%s7052_s30 + $0x220] sm:$0xff] %v478_v4   ;;  %v490_v7 = vld [vmem:[%s7047_s29 + $0x3b8] sm:$0xff]   ;;  %483 = vst [vmem:[%s7052_s30 + $0x228] sm:$0xff] %v482_v5  }
  0x36   : > { %487 = vst [vmem:[%s7052_s30 + $0x230] sm:$0xff] %v486_v6   ;;  %491 = vst [vmem:[%s7052_s30 + $0x238] sm:$0xff] %v490_v7  }
  0x37 PF: > { %p5563_p6 = scmp.ge.s32.totalorder %s6977_s19, 1  ;;  %p803_p7 = scmp.lt.s32.totalorder %s6977_s19, 3 }
  0x39   : > { %p804_p8 = pnand %p5563_p6, %p803_p7 }
  0x3b   : > { %807 = sbr.rel (%p804_p8) target bundleno = 660 (0x294), region = 65 }
  0x42   : > { %v5568_v8 = vld [vmem:[%s9207_s1 + $0x2] sm:$0x3]  ;;  %vm1414_vm0 = vcmask 1041408   ;;  %v5763_v9 = vld [vmem:[%s9207_s1 + $0x8] sm:$0x3]  ;;  %s810_s9 = sand.u32 1, %s6961_s15  }
  0x43   : > { %6728 = vmatprep.subr.msk.bf16.mxu1 %vm1414_vm0, %v5568_v8  ;;  %6732 = vmatprep.subr.msk.bf16.mxu0 %vm1414_vm0, %v5763_v9  ;;  %v1416_v10 = vsel %vm1414_vm0, %v5568_v8, 0  ;;  %v7208_v11 = vsel %vm1414_vm0, %v5763_v9, 0  ;;  %s6740_s10 = smul.u32 576, %s810_s9  ;;  %v927_v12 = vld [vmem:[%s9207_s1] sm:$0x3]  ;;  %vm1365_vm3 = vcmask 31744  }
  0x44   : > { %9237 = vst [vmem:[#allocation3_spill] sm:$0xff] %v7208_v11  ;;  %6165 = vmatpush3.bf16.msra.mxu1 %v1416_v10  ;;  %6301 = vmatpush3.bf16.msra.mxu0 %v7208_v11  ;;  %v7217_v13 = vld [vmem:[%s9207_s1 + $0xa] sm:$0x3]  ;;  %vm928_vm1 = vsmask.f32 3328  ;;  %v7250_v43 = vsel %vm1414_vm0, %v927_v12, 0 }
  0x45   : > { %vm929_vm2 = vsmask.f32 7440  ;;  %6729 = vmatprep.subr.msk.bf16.mxu1 %vm1414_vm0, %v927_v12  ;;  %6734 = vmatprep.subr.msk.bf16.mxu0 %vm1414_vm0, %v7217_v13  ;;  %s7222_s15 = scalar_lea.vmem [#allocation2], %s6740_s10  ;;  %v7272_v7 = vsel %vm1414_vm0, %v7217_v13, 0  ;;  %vm1887_vm5 = vcmask 1042432   ;;  %vm1888_vm6 = vcmask 1046532  }
  0x46   : > { %v879_v14 = vld [vmem:[%s7222_s15] sm:$0xf]  ;;  %v880_v15 = vld [vmem:[%s7222_s15 + $0x4] sm:$0xf]  ;;  %v881_v16 = vld [vmem:[%s7222_s15 + $0x8] sm:$0x1] }
  0x47   : > { %v932_v17 = vshrl.u32 %v879_v14, 16  ;;  %v935_v18 = vshll.u32 %v879_v14, 16  ;;  %v941_v19 = vshll.u32 %v880_v15, 16  ;;  %v945_v20 = vshrl.u32 %v880_v15, 16  ;;  %v7228_v21 = vld [vmem:[%s7222_s15 + $0xc0] sm:$0xf]  ;;  %vm7245_vm4 = vmor %vm928_vm1, %vm929_vm2 }
  0x48   : > { %v951_v22 = vshll.u32 %v881_v16, 16  ;;  %v7231_v23 = vld [vmem:[%s7222_s15 + $0xc4] sm:$0xf]  ;;  %v7234_v24 = vld [vmem:[%s7222_s15 + $0xc8] sm:$0x1]  ;;  %v2672_v30 = vshrl.u32 %v7228_v21, 16  ;;  %vm7514_vm7 = vmor %vm1887_vm5, %vm1888_vm6 }
  0x49   : > { %v934_v25 = vrot.slane %v932_v17, 4  ;;  %v937_v26 = vrot.slane %v935_v18, 5  ;;  %v943_v27 = vrot.slane %v941_v19, 5  ;;  %v947_v28 = vrot.slane %v945_v20, 4  ;;  %v882_v37 = vld [vmem:[%s7222_s15 + $0xc] sm:$0xf] }
  0x4a   : > { %v953_v29 = vrot.slane %v951_v22, 5  ;;  %v2675_v31 = vshll.u32 %v7228_v21, 16  ;;  %v2681_v32 = vshll.u32 %v7231_v23, 16  ;;  %v2685_v35 = vshrl.u32 %v7231_v23, 16  ;;  %v883_v38 = vld [vmem:[%s7222_s15 + $0x10] sm:$0xf] }
  0x4b   : > { %v938_v33 = vor.u32 %v937_v26, %v934_v25  ;;  %v948_v34 = vor.u32 %v947_v28, %v943_v27  ;;  %v2691_v36 = vshll.u32 %v7234_v24, 16  ;;  %v2674_v40 = vrot.slane %v2672_v30, 4  ;;  %v884_v49 = vld [vmem:[%s7222_s15 + $0x14] sm:$0x1]  ;;  %v7258_v61 = vld [vmem:[%s7222_s15 + $0xcc] sm:$0xf] }
  0x4c   : > { %v2677_v41 = vrot.slane %v2675_v31, 5  ;;  %v2683_v42 = vrot.slane %v2681_v32, 5  ;;  %v2687_v46 = vrot.slane %v2685_v35, 4  ;;  %v956_v50 = vshrl.u32 %v882_v37, 16  ;;  %v7261_v2 = vld [vmem:[%s7222_s15 + $0xd0] sm:$0xf] }
  0x4d   : > { %v939_v44 = vrot.slane %v938_v33, 4  ;;  %v949_v45 = vrot.slane %v948_v34, 4  ;;  %v2693_v47 = vrot.slane %v2691_v36, 5  ;;  %v959_v51 = vshll.u32 %v882_v37, 16  ;;  %v7268_v6 = vld [vmem:[%s7222_s15 + $0xd4] sm:$0x1] }
  0x4e   : > { %v2678_v48 = vor.u32 %v2677_v41, %v2674_v40  ;;  %v965_v52 = vshll.u32 %v883_v38, 16  ;;  %v2688_v55 = vor.u32 %v2687_v46, %v2683_v42  ;;  %v969_v56 = vshrl.u32 %v883_v38, 16  ;;  %v885_v18 = vld [vmem:[%s7222_s15 + $0x18] sm:$0xf]  ;;  %v886_v25 = vld [vmem:[%s7222_s15 + $0x1c] sm:$0xf] }
  0x4f   : > { %v944_v53 = vsel %vm7245_vm4, %v939_v44, %v943_v27  ;;  %v954_v54 = vsel %vm7245_vm4, %v949_v45, %v953_v29  ;;  %v958_v59 = vrot.slane %v956_v50, 4  ;;  %v961_v60 = vrot.slane %v959_v51, 5  ;;  %v887_v30 = vld [vmem:[%s7222_s15 + $0x20] sm:$0x1]  ;;  %v7292_v35 = vld [vmem:[%s7222_s15 + $0xd8] sm:$0xf] }
  0x50   : > { %v5569_v57 = vcombine.low %v944_v53, %v954_v54  ;;  %v2679_v58 = vrot.slane %v2678_v48, 4  ;;  %v2689_v62 = vrot.slane %v2688_v55, 4  ;;  %v967_v63 = vrot.slane %v965_v52, 5  ;;  %v7301_v55 = vld [vmem:[%s7222_s15 + $0xe0] sm:$0x1]  ;;  %p855_p9 = scmp.lt.s32.totalorder %s6969_s17, 1 }
  0x51   : > { %v971_v0 = vrot.slane %v969_v56, 4  ;;  %v975_v1 = vshll.u32 %v884_v49, 16  ;;  %v3370_v4 = vrot.slane %v7234_v24, 5  ;;  %v962_v5 = vor.u32 %v961_v60, %v958_v59  ;;  %v7296_v49 = vld [vmem:[%s7222_s15 + $0xdc] sm:$0xf] }
  0x52   : > { %6166 = vmatprep.mubr.msk.bf16.mxu1 %vm1365_vm3, %v5569_v57  ;;  %v2684_v3 = vsel %vm7245_vm4, %v2679_v58, %v2683_v42  ;;  %v2694_v8 = vsel %vm7245_vm4, %v2689_v62, %v2693_v47  ;;  %v2696_v12 = vshrl.u32 %v7258_v61, 16  ;;  %v2699_v16 = vshll.u32 %v7258_v61, 16  ;;  %v888_v60 = vld [vmem:[%s7222_s15 + $0x24] sm:$0xf]  ;;  %s9333_s17 = smov (!%p855_p9, %s6969_s17), 1 }
  0x53   : > { %v972_v9 = vor.u32 %v971_v0, %v967_v63  ;;  %v977_v10 = vrot.slane %v975_v1, 5  ;;  %v5764_v14 = vcombine.low %v2684_v3, %v2694_v8  ;;  %v963_v15 = vrot.slane %v962_v5, 4  ;;  %s6010_s8 = sshll.u32 %s9333_s17, 8  ;;  %s5566_s12 = sshll.u32 %s9333_s17, 3 }
  0x54   : > { %v2705_v17 = vshll.u32 %v7261_v2, 16  ;;  %v2698_v20 = vrot.slane %v2696_v12, 4  ;;  %v2709_v13 = vshrl.u32 %v7261_v2, 16  ;;  %v2715_v22 = vshll.u32 %v7268_v6, 16  ;;  %s9145_s11 = scalar_lea.vmem %s9208_s2, %s6010_s8  ;;  %s877_s24 = scalar_lea.vmem %s9210_s4, %s5566_s12 }
  0x55   : > { %v973_v19 = vrot.slane %v972_v9, 4  ;;  %6302 = vmatprep.mubr.msk.bf16.mxu0 %vm1365_vm3, %v5764_v14  ;;  %v968_v26 = vsel %vm7245_vm4, %v963_v15, %v967_v63  ;;  %v2701_v27 = vrot.slane %v2699_v16, 5  ;;  %v3374_v29 = vrot.slane %v7261_v2, 5  ;;  %v889_v9 = vld [vmem:[%s7222_s15 + $0x28] sm:$0xf] }
  0x56   : > { %v2707_v28 = vrot.slane %v2705_v17, 5  ;;  %v2711_v32 = vrot.slane %v2709_v13, 4  ;;  %v2717_v33 = vrot.slane %v2715_v22, 5  ;;  %v980_v38 = vshrl.u32 %v885_v18, 16  ;;  %v7318_v13 = vld [vmem:[%s7222_s15 + $0xe4] sm:$0xf] }
  0x57   : > { %v978_v31 = vsel %vm7245_vm4, %v973_v19, %v977_v10  ;;  %v2702_v37 = vor.u32 %v2701_v27, %v2698_v20  ;;  %v983_v40 = vshll.u32 %v885_v18, 16  ;;  %v989_v42 = vshll.u32 %v886_v25, 16  ;;  %v890_v19 = vld [vmem:[%s7222_s15 + $0x2c] sm:$0x1] }
  0x58   : > { %v5570_v36 = vcombine.low %v968_v26, %v978_v31  ;;  %v2712_v41 = vor.u32 %v2711_v32, %v2707_v28  ;;  %v993_v44 = vshrl.u32 %v886_v25, 16  ;;  %v999_v45 = vshll.u32 %v887_v30, 16 }
  0x59   : > { %v2703_v46 = vrot.slane %v2702_v37, 4  ;;  %v982_v47 = vrot.slane %v980_v38, 4  ;;  %v985_v48 = vrot.slane %v983_v40, 5  ;;  %v2720_v50 = vshrl.u32 %v7292_v35, 16 }
  0x5a   : > { %6167 = vmatmul.mubr.msk.bf16.vlgmr.msra.gmra.mrb[0].mxu1 %vm1365_vm3, %v5570_v36  ;;  %v2713_v51 = vrot.slane %v2712_v41, 4  ;;  %v991_v52 = vrot.slane %v989_v42, 5  ;;  %v995_v53 = vrot.slane %v993_v44, 4  ;;  %v1001_v54 = vrot.slane %v999_v45, 5  ;;  %v7331_v44 = vld [vmem:[%s7222_s15 + $0xec] sm:$0x1] }
  0x5b   : > { %6199 = vmatpush3.bf16.msra.mxu1 %v7250_v43  ;;  %v2708_v56 = vsel %vm7245_vm4, %v2703_v46, %v2707_v28  ;;  %v986_v57 = vor.u32 %v985_v48, %v982_v47  ;;  %v2722_v58 = vrot.slane %v2720_v50, 4  ;;  %v2723_v59 = vshll.u32 %v7292_v35, 16  ;;  %v7335_v46 = vld [vmem:[%s7222_s15 + $0x30] sm:$0xf] }
  0x5c   : > { %v2718_v62 = vsel %vm7245_vm4, %v2713_v51, %v2717_v33  ;;  %v996_v63 = vor.u32 %v995_v53, %v991_v52  ;;  %v2729_v43 = vshll.u32 %v7296_v49, 16  ;;  %v2733_v0 = vshrl.u32 %v7296_v49, 16  ;;  %v7324_v33 = vld [vmem:[%s7222_s15 + $0xe8] sm:$0xf] }
  0x5d   : > { %v5765_v1 = vcombine.low %v2708_v56, %v2718_v62  ;;  %v987_v3 = vrot.slane %v986_v57, 4  ;;  %v2725_v5 = vrot.slane %v2723_v59, 5  ;;  %v2739_v8 = vshll.u32 %v7301_v55, 16  ;;  %v7341_v57 = vld [vmem:[%s7222_s15 + $0x34] sm:$0xf] }
  0x5e   : > { %v997_v10 = vrot.slane %v996_v63, 4  ;;  %v2731_v12 = vrot.slane %v2729_v43, 5  ;;  %v2735_v14 = vrot.slane %v2733_v0, 4  ;;  %v1004_v15 = vshrl.u32 %v888_v60, 16 }
  0x5f   : > { %6303 = vmatmul.mubr.msk.bf16.vlgmr.msra.gmra.mrb[0].mxu0 %vm1365_vm3, %v5765_v1  ;;  %v992_v16 = vsel %vm7245_vm4, %v987_v3, %v991_v52  ;;  %v2726_v17 = vor.u32 %v2725_v5, %v2722_v58  ;;  %v2741_v18 = vrot.slane %v2739_v8, 5  ;;  %v1007_v20 = vshll.u32 %v888_v60, 16  ;;  %v893_v1 = vld [vmem:[%s7222_s15 + $0x38] sm:$0x1]  ;;  %v7352_v5 = vld [vmem:[%s7222_s15 + $0xf0] sm:$0xf] }
  0x60   : > { %6335 = vmatpush3.bf16.msra.mxu0 %v7272_v7  ;;  %v1002_v22 = vsel %vm7245_vm4, %v997_v10, %v1001_v54  ;;  %v2736_v25 = vor.u32 %v2735_v14, %v2731_v12  ;;  %v1006_v26 = vrot.slane %v1004_v15, 4  ;;  %v1013_v27 = vshll.u32 %v889_v9, 16  ;;  %v7356_v14 = vld [vmem:[%s7222_s15 + $0xf4] sm:$0xf] }
  0x61   : > { %v5571_v28 = vcombine.low %v992_v16, %v1002_v22  ;;  %v2727_v30 = vrot.slane %v2726_v17, 4  ;;  %v1009_v31 = vrot.slane %v1007_v20, 5  ;;  %v1017_v32 = vshrl.u32 %v889_v9, 16 }
  0x62   : > { %v2737_v36 = vrot.slane %v2736_v25, 4  ;;  %v1015_v37 = vrot.slane %v1013_v27, 5  ;;  %v1023_v38 = vshll.u32 %v890_v19, 16  ;;  %v2744_v40 = vshrl.u32 %v7318_v13, 16  ;;  %v7364_v19 = vld [vmem:[%s9207_s1 + $0xc] sm:$0x3] }
  0x63   : > { %6170 = vmatprep.mubr.msk.bf16.mxu1 %vm1365_vm3, %v5571_v28  ;;  %v2732_v7 = vsel %vm7245_vm4, %v2727_v30, %v2731_v12  ;;  %v1010_v41 = vor.u32 %v1009_v31, %v1006_v26  ;;  %v1019_v42 = vrot.slane %v1017_v32, 4  ;;  %v2747_v45 = vshll.u32 %v7318_v13, 16  ;;  %6735 = vmatprep.subr.msk.bf16.mxu0 %vm1414_vm0, %v7364_v19  ;;  %v7371_v31 = vld [vmem:[%s7222_s15 + $0xf8] sm:$0x1] }
  0x64   : > { %v2742_v47 = vsel %vm7245_vm4, %v2737_v36, %v2741_v18  ;;  %v1025_v48 = vrot.slane %v1023_v38, 5  ;;  %v2746_v50 = vrot.slane %v2744_v40, 4  ;;  %v2753_v51 = vshll.u32 %v7324_v33, 16 }
  0x65   : > { %v5766_v52 = vcombine.low %v2732_v7, %v2742_v47  ;;  %v1011_v53 = vrot.slane %v1010_v41, 4  ;;  %v1020_v54 = vor.u32 %v1019_v42, %v1015_v37  ;;  %v2749_v56 = vrot.slane %v2747_v45, 5  ;;  %v7379_v47 = vld [vmem:[%s7222_s15 + $0x3c] sm:$0xf] }
  0x66   : > { %v2755_v58 = vrot.slane %v2753_v51, 5  ;;  %v2757_v59 = vshrl.u32 %v7324_v33, 16  ;;  %v2763_v60 = vshll.u32 %v7331_v44, 16  ;;  %v1028_v62 = vshrl.u32 %v7335_v46, 16 }
  0x67   : > { %6306 = vmatprep.mubr.msk.bf16.mxu0 %vm1365_vm3, %v5766_v52  ;;  %v1016_v63 = vsel %vm7245_vm4, %v1011_v53, %v1015_v37  ;;  %v1021_v43 = vrot.slane %v1020_v54, 4  ;;  %v2750_v0 = vor.u32 %v2749_v56, %v2746_v50  ;;  %v1031_v3 = vshll.u32 %v7335_v46, 16  ;;  %v7385_v53 = vld [vmem:[%s7222_s15 + $0x40] sm:$0xf] }
  0x68   : > { %v2759_v8 = vrot.slane %v2757_v59, 4  ;;  %v2765_v9 = vrot.slane %v2763_v60, 5  ;;  %v1030_v10 = vrot.slane %v1028_v62, 4  ;;  %v1037_v12 = vshll.u32 %v7341_v57, 16 }
  0x69   : > { %v1026_v15 = vsel %vm7245_vm4, %v1021_v43, %v1025_v48  ;;  %v2751_v16 = vrot.slane %v2750_v0, 4  ;;  %v1033_v17 = vrot.slane %v1031_v3, 5  ;;  %v1041_v18 = vshrl.u32 %v7341_v57, 16 }
  0x6a   : > { %v5572_v20 = vcombine.low %v1016_v63, %v1026_v15  ;;  %v2760_v22 = vor.u32 %v2759_v8, %v2755_v58  ;;  %v1039_v25 = vrot.slane %v1037_v12, 5  ;;  %v1047_v26 = vshll.u32 %v893_v1, 16  ;;  %v896_v63 = vld [vmem:[%s7222_s15 + $0x44] sm:$0x1] }
  0x6b   : > { %v2756_v27 = vsel %vm7245_vm4, %v2751_v16, %v2755_v58  ;;  %v1034_v28 = vor.u32 %v1033_v17, %v1030_v10  ;;  %v1043_v30 = vrot.slane %v1041_v18, 4  ;;  %v2768_v32 = vshrl.u32 %v7352_v5, 16  ;;  %v7398_v10 = vld [vmem:[%s7222_s15 + $0xfc] sm:$0xf]  ;;  %v7401_v18 = vld [vmem:[%s7222_s15 + $0x100] sm:$0xf] }
  0x6c   : > { %6171 = vmatmul.mubr.msk.bf16.gmra.mrb[4].mxu1 %vm1365_vm3, %v5572_v20  ;;  %v2761_v36 = vrot.slane %v2760_v22, 4  ;;  %v1049_v37 = vrot.slane %v1047_v26, 5  ;;  %v2771_v38 = vshll.u32 %v7352_v5, 16  ;;  %v2777_v40 = vshll.u32 %v7356_v14, 16 }
  0x6d   : > { %v1035_v7 = vrot.slane %v1034_v28, 4  ;;  %v1044_v41 = vor.u32 %v1043_v30, %v1039_v25  ;;  %v2770_v42 = vrot.slane %v2768_v32, 4  ;;  %v2781_v45 = vshrl.u32 %v7356_v14, 16  ;;  %v7407_v30 = vld [vmem:[%s7222_s15 + $0x104] sm:$0x1] }
  0x6e   : > { %v2766_v48 = vsel %vm7245_vm4, %v2761_v36, %v2765_v9  ;;  %v2773_v50 = vrot.slane %v2771_v38, 5  ;;  %v2779_v51 = vrot.slane %v2777_v40, 5  ;;  %v2787_v52 = vshll.u32 %v7371_v31, 16 }
  0x6f   : > { %v5767_v54 = vcombine.low %v2756_v27, %v2766_v48  ;;  %v1040_v56 = vsel %vm7245_vm4, %v1035_v7, %v1039_v25  ;;  %v1045_v58 = vrot.slane %v1044_v41, 4  ;;  %v2783_v59 = vrot.slane %v2781_v45, 4  ;;  %v7415_v41 = vld [vmem:[%s7222_s15 + $0x48] sm:$0xf] }
  0x70   : > { %v2774_v60 = vor.u32 %v2773_v50, %v2770_v42  ;;  %v2789_v62 = vrot.slane %v2787_v52, 5  ;;  %v1052_v43 = vshrl.u32 %v7379_v47, 16  ;;  %v1055_v0 = vshll.u32 %v7379_v47, 16 }
  0x71   : > { %6307 = vmatmul.mubr.msk.bf16.gmra.mrb[4].mxu0 %vm1365_vm3, %v5767_v54  ;;  %v1050_v1 = vsel %vm7245_vm4, %v1045_v58, %v1049_v37  ;;  %v2784_v3 = vor.u32 %v2783_v59, %v2779_v51  ;;  %v1061_v8 = vshll.u32 %v7385_v53, 16  ;;  %v1065_v9 = vshrl.u32 %v7385_v53, 16 }
  0x72   : > { %v5573_v12 = vcombine.low %v1040_v56, %v1050_v1  ;;  %v2775_v15 = vrot.slane %v2774_v60, 4  ;;  %v1054_v16 = vrot.slane %v1052_v43, 4  ;;  %v1057_v17 = vrot.slane %v1055_v0, 5  ;;  %v7431_v0 = vld [vmem:[%s9207_s1 + $0x4] sm:$0x3] }
  0x73   : > { %v2785_v20 = vrot.slane %v2784_v3, 4  ;;  %v1063_v22 = vrot.slane %v1061_v8, 5  ;;  %v1067_v25 = vrot.slane %v1065_v9, 4  ;;  %v1071_v26 = vshll.u32 %v896_v63, 16  ;;  %6730 = vmatprep.subr.msk.bf16.mxu1 %vm1414_vm0, %v7431_v0 }
  0x74   : > { %6174 = vmatprep.mubr.msk.bf16.mxu1 %vm1365_vm3, %v5573_v12  ;;  %v2780_v27 = vsel %vm7245_vm4, %v2775_v15, %v2779_v51  ;;  %v1058_v28 = vor.u32 %v1057_v17, %v1054_v16  ;;  %v2792_v32 = vshrl.u32 %v7398_v10, 16  ;;  %v2795_v36 = vshll.u32 %v7398_v10, 16  ;;  %v7418_v51 = vld [vmem:[%s7222_s15 + $0x4c] sm:$0xf]  ;;  %v7437_v12 = vld [vmem:[%s7222_s15 + $0x108] sm:$0xf] }
  0x75   : > { %v2790_v37 = vsel %vm7245_vm4, %v2785_v20, %v2789_v62  ;;  %v1068_v38 = vor.u32 %v1067_v25, %v1063_v22  ;;  %v1073_v40 = vrot.slane %v1071_v26, 5  ;;  %v2801_v7 = vshll.u32 %v7401_v18, 16  ;;  %v899_v62 = vld [vmem:[%s7222_s15 + $0x50] sm:$0x1] }
  0x76   : > { %v5768_v42 = vcombine.low %v2780_v27, %v2790_v37  ;;  %v1059_v45 = vrot.slane %v1058_v28, 4  ;;  %v2794_v48 = vrot.slane %v2792_v32, 4  ;;  %v2797_v50 = vrot.slane %v2795_v36, 5  ;;  %v7449_v37 = vld [vmem:[%s7222_s15 + $0x110] sm:$0x1] }
  0x77   : > { %v1069_v52 = vrot.slane %v1068_v38, 4  ;;  %v2803_v54 = vrot.slane %v2801_v7, 5  ;;  %v2805_v56 = vshrl.u32 %v7401_v18, 16  ;;  %v2811_v58 = vshll.u32 %v7407_v30, 16 }
  0x78   : > { %6310 = vmatprep.mubr.msk.bf16.mxu0 %vm1365_vm3, %v5768_v42  ;;  %v1064_v59 = vsel %vm7245_vm4, %v1059_v45, %v1063_v22  ;;  %v2798_v60 = vor.u32 %v2797_v50, %v2794_v48  ;;  %v1076_v63 = vshrl.u32 %v7415_v41, 16  ;;  %v1079_v43 = vshll.u32 %v7415_v41, 16  ;;  %v7442_v22 = vld [vmem:[%s7222_s15 + $0x10c] sm:$0xf] }
  0x79   : > { %v1074_v1 = vsel %vm7245_vm4, %v1069_v52, %v1073_v40  ;;  %v2807_v3 = vrot.slane %v2805_v56, 4  ;;  %v2813_v8 = vrot.slane %v2811_v58, 5  ;;  %v1085_v9 = vshll.u32 %v7418_v51, 16 }
  0x7a   : > { %v5574_v15 = vcombine.low %v1064_v59, %v1074_v1  ;;  %v2799_v16 = vrot.slane %v2798_v60, 4  ;;  %v1078_v17 = vrot.slane %v1076_v63, 4  ;;  %v1081_v20 = vrot.slane %v1079_v43, 5  ;;  %v7462_v43 = vld [vmem:[%s7222_s15 + $0x58] sm:$0xf] }
  0x7b   : > { %v2808_v25 = vor.u32 %v2807_v3, %v2803_v54  ;;  %v1087_v26 = vrot.slane %v1085_v9, 5  ;;  %v1089_v27 = vshrl.u32 %v7418_v51, 16  ;;  %v1095_v28 = vshll.u32 %v899_v62, 16 }
  0x7c   : > { %6175 = vmatmul.mubr.msk.bf16.gmra.mrb[8].mxu1 %vm1365_vm3, %v5574_v15  ;;  %v2804_v32 = vsel %vm7245_vm4, %v2799_v16, %v2803_v54  ;;  %v1082_v36 = vor.u32 %v1081_v20, %v1078_v17  ;;  %v2816_v38 = vshrl.u32 %v7437_v12, 16  ;;  %v2819_v40 = vshll.u32 %v7437_v12, 16  ;;  %v7456_v54 = vld [vmem:[%s7222_s15 + $0x54] sm:$0xf]  ;;  %v902_v16 = vld [vmem:[%s7222_s15 + $0x5c] sm:$0x1] }
  0x7d   : > { %v2809_v7 = vrot.slane %v2808_v25, 4  ;;  %v1091_v42 = vrot.slane %v1089_v27, 4  ;;  %v1097_v45 = vrot.slane %v1095_v28, 5  ;;  %v2825_v48 = vshll.u32 %v7442_v22, 16 }
  0x7e   : > { %v1083_v50 = vrot.slane %v1082_v36, 4  ;;  %v2818_v52 = vrot.slane %v2816_v38, 4  ;;  %v2821_v56 = vrot.slane %v2819_v40, 5  ;;  %v2829_v58 = vshrl.u32 %v7442_v22, 16 }
  0x7f   : > { %v2814_v59 = vsel %vm7245_vm4, %v2809_v7, %v2813_v8  ;;  %v1092_v60 = vor.u32 %v1091_v42, %v1087_v26  ;;  %v2827_v62 = vrot.slane %v2825_v48, 5  ;;  %v2835_v63 = vshll.u32 %v7449_v37, 16  ;;  %v7478_v48 = vld [vmem:[%s7222_s15 + $0x118] sm:$0xf] }
  0x80   : > { %v5769_v1 = vcombine.low %v2804_v32, %v2814_v59  ;;  %v1088_v3 = vsel %vm7245_vm4, %v1083_v50, %v1087_v26  ;;  %v2822_v9 = vor.u32 %v2821_v56, %v2818_v52  ;;  %v2831_v15 = vrot.slane %v2829_v58, 4  ;;  %v7473_v26 = vld [vmem:[%s7222_s15 + $0x114] sm:$0xf] }
  0x81   : > { %v1093_v17 = vrot.slane %v1092_v60, 4  ;;  %v2837_v20 = vrot.slane %v2835_v63, 5  ;;  %v1100_v25 = vshrl.u32 %v7456_v54, 16  ;;  %v1103_v8 = vshll.u32 %v7456_v54, 16 }
  0x82   : > { %6311 = vmatmul.mubr.msk.bf16.gmra.mrb[8].mxu0 %vm1365_vm3, %v5769_v1  ;;  %v2823_v27 = vrot.slane %v2822_v9, 4  ;;  %v2832_v28 = vor.u32 %v2831_v15, %v2827_v62  ;;  %v1109_v36 = vshll.u32 %v7462_v43, 16  ;;  %v1113_v32 = vshrl.u32 %v7462_v43, 16  ;;  %v7483_v1 = vld [vmem:[%s7222_s15 + $0x11c] sm:$0x1] }
  0x83   : > { %v1098_v38 = vsel %vm7245_vm4, %v1093_v17, %v1097_v45  ;;  %v1102_v40 = vrot.slane %v1100_v25, 4  ;;  %v1105_v7 = vrot.slane %v1103_v8, 5  ;;  %v1119_v42 = vshll.u32 %v902_v16, 16  ;;  %v7493_v16 = vld [vmem:[%s7222_s15 + $0x60] sm:$0xf] }
  0x84   : > { %v5575_v50 = vcombine.low %v1088_v3, %v1098_v38  ;;  %v2828_v52 = vsel %vm7245_vm4, %v2823_v27, %v2827_v62  ;;  %v2833_v56 = vrot.slane %v2832_v28, 4  ;;  %v1111_v58 = vrot.slane %v1109_v36, 5  ;;  %v7496_v28 = vld [vmem:[%s7222_s15 + $0x64] sm:$0xf] }
  0x85   : > { %v1106_v59 = vor.u32 %v1105_v7, %v1102_v40  ;;  %v1115_v60 = vrot.slane %v1113_v32, 4  ;;  %v1121_v63 = vrot.slane %v1119_v42, 5  ;;  %v2840_v45 = vshrl.u32 %v7473_v26, 16 }
  0x86   : > { %6178 = vmatprep.mubr.msk.bf16.mxu1 %vm1365_vm3, %v5575_v50  ;;  %v2838_v9 = vsel %vm7245_vm4, %v2833_v56, %v2837_v20  ;;  %v2843_v3 = vshll.u32 %v7473_v26, 16  ;;  %v2849_v15 = vshll.u32 %v7478_v48, 16  ;;  %v2853_v62 = vshrl.u32 %v7478_v48, 16 }
  0x87   : > { %v5770_v17 = vcombine.low %v2828_v52, %v2838_v9  ;;  %v1107_v25 = vrot.slane %v1106_v59, 4  ;;  %v1116_v8 = vor.u32 %v1115_v60, %v1111_v58  ;;  %v2842_v27 = vrot.slane %v2840_v45, 4  ;;  %v905_v60 = vld [vmem:[%s7222_s15 + $0x68] sm:$0x1] }
  0x88   : > { %v2845_v36 = vrot.slane %v2843_v3, 5  ;;  %v2851_v32 = vrot.slane %v2849_v15, 5  ;;  %v2855_v38 = vrot.slane %v2853_v62, 4  ;;  %v2859_v20 = vshll.u32 %v7483_v1, 16 }
  0x89   : > { %6314 = vmatprep.mubr.msk.bf16.mxu0 %vm1365_vm3, %v5770_v17  ;;  %v1112_v40 = vsel %vm7245_vm4, %v1107_v25, %v1111_v58  ;;  %v1117_v7 = vrot.slane %v1116_v8, 4  ;;  %v1124_v42 = vshrl.u32 %v7493_v16, 16  ;;  %v1127_v50 = vshll.u32 %v7493_v16, 16  ;;  %v7510_v58 = vld [vmem:[%s7222_s15 + $0x6c] sm:$0xf] }
  0x8a   : > { %v2846_v52 = vor.u32 %v2845_v36, %v2842_v27  ;;  %v2856_v56 = vor.u32 %v2855_v38, %v2851_v32  ;;  %v2861_v59 = vrot.slane %v2859_v20, 5  ;;  %v1133_v45 = vshll.u32 %v7496_v28, 16 }
  0x8b   : > { %v1122_v9 = vsel %vm7245_vm4, %v1117_v7, %v1121_v63  ;;  %v1126_v3 = vrot.slane %v1124_v42, 4  ;;  %v1129_v15 = vrot.slane %v1127_v50, 5  ;;  %v1137_v62 = vshrl.u32 %v7496_v28, 16  ;;  %v7526_v50 = vld [vmem:[%s7222_s15 + $0x70] sm:$0xf] }
  0x8c   : > { %v5576_v17 = vcombine.low %v1112_v40, %v1122_v9  ;;  %v2847_v25 = vrot.slane %v2846_v52, 4  ;;  %v2857_v8 = vrot.slane %v2856_v56, 4  ;;  %v1135_v34 = vrot.slane %v1133_v45, 5 }
  0x8d   : > { %v1130_v27 = vor.u32 %v1129_v15, %v1126_v3  ;;  %v1139_v36 = vrot.slane %v1137_v62, 4  ;;  %v1143_v38 = vshll.u32 %v905_v60, 16  ;;  %v5796_v63 = vrot.slane %v7228_v21, 9  ;;  %v7530_v21 = vld [vmem:[%s7222_s15 + $0x74] sm:$0x1] }
  0x8e   : > { %6179 = vmatmul.mubr.msk.bf16.gmra.mrb[12].mxu1 %vm1365_vm3, %v5576_v17  ;;  %v2852_v40 = vsel %vm7245_vm4, %v2847_v25, %v2851_v32  ;;  %v2862_v7 = vsel %vm7245_vm4, %v2857_v8, %v2861_v59  ;;  %v3367_v42 = vrot.slane %v7231_v23, 5  ;;  %v1148_v52 = vshrl.u32 %v7510_v58, 16 }
  0x8f   : > { %v5771_v56 = vcombine.low %v2852_v40, %v2862_v7  ;;  %v1131_v60 = vrot.slane %v1130_v27, 4  ;;  %v1140_v45 = vor.u32 %v1139_v36, %v1135_v34  ;;  %v1145_v9 = vrot.slane %v1143_v38, 5 }
  0x90   : > { %v3368_v3 = vsel %vm7514_vm7, %v5796_v63, %v3367_v42  ;;  %v3369_v32 = vrot.slane %v3367_v42, 4  ;;  %v1150_v15 = vrot.slane %v1148_v52, 4  ;;  %v1151_v59 = vshll.u32 %v7510_v58, 16  ;;  %v7547_v63 = vld [vmem:[%s7222_s15 + $0x78] sm:$0xf] }
  0x91   : > { %6315 = vmatmul.mubr.msk.bf16.gmra.mrb[12].mxu0 %vm1365_vm3, %v5771_v56  ;;  %v1136_v23 = vsel %vm7245_vm4, %v1131_v60, %v1135_v34  ;;  %v1141_v62 = vrot.slane %v1140_v45, 4  ;;  %v1157_v17 = vshll.u32 %v7526_v50, 16  ;;  %v1161_v25 = vshrl.u32 %v7526_v50, 16  ;;  %v7552_v52 = vld [vmem:[%s7222_s15 + $0x7c] sm:$0xf] }
  0x92   : > { %v3371_v8 = vsel %vm7514_vm7, %v3369_v32, %v3370_v4  ;;  %v1153_v27 = vrot.slane %v1151_v59, 5  ;;  %v1167_v36 = vshll.u32 %v7530_v21, 16  ;;  %v5797_v38 = vrot.slane %v7258_v61, 9  ;;  %v911_v45 = vld [vmem:[%s7222_s15 + $0x80] sm:$0x1] }
  0x93   : > { %v1146_v34 = vsel %vm7245_vm4, %v1141_v62, %v1145_v9  ;;  %v5813_v40 = vcombine.low %v3368_v3, %v3371_v8  ;;  %v1159_v7 = vrot.slane %v1157_v17, 5  ;;  %v1163_v42 = vrot.slane %v1161_v25, 4 }
  0x94   : > { %v5577_v56 = vcombine.low %v1136_v23, %v1146_v34  ;;  %v1154_v24 = vor.u32 %v1153_v27, %v1150_v15  ;;  %v1169_v60 = vrot.slane %v1167_v36, 5  ;;  %v3375_v4 = vsel %vm7514_vm7, %v5797_v38, %v3374_v29  ;;  %v7576_v34 = vld [vmem:[%s7222_s15 + $0x84] sm:$0xf] }
  0x95   : > { %6336 = vmatprep.mubr.msk.bf16.mxu0 %vm1365_vm3, %v5813_v40  ;;  %v1164_v61 = vor.u32 %v1163_v42, %v1159_v7  ;;  %v3376_v9 = vrot.slane %v3374_v29, 4  ;;  %v3951_v3 = vsel %vm1414_vm0, %v7364_v19, 0  ;;  %v1172_v32 = vshrl.u32 %v7547_v63, 16  ;;  %v7579_v40 = vld [vmem:[%s7222_s15 + $0x88] sm:$0xf] }
  0x96   : > { %6182 = vmatprep.mubr.msk.bf16.mxu1 %vm1365_vm3, %v5577_v56  ;;  %v1155_v15 = vrot.slane %v1154_v24, 4  ;;  %v1175_v59 = vshll.u32 %v7547_v63, 16  ;;  %v1181_v23 = vshll.u32 %v7552_v52, 16  ;;  %v1185_v62 = vshrl.u32 %v7552_v52, 16 }
  0x97   : > { %v1165_v17 = vrot.slane %v1164_v61, 4  ;;  %v9242_v2 = vrot.slane %v7268_v6, 5  ;;  %v1174_v25 = vrot.slane %v1172_v32, 4  ;;  %v1191_v19 = vshll.u32 %v911_v45, 16  ;;  %v7587_v45 = vld [vmem:[%s9207_s1 + $0xe] sm:$0x3] }
  0x98   : > { %v1160_v8 = vsel %vm7245_vm4, %v1155_v15, %v1159_v7  ;;  %v1177_v36 = vrot.slane %v1175_v59, 5  ;;  %v1183_v38 = vrot.slane %v1181_v23, 5  ;;  %v1187_v6 = vrot.slane %v1185_v62, 4 }
  0x99   : > { %v3378_v29 = vsel %vm7514_vm7, %v3376_v9, %v9242_v2  ;;  %v1170_v42 = vsel %vm7245_vm4, %v1165_v17, %v1169_v60  ;;  %v1193_v56 = vrot.slane %v1191_v19, 5  ;;  %v5798_v24 = vrot.slane %v7292_v35, 9  ;;  %v914_v60 = vld [vmem:[%s7222_s15 + $0x8c] sm:$0x1] }
  0x9a   : > { %v5814_v27 = vcombine.low %v3375_v4, %v3378_v29  ;;  %v5578_v7 = vcombine.low %v1160_v8, %v1170_v42  ;;  %v1178_v4 = vor.u32 %v1177_v36, %v1174_v25  ;;  %v3381_v61 = vrot.slane %v7296_v49, 5  ;;  %v7607_v36 = vld [vmem:[%s7222_s15 + $0x90] sm:$0xf] }
  0x9b   : > { %v3384_v9 = vrot.slane %v7301_v55, 5  ;;  %v1188_v32 = vor.u32 %v1187_v6, %v1183_v38  ;;  %v1196_v15 = vshrl.u32 %v7576_v34, 16  ;;  %v1199_v35 = vshll.u32 %v7576_v34, 16 }
  0x9c   : > { %6337 = vmatmul.mubr.msk.bf16.vlgmr.msra.gmra.mrb[0].mxu0 %vm1365_vm3, %v5814_v27  ;;  %v1205_v59 = vshll.u32 %v7579_v40, 16  ;;  %6183 = vmatmul.mubr.msk.bf16.gmra.mrb[16].mxu1 %vm1365_vm3, %v5578_v7  ;;  %v1179_v23 = vrot.slane %v1178_v4, 4  ;;  %v3382_v62 = vsel %vm7514_vm7, %v5798_v24, %v3381_v61  ;;  %v3383_v17 = vrot.slane %v3381_v61, 4  ;;  %v7613_v4 = vld [vmem:[%s7222_s15 + $0x94] sm:$0xf] }
  0x9d   : > { %6369 = vmatpush3.bf16.msra.mxu0 %v3951_v3  ;;  %v1209_v49 = vshrl.u32 %v7579_v40, 16  ;;  %v1189_v55 = vrot.slane %v1188_v32, 4  ;;  %v1198_v3 = vrot.slane %v1196_v15, 4  ;;  %v1201_v2 = vrot.slane %v1199_v35, 5  ;;  %v917_v35 = vld [vmem:[%s7222_s15 + $0x98] sm:$0x1] }
  0x9e   : > { %6736 = vmatprep.subr.msk.bf16.mxu0 %vm1414_vm0, %v7587_v45  ;;  %v1207_v29 = vrot.slane %v1205_v59, 5  ;;  %v1184_v25 = vsel %vm7245_vm4, %v1179_v23, %v1183_v38  ;;  %v3385_v19 = vsel %vm7514_vm7, %v3383_v17, %v3384_v9  ;;  %v1215_v27 = vshll.u32 %v914_v60, 16 }
  0x9f   : > { %v1211_v8 = vrot.slane %v1209_v49, 4  ;;  %v1194_v42 = vsel %vm7245_vm4, %v1189_v55, %v1193_v56  ;;  %v5815_v6 = vcombine.low %v3382_v62, %v3385_v19  ;;  %v1202_v24 = vor.u32 %v1201_v2, %v1198_v3 }
  0xa0   : > { %v5799_v7 = vrot.slane %v7318_v13, 9  ;;  %v5579_v61 = vcombine.low %v1184_v25, %v1194_v42  ;;  %v1217_v38 = vrot.slane %v1215_v27, 5  ;;  %v3388_v15 = vrot.slane %v7324_v33, 5 }
  0xa1   : > { %v1212_v32 = vor.u32 %v1211_v8, %v1207_v29  ;;  %6340 = vmatprep.mubr.msk.bf16.mxu0 %vm1365_vm3, %v5815_v6  ;;  %v1203_v9 = vrot.slane %v1202_v24, 4  ;;  %v3391_v60 = vrot.slane %v7331_v44, 5  ;;  %v1220_v56 = vshrl.u32 %v7607_v36, 16  ;;  %v7633_v8 = vld [vmem:[%s7222_s15 + $0x9c] sm:$0xf] }
  0xa2   : > { %v1223_v59 = vshll.u32 %v7607_v36, 16  ;;  %6186 = vmatprep.mubr.msk.bf16.mxu1 %vm1365_vm3, %v5579_v61  ;;  %v3389_v23 = vsel %vm7514_vm7, %v5799_v7, %v3388_v15  ;;  %v3390_v62 = vrot.slane %v3388_v15, 4  ;;  %v1229_v33 = vshll.u32 %v7613_v4, 16 }
  0xa3   : > { %v1213_v13 = vrot.slane %v1212_v32, 4  ;;  %v1208_v17 = vsel %vm7245_vm4, %v1203_v9, %v1207_v29  ;;  %v1222_v44 = vrot.slane %v1220_v56, 4  ;;  %v1233_v55 = vshrl.u32 %v7613_v4, 16  ;;  %v7636_v29 = vld [vmem:[%s7222_s15 + $0xa0] sm:$0xf] }
  0xa4   : > { %v1225_v49 = vrot.slane %v1223_v59, 5  ;;  %v3392_v2 = vsel %vm7514_vm7, %v3390_v62, %v3391_v60  ;;  %v1231_v25 = vrot.slane %v1229_v33, 5  ;;  %v1239_v19 = vshll.u32 %v917_v35, 16  ;;  %v7644_v60 = vld [vmem:[%s7222_s15 + $0xa4] sm:$0x1] }
  0xa5   : > { %v1218_v3 = vsel %vm7245_vm4, %v1213_v13, %v1217_v38  ;;  %v5816_v42 = vcombine.low %v3389_v23, %v3392_v2  ;;  %v1235_v24 = vrot.slane %v1233_v55, 4  ;;  %v5800_v61 = vrot.slane %v7352_v5, 9 }
  0xa6   : > { %v5580_v27 = vcombine.low %v1208_v17, %v1218_v3  ;;  %v1226_v6 = vor.u32 %v1225_v49, %v1222_v44  ;;  %v1241_v7 = vrot.slane %v1239_v19, 5  ;;  %v3395_v32 = vrot.slane %v7356_v14, 5  ;;  %v7658_v3 = vld [vmem:[%s7222_s15 + $0xa8] sm:$0xf] }
  0xa7   : > { %v3398_v38 = vrot.slane %v7371_v31, 5  ;;  %6341 = vmatmul.mubr.msk.bf16.gmra.mrb[4].mxu0 %vm1365_vm3, %v5816_v42  ;;  %v1236_v9 = vor.u32 %v1235_v24, %v1231_v25  ;;  %v1244_v35 = vshrl.u32 %v7633_v8, 16  ;;  %v1247_v56 = vshll.u32 %v7633_v8, 16  ;;  %9243 = vst [vmem:[#allocation4_spill] sm:$0xff] %v7658_v3  ;;  %v7664_v42 = vld [vmem:[%s7222_s15 + $0xac] sm:$0xf] }
  0xa8   : > { %6187 = vmatmul.mubr.msk.bf16.gmra.mrb[20].mxu1 %vm1365_vm3, %v5580_v27  ;;  %v1227_v15 = vrot.slane %v1226_v6, 4  ;;  %v3396_v5 = vsel %vm7514_vm7, %v5800_v61, %v3395_v32  ;;  %v3397_v59 = vrot.slane %v3395_v32, 4  ;;  %v1253_v14 = vshll.u32 %v7636_v29, 16  ;;  %9244 = vst [vmem:[#allocation5_spill] sm:$0xff] %v7664_v42 }
  0xa9   : > { %v1257_v31 = vshrl.u32 %v7636_v29, 16  ;;  %v1237_v23 = vrot.slane %v1236_v9, 4  ;;  %v1246_v62 = vrot.slane %v1244_v35, 4  ;;  %v1249_v33 = vrot.slane %v1247_v56, 5  ;;  %v7670_v9 = vld [vmem:[%s7222_s15 + $0xb0] sm:$0x1] }
  0xaa   : > { %v1232_v13 = vsel %vm7245_vm4, %v1227_v15, %v1231_v25  ;;  %v3399_v17 = vsel %vm7514_vm7, %v3397_v59, %v3398_v38  ;;  %v1255_v44 = vrot.slane %v1253_v14, 5  ;;  %v1263_v55 = vshll.u32 %v7644_v60, 16  ;;  %9245 = vst [vmem:[#allocation6_spill] sm:$0xff] %v7670_v9 }
  0xab   : > { %v1259_v49 = vrot.slane %v1257_v31, 4  ;;  %v1242_v2 = vsel %vm7245_vm4, %v1237_v23, %v1241_v7  ;;  %v5817_v19 = vcombine.low %v3396_v5, %v3399_v17  ;;  %v1250_v27 = vor.u32 %v1249_v33, %v1246_v62  ;;  %v7687_v17 = vld [vmem:[%s7222_s15 + $0xb4] sm:$0xf] }
  0xac   : > { %v5801_v25 = vrot.slane %v7398_v10, 9  ;;  %v5581_v6 = vcombine.low %v1232_v13, %v1242_v2  ;;  %v1265_v61 = vrot.slane %v1263_v55, 5  ;;  %v3402_v32 = vrot.slane %v7401_v18, 5 }
  0xad   : > { %v1260_v24 = vor.u32 %v1259_v49, %v1255_v44  ;;  %6344 = vmatprep.mubr.msk.bf16.mxu0 %vm1365_vm3, %v5817_v19  ;;  %v1251_v38 = vrot.slane %v1250_v27, 4  ;;  %v3405_v15 = vrot.slane %v7407_v30, 5  ;;  %v1268_v7 = vshrl.u32 %v7658_v3, 16  ;;  %v7690_v19 = vld [vmem:[%s7222_s15 + $0xb8] sm:$0xf] }
  0xae   : > { %v1271_v35 = vshll.u32 %v7658_v3, 16  ;;  %6190 = vmatprep.mubr.msk.bf16.mxu1 %vm1365_vm3, %v5581_v6  ;;  %v3403_v56 = vsel %vm7514_vm7, %v5801_v25, %v3402_v32  ;;  %v3404_v18 = vrot.slane %v3402_v32, 4  ;;  %v1277_v5 = vshll.u32 %v7664_v42, 16  ;;  %9246 = vst [vmem:[#allocation7_spill] sm:$0xff] %v7690_v19 }
  0xaf   : > { %v1261_v10 = vrot.slane %v1260_v24, 4  ;;  %v1256_v30 = vsel %vm7245_vm4, %v1251_v38, %v1255_v44  ;;  %v1270_v59 = vrot.slane %v1268_v7, 4  ;;  %v1281_v31 = vshrl.u32 %v7664_v42, 16  ;;  %v926_v38 = vld [vmem:[%s7222_s15 + $0xbc] sm:$0x1] }
  0xb0   : > { %v1273_v14 = vrot.slane %v1271_v35, 5  ;;  %v3406_v23 = vsel %vm7514_vm7, %v3404_v18, %v3405_v15  ;;  %v1279_v62 = vrot.slane %v1277_v5, 5  ;;  %v1287_v33 = vshll.u32 %v7670_v9, 16 }
  0xb1   : > { %v1266_v13 = vsel %vm7245_vm4, %v1261_v10, %v1265_v61  ;;  %v5818_v55 = vcombine.low %v3403_v56, %v3406_v23  ;;  %v1283_v44 = vrot.slane %v1281_v31, 4  ;;  %v5802_v25 = vrot.slane %v7437_v12, 9  ;;  %v5707_v23 = vld [vmem:[%s7222_s15 + $0x124] sm:$0xf] }
  0xb2   : > { %v5582_v49 = vcombine.low %v1256_v30, %v1266_v13  ;;  %v1274_v2 = vor.u32 %v1273_v14, %v1270_v59  ;;  %v1289_v27 = vrot.slane %v1287_v33, 5  ;;  %v3409_v6 = vrot.slane %v7442_v22, 5  ;;  %v5706_v30 = vld [vmem:[%s7222_s15 + $0x120] sm:$0xf] }
  0xb3   : > { %v3412_v24 = vrot.slane %v7449_v37, 5  ;;  %6345 = vmatmul.mubr.msk.bf16.gmra.mrb[8].mxu0 %vm1365_vm3, %v5818_v55  ;;  %v1284_v32 = vor.u32 %v1283_v44, %v1279_v62  ;;  %v1292_v15 = vshrl.u32 %v7687_v17, 16  ;;  %v1295_v7 = vshll.u32 %v7687_v17, 16  ;;  %v5708_v44 = vld [vmem:[%s7222_s15 + $0x128] sm:$0x1] }
  0xb4   : > { %6191 = vmatmul.mubr.msk.bf16.gmra.mrb[24].mxu1 %vm1365_vm3, %v5582_v49  ;;  %v1275_v61 = vrot.slane %v1274_v2, 4  ;;  %v3410_v12 = vsel %vm7514_vm7, %v5802_v25, %v3409_v6  ;;  %v3411_v35 = vrot.slane %v3409_v6, 4  ;;  %v1301_v22 = vshll.u32 %v7690_v19, 16 }
  0xb5   : > { %v1305_v37 = vshrl.u32 %v7690_v19, 16  ;;  %v1285_v56 = vrot.slane %v1284_v32, 4  ;;  %v1294_v18 = vrot.slane %v1292_v15, 4  ;;  %v1297_v5 = vrot.slane %v1295_v7, 5 }
  0xb6   : > { %v1280_v10 = vsel %vm7245_vm4, %v1275_v61, %v1279_v62  ;;  %v3413_v59 = vsel %vm7514_vm7, %v3411_v35, %v3412_v24  ;;  %v1303_v14 = vrot.slane %v1301_v22, 5  ;;  %v1311_v13 = vshll.u32 %v926_v38, 16 }
  0xb7   : > { %v1307_v31 = vrot.slane %v1305_v37, 4  ;;  %v1290_v33 = vsel %vm7245_vm4, %v1285_v56, %v1289_v27  ;;  %v5819_v49 = vcombine.low %v3410_v12, %v3413_v59  ;;  %v1298_v55 = vor.u32 %v1297_v5, %v1294_v18  ;;  %v7732_v56 = vld [vmem:[%s7222_s15 + $0x4] sm:$0xf]  ;;  %v5709_v5 = vld [vmem:[%s7222_s15 + $0x12c] sm:$0xf] }
  0xb8   : > { %v5803_v2 = vrot.slane %v7473_v26, 9  ;;  %v5583_v62 = vcombine.low %v1280_v10, %v1290_v33  ;;  %v1313_v6 = vrot.slane %v1311_v13, 5  ;;  %v3416_v61 = vrot.slane %v7478_v48, 5  ;;  %v7729_v10 = vld [vmem:[%s7222_s15] sm:$0xf] }
  0xb9   : > { %v1308_v25 = vor.u32 %v1307_v31, %v1303_v14  ;;  %6348 = vmatprep.mubr.msk.bf16.mxu0 %vm1365_vm3, %v5819_v49  ;;  %v1299_v24 = vrot.slane %v1298_v55, 4  ;;  %v3419_v32 = vrot.slane %v7483_v1, 5  ;;  %v5804_v38 = vrot.slane %v5706_v30, 9  ;;  %v5710_v30 = vld [vmem:[%s7222_s15 + $0x130] sm:$0xf] }
  0xba   : > { %v3423_v27 = vrot.slane %v5707_v23, 5  ;;  %6194 = vmatprep.mubr.msk.bf16.mxu1 %vm1365_vm3, %v5583_v62  ;;  %v3417_v15 = vsel %vm7514_vm7, %v5803_v2, %v3416_v61  ;;  %v3418_v7 = vrot.slane %v3416_v61, 4  ;;  %v3426_v48 = vrot.slane %v5708_v44, 5  ;;  %v5711_v13 = vld [vmem:[%s7222_s15 + $0x134] sm:$0x1] }
  0xbb   : > { %v1309_v26 = vrot.slane %v1308_v25, 4  ;;  %v1304_v12 = vsel %vm7245_vm4, %v1299_v24, %v1303_v14  ;;  %v5601_v18 = vcombine.low %v7729_v10, %v7732_v56  ;;  %v5712_v33 = vld [vmem:[%s7222_s15 + $0x138] sm:$0xf]  ;;  %v5713_v49 = vld [vmem:[%s7222_s15 + $0x13c] sm:$0xf]  ;;  %v5805_v55 = vrot.slane %v5709_v5, 9 }
  0xbc   : > { %v3424_v1 = vsel %vm7514_vm7, %v5804_v38, %v3423_v27  ;;  %v3425_v35 = vrot.slane %v3423_v27, 4  ;;  %v3420_v37 = vsel %vm7514_vm7, %v3418_v7, %v3419_v32  ;;  %v3430_v2 = vrot.slane %v5710_v30, 5  ;;  %v5714_v44 = vld [vmem:[%s7222_s15 + $0x140] sm:$0x1]  ;;  %v5715_v62 = vld [vmem:[%s7222_s15 + $0x144] sm:$0xf] }
  0xbd   : > { %v1314_v22 = vsel %vm7245_vm4, %v1309_v26, %v1313_v6  ;;  %v5820_v14 = vcombine.low %v3417_v15, %v3420_v37  ;;  %v3433_v25 = vrot.slane %v5711_v13, 5  ;;  %v5716_v6 = vld [vmem:[%s7222_s15 + $0x148] sm:$0xf]  ;;  %v5717_v61 = vld [vmem:[%s7222_s15 + $0x14c] sm:$0x1]  ;;  %v5806_v38 = vrot.slane %v5712_v33, 9 }
  0xbe   : > { %v5584_v59 = vcombine.low %v1304_v12, %v1314_v22  ;;  %v3427_v31 = vsel %vm7514_vm7, %v3425_v35, %v3426_v48  ;;  %v3431_v24 = vsel %vm7514_vm7, %v5805_v55, %v3430_v2  ;;  %v3432_v32 = vrot.slane %v3430_v2, 4  ;;  %v5718_v27 = vld [vmem:[%s7222_s15 + $0x150] sm:$0xf]  ;;  %v5719_v26 = vld [vmem:[%s7222_s15 + $0x154] sm:$0xf] }
  0xbf   : > { %v5821_v23 = vcombine.low %v3424_v1, %v3427_v31  ;;  %6349 = vmatmul.mubr.msk.bf16.gmra.mrb[12].mxu0 %vm1365_vm3, %v5820_v14  ;;  %v7756_v15 = vld [vmem:[%s7222_s15 + $0xc] sm:$0xf]  ;;  %v7759_v7 = vld [vmem:[%s7222_s15 + $0x10] sm:$0xf]  ;;  %v2101_v12 = vsel %vm1414_vm0, %v7431_v0, 0  ;;  %v3437_v1 = vrot.slane %v5713_v49, 5 }
  0xc0   : > { %6195 = vmatmul.mubr.msk.bf16.gmra.mrb[28].mxu1 %vm1365_vm3, %v5584_v59  ;;  %v5602_v48 = vcombine.low %v7756_v15, %v7759_v7  ;;  %v3440_v35 = vrot.slane %v5714_v44, 5  ;;  %v5720_v22 = vld [vmem:[%s7222_s15 + $0x158] sm:$0x1]  ;;  %v3434_v37 = vsel %vm7514_vm7, %v3432_v32, %v3433_v25  ;;  %v7772_v5 = vld [vmem:[%s7222_s15 + $0x1c] sm:$0xf]  ;;  %v5807_v59 = vrot.slane %v5715_v62, 9 }
  0xc1   : > { %6200 = vmatprep.mubr.msk.bf16.mxu1 %vm1365_vm3, %v5601_v18  ;;  %6352 = vmatprep.mubr.msk.bf16.mxu0 %vm1365_vm3, %v5821_v23  ;;  %v7769_v18 = vld [vmem:[%s7222_s15 + $0x18] sm:$0xf]  ;;  %v3444_v14 = vrot.slane %v5716_v6, 5  ;;  %v5822_v31 = vcombine.low %v3431_v24, %v3434_v37  ;;  %v3438_v0 = vsel %vm7514_vm7, %v5806_v38, %v3437_v1  ;;  %v3439_v13 = vrot.slane %v3437_v1, 4  ;;  %v5722_v44 = vld [vmem:[%s7222_s15 + $0x160] sm:$0xf] }
  0xc2   : > { %v5603_v30 = vcombine.low %v7769_v18, %v7772_v5  ;;  %v3447_v23 = vrot.slane %v5717_v61, 5  ;;  %v5808_v49 = vrot.slane %v5718_v27, 9  ;;  %v3451_v55 = vrot.slane %v5719_v26, 5  ;;  %v5725_v32 = vld [vmem:[%s7222_s15 + $0x16c] sm:$0xf] }
  0xc3   : > { %v3446_v33 = vrot.slane %v3444_v14, 4  ;;  %v3454_v2 = vrot.slane %v5720_v22, 5  ;;  %v3441_v25 = vsel %vm7514_vm7, %v3439_v13, %v3440_v35  ;;  %v7785_v62 = vld [vmem:[%s9207_s1 + $0x6] sm:$0x3]  ;;  %v3445_v24 = vsel %vm7514_vm7, %v5807_v59, %v3444_v14  ;;  %v5721_v1 = vld [vmem:[%s7222_s15 + $0x15c] sm:$0xf] }
  0xc4   : > { %v5823_v6 = vcombine.low %v3438_v0, %v3441_v25  ;;  %v3453_v61 = vrot.slane %v3451_v55, 4  ;;  %v3458_v27 = vrot.slane %v5722_v44, 5  ;;  %v3452_v26 = vsel %vm7514_vm7, %v5808_v49, %v3451_v55  ;;  %v5723_v35 = vld [vmem:[%s7222_s15 + $0x164] sm:$0x1]  ;;  %v5724_v22 = vld [vmem:[%s7222_s15 + $0x168] sm:$0xf] }
  0xc5   : > { %v3448_v38 = vsel %vm7514_vm7, %v3446_v33, %v3447_v23  ;;  %v5726_v37 = vld [vmem:[%s7222_s15 + $0x170] sm:$0x1]  ;;  %v7809_v59 = vld [vmem:[%s7222_s15 + $0x28] sm:$0xf]  ;;  %v5605_v0 = vcombine.low %v7335_v46, %v7341_v57  ;;  %v5809_v23 = vrot.slane %v5721_v1, 9  ;;  %v3461_v49 = vrot.slane %v5723_v35, 5 }
  0xc6   : > { %v3460_v33 = vrot.slane %v3458_v27, 4  ;;  %v5810_v55 = vrot.slane %v5724_v22, 9  ;;  %v3468_v44 = vrot.slane %v5726_v37, 5  ;;  %v5728_v25 = vld [vmem:[%s7222_s15 + $0x178] sm:$0xf] }
  0xc7   : > { %6353 = vmatmul.mubr.msk.bf16.gmra.mrb[16].mxu0 %vm1365_vm3, %v5822_v31  ;;  %v5824_v31 = vcombine.low %v3445_v24, %v3448_v38  ;;  %v3459_v46 = vsel %vm7514_vm7, %v5809_v23, %v3458_v27  ;;  %v5727_v24 = vld [vmem:[%s7222_s15 + $0x174] sm:$0xf]  ;;  %v5729_v38 = vld [vmem:[%s7222_s15 + $0x17c] sm:$0x1]  ;;  %v5607_v27 = vcombine.low %v7415_v41, %v7418_v51  ;;  %v7843_v41 = vld [vmem:[%s7222_s15 + $0x180] sm:$0xf] }
  0xc8   : > { %6201 = vmatmul.mubr.msk.bf16.vlgmr.msra.gmra.mrb[0].mxu1 %vm1365_vm3, %v5602_v48  ;;  %6356 = vmatprep.mubr.msk.bf16.mxu0 %vm1365_vm3, %v5823_v6  ;;  %v3455_v48 = vsel %vm7514_vm7, %v3453_v61, %v3454_v2  ;;  %v3462_v57 = vsel %vm7514_vm7, %v3460_v33, %v3461_v49  ;;  %v5811_v35 = vrot.slane %v5727_v24, 9  ;;  %v3475_v37 = vrot.slane %v5729_v38, 5  ;;  %v7846_v51 = vld [vmem:[%s7222_s15 + $0x184] sm:$0xf]  ;;  %v6844_v38 = vld [vmem:[%s7222_s15 + $0x38] sm:$0x1] }
  0xc9   : > { %6233 = vmatpush3.bf16.msra.mxu1 %v2101_v12  ;;  %6204 = vmatprep.mubr.msk.bf16.mxu1 %vm1365_vm3, %v5603_v30  ;;  %v3465_v12 = vrot.slane %v5725_v32, 5  ;;  %v7806_v30 = vld [vmem:[%s7222_s15 + $0x24] sm:$0xf]  ;;  %v5825_v13 = vcombine.low %v3452_v26, %v3455_v48  ;;  %v3472_v32 = vrot.slane %v5728_v25, 5  ;;  %v5606_v26 = vcombine.low %v7379_v47, %v7385_v53 }
  0xca   : > { %6731 = vmatprep.subr.msk.bf16.mxu1 %vm1414_vm0, %v7785_v62  ;;  %v5604_v14 = vcombine.low %v7806_v30, %v7809_v59  ;;  %v5826_v48 = vcombine.low %v3459_v46, %v3462_v57  ;;  %v5611_v33 = vcombine.low %v7547_v63, %v7552_v52  ;;  %v4629_v49 = vsel %vm1414_vm0, %v7587_v45, 0  ;;  %v7892_v63 = vld [vmem:[%s7222_s15 + $0x1a8] sm:$0xf]  ;;  %v7896_v52 = vld [vmem:[%s7222_s15 + $0x1b0] sm:$0xf] }
  0xcb   : > { %v3467_v2 = vrot.slane %v3465_v12, 4  ;;  %v3466_v6 = vsel %vm7514_vm7, %v5810_v55, %v3465_v12  ;;  %v3474_v22 = vrot.slane %v3472_v32, 4  ;;  %v3473_v47 = vsel %vm7514_vm7, %v5811_v35, %v3472_v32  ;;  %v7899_v45 = vld [vmem:[%s7222_s15 + $0x1b4] sm:$0xf]  ;;  %v7927_v35 = vld [vmem:[%s7222_s15 + $0x1c0] sm:$0xf] }
  0xcc   : > { %v5608_v12 = vcombine.low %v7456_v54, %v7462_v43  ;;  %v7862_v54 = vld [vmem:[%s7222_s15 + $0x190] sm:$0xf]  ;;  %v7865_v43 = vld [vmem:[%s7222_s15 + $0x198] sm:$0xf]  ;;  %v1899_v46 = vrot.slane %v7759_v7, 5  ;;  %v1923_v11 = vrot.slane %v6844_v38, 5 }
  0xcd   : > { %v3469_v61 = vsel %vm7514_vm7, %v3467_v2, %v3468_v44  ;;  %v3476_v53 = vsel %vm7514_vm7, %v3474_v22, %v3475_v37  ;;  %v7883_v2 = vld [vmem:[%s9207_s1 + $0x10] sm:$0x3]  ;;  %v7904_v44 = vld [vmem:[%s7222_s15 + $0x8] sm:$0x1]  ;;  %v7909_v57 = vld [vmem:[%s7222_s15 + $0x14] sm:$0x1] }
  0xce   : > { %v5827_v1 = vcombine.low %v3466_v6, %v3469_v61  ;;  %v1895_v25 = vrot.slane %v7904_v44, 5  ;;  %v1902_v32 = vrot.slane %v7909_v57, 5  ;;  %v5612_v61 = vcombine.low %v7576_v34, %v7579_v40  ;;  %v7985_v34 = vld [vmem:[%s7222_s15 + $0x1ec] sm:$0xf]  ;;  %v8029_v7 = vld [vmem:[%s7222_s15 + $0x1f8] sm:$0xf] }
  0xcf   : > { %6357 = vmatmul.mubr.msk.bf16.gmra.mrb[20].mxu0 %vm1365_vm3, %v5824_v31  ;;  %v5609_v31 = vcombine.low %v7493_v16, %v7496_v28  ;;  %v7868_v16 = vld [vmem:[%s7222_s15 + $0x19c] sm:$0xf]  ;;  %v5610_v28 = vcombine.low %v7510_v58, %v7526_v50  ;;  %v7889_v58 = vld [vmem:[%s7222_s15 + $0x1a4] sm:$0xf]  ;;  %v5634_v37 = vrot.slane %v7756_v15, 9  ;;  %v1901_v22 = vrot.slane %v1899_v46, 4 }
  0xd0   : > { %6205 = vmatmul.mubr.msk.bf16.gmra.mrb[4].mxu1 %vm1365_vm3, %v5604_v14  ;;  %6360 = vmatprep.mubr.msk.bf16.mxu0 %vm1365_vm3, %v5825_v13  ;;  %v5828_v14 = vcombine.low %v3473_v47, %v3476_v53  ;;  %v7859_v13 = vld [vmem:[%s7222_s15 + $0x18c] sm:$0xf]  ;;  %v5896_v55 = vcombine.low %v7865_v43, %v7868_v16  ;;  %v5897_v24 = vcombine.low %v7889_v58, %v7892_v63  ;;  %v7934_v53 = vld [vmem:[%s7222_s15 + $0x1c8] sm:$0xf]  ;;  %v1913_v15 = vrot.slane %v7809_v59, 5 }
  0xd1   : > { %6208 = vmatprep.mubr.msk.bf16.mxu1 %vm1365_vm3, %v5605_v0  ;;  %v5894_v0 = vcombine.low %v7843_v41, %v7846_v51  ;;  %v5895_v23 = vcombine.low %v7859_v13, %v7862_v54  ;;  %9248 = vst [vmem:[#allocation9_spill] sm:$0xff] %v7934_v53  ;;  %9253 = vst [vmem:[#allocation14_spill] sm:$0xff] %v7985_v34  ;;  %v8020_v44 = vsel %vm7514_vm7, %v1901_v22, %v1902_v32  ;;  %v6841_v47 = vld [vmem:[%s7222_s15 + $0x2c] sm:$0x1] }
  0xd2   : > { %v8024_v59 = vsel %vm1414_vm0, %v7785_v62, 0  ;;  %9255 = vst [vmem:[#allocation16_spill] sm:$0xff] %v8029_v7  ;;  %v5635_v57 = vrot.slane %v7769_v18, 9  ;;  %v6839_v62 = vld [vmem:[%s7222_s15 + $0x20] sm:$0x1]  ;;  %v4156_v6 = vshll.u32 %v7846_v51, 16 }
  0xd3   : > { %v1909_v22 = vrot.slane %v6839_v62, 5  ;;  %v1915_v62 = vrot.slane %v1913_v15, 4 }
  0xd4   : > { %v8127_v9 = vrot.slane %v4156_v6, 5 }
  0xd7   : > { %6361 = vmatmul.mubr.msk.bf16.gmra.mrb[24].mxu0 %vm1365_vm3, %v5826_v48  ;;  %v5613_v48 = vcombine.low %v7607_v36, %v7613_v4  ;;  %v5633_v36 = vrot.slane %v7729_v10, 9 }
  0xd8   : > { %6209 = vmatmul.mubr.msk.bf16.gmra.mrb[8].mxu1 %vm1365_vm3, %v5606_v26  ;;  %6364 = vmatprep.mubr.msk.bf16.mxu0 %vm1365_vm3, %v5827_v1  ;;  %v7924_v1 = vld [vmem:[%s7222_s15 + $0x1bc] sm:$0xf]  ;;  %v7992_v26 = vld [vmem:[%s7222_s15 + $0x1f0] sm:$0xf] }
  0xd9   : > { %6212 = vmatprep.mubr.msk.bf16.mxu1 %vm1365_vm3, %v5607_v27  ;;  %v5898_v27 = vcombine.low %v7896_v52, %v7899_v45  ;;  %9247 = vst [vmem:[#allocation8_spill] sm:$0xff] %v7924_v1  ;;  %9254 = vst [vmem:[#allocation15_spill] sm:$0xff] %v7992_v26 }
  0xdf   : > { %6365 = vmatmul.mubr.msk.bf16.gmra.mrb[28].mxu0 %vm1365_vm3, %v5828_v14 }
  0xe0   : > { %6213 = vmatmul.mubr.msk.bf16.gmra.mrb[12].mxu1 %vm1365_vm3, %v5608_v12  ;;  %6370 = vmatprep.mubr.msk.bf16.mxu0 %vm1365_vm3, %v5894_v0  ;;  %v1892_v0 = vrot.slane %v7732_v56, 5  ;;  %v7976_v12 = vld [vmem:[%s7222_s15 + $0x1e4] sm:$0xf] }
  0xe1   : > { %6216 = vmatprep.mubr.msk.bf16.mxu1 %vm1365_vm3, %v5609_v31  ;;  %v7940_v31 = vld [vmem:[%s7222_s15 + $0x1cc] sm:$0xf]  ;;  %9252 = vst [vmem:[#allocation13_spill] sm:$0xff] %v7976_v12 }
  0xe2   : > { %v5900_v56 = vcombine.low %v7934_v53, %v7940_v31  ;;  %v1893_v10 = vsel %vm7514_vm7, %v5633_v36, %v1892_v0  ;;  %v8014_v36 = vsel %vm7514_vm7, %v5634_v37, %v1899_v46  ;;  %v8040_v37 = vld [vmem:[%s7222_s15 + $0x204] sm:$0xf]  ;;  %v5636_v46 = vrot.slane %v7806_v30, 9 }
  0xe7   : > { %6371 = vmatmul.mubr.msk.bf16.vlgmr.msra.gmra.mrb[0].mxu0 %vm1365_vm3, %v5895_v23  ;;  %v7958_v23 = vld [vmem:[%s7222_s15 + $0x1d4] sm:$0xf] }
  0xe8   : > { %6217 = vmatmul.mubr.msk.bf16.gmra.mrb[16].mxu1 %vm1365_vm3, %v5610_v28  ;;  %6403 = vmatpush3.bf16.msra.mxu0 %v4629_v49  ;;  %9249 = vst [vmem:[#allocation10_spill] sm:$0xff] %v7958_v23  ;;  %v7970_v28 = vld [vmem:[%s7222_s15 + $0x1e0] sm:$0xf]  ;;  %v1894_v49 = vrot.slane %v1892_v0, 4  ;;  %v8032_v0 = vld [vmem:[%s7222_s15 + $0x1fc] sm:$0xf] }
  0xe9   : > { %6220 = vmatprep.mubr.msk.bf16.mxu1 %vm1365_vm3, %v5611_v33  ;;  %6374 = vmatprep.mubr.msk.bf16.mxu0 %vm1365_vm3, %v5896_v55  ;;  %v5614_v55 = vcombine.low %v7633_v8, %v7636_v29  ;;  %v7967_v33 = vld [vmem:[%s7222_s15 + $0x1d8] sm:$0xf]  ;;  %9251 = vst [vmem:[#allocation12_spill] sm:$0xff] %v7970_v28  ;;  %9256 = vst [vmem:[#allocation17_spill] sm:$0xff] %v8032_v0 }
  0xea   : > { %6737 = vmatprep.subr.msk.bf16.mxu0 %vm1414_vm0, %v7883_v2  ;;  %9250 = vst [vmem:[#allocation11_spill] sm:$0xff] %v7967_v33  ;;  %v5901_v14 = vcombine.low %v7958_v23, %v7967_v33 }
  0xef   : > { %6375 = vmatmul.mubr.msk.bf16.gmra.mrb[4].mxu0 %vm1365_vm3, %v5897_v24  ;;  %v1896_v24 = vsel %vm7514_vm7, %v1894_v49, %v1895_v25  ;;  %v8068_v25 = vld [vmem:[%s7222_s15 + $0x210] sm:$0xf] }
  0xf0   : > { %6221 = vmatmul.mubr.msk.bf16.gmra.mrb[20].mxu1 %vm1365_vm3, %v5612_v61  ;;  %6378 = vmatprep.mubr.msk.bf16.mxu0 %vm1365_vm3, %v5898_v27  ;;  %v5899_v61 = vcombine.low %v7924_v1, %v7927_v35  ;;  %v5615_v27 = vcombine.low %v7658_v3, %v7664_v42  ;;  %v5650_v49 = vcombine.low %v1893_v10, %v1896_v24  ;;  %v1916_v24 = vrot.slane %v6841_v47, 5  ;;  %v8071_v10 = vld [vmem:[%s7222_s15 + $0x214] sm:$0xf]  ;;  %v8110_v47 = vld [vmem:[%s7222_s15 + $0x220] sm:$0xf] }
  0xf1   : > { %6224 = vmatprep.mubr.msk.bf16.mxu1 %vm1365_vm3, %v5613_v48  ;;  %v1906_v48 = vrot.slane %v7772_v5, 5  ;;  %v8045_v5 = vld [vmem:[%s7222_s15 + $0x208] sm:$0xf]  ;;  %v1955_v3 = vrot.slane %v7526_v50, 5  ;;  %v9264_v50 = vcombine.low %v7985_v34, %v7992_v26  ;;  %v6856_v34 = vld [vmem:[%s7222_s15 + $0x6c] sm:$0xf] }
  0xf2   : > { %v5642_v26 = vrot.slane %v6856_v34, 9  ;;  %v8208_v1 = vld [vmem:[%s7222_s15 + $0x194] sm:$0x1] }
  0xf3   : > { %v1908_v32 = vrot.slane %v1906_v48, 4 }
  0xf5   : > { %v8063_v30 = vsel %vm7514_vm7, %v1908_v32, %v1909_v22  ;;  %v8079_v32 = vsel %vm7514_vm7, %v5636_v46, %v1913_v15  ;;  %v8083_v22 = vsel %vm7514_vm7, %v1915_v62, %v1916_v24  ;;  %v8098_v62 = vld [vmem:[%s7222_s15 + $0x21c] sm:$0xf]  ;;  %v6845_v24 = vld [vmem:[%s7222_s15 + $0x4c] sm:$0xf]  ;;  %v6847_v15 = vld [vmem:[%s7222_s15 + $0x44] sm:$0x1] }
  0xf6   : > { %v1930_v46 = vrot.slane %v6847_v15, 5 }
  0xf7   : > { %6379 = vmatmul.mubr.msk.bf16.gmra.mrb[8].mxu0 %vm1365_vm3, %v5899_v61  ;;  %v6842_v61 = vld [vmem:[%s7222_s15 + $0x40] sm:$0xf] }
  0xf8   : > { %6225 = vmatmul.mubr.msk.bf16.gmra.mrb[24].mxu1 %vm1365_vm3, %v5614_v55  ;;  %6382 = vmatprep.mubr.msk.bf16.mxu0 %vm1365_vm3, %v5900_v56  ;;  %v6840_v56 = vld [vmem:[%s7222_s15 + $0x34] sm:$0xf]  ;;  %v1927_v18 = vrot.slane %v6842_v61, 5  ;;  %v6843_v55 = vld [vmem:[%s7222_s15 + $0x30] sm:$0xf]  ;;  %v1934_v61 = vrot.slane %v6845_v24, 5 }
  0xf9   : > { %6228 = vmatprep.mubr.msk.bf16.mxu1 %vm1365_vm3, %v5615_v27  ;;  %v1920_v27 = vrot.slane %v6840_v56, 5  ;;  %v8059_v56 = vsel %vm7514_vm7, %v5635_v57, %v1906_v48  ;;  %v5637_v48 = vrot.slane %v6843_v55, 9  ;;  %v9257_v55 = vcombine.low %v7687_v17, %v7690_v19 }
  0xfa   : > { %v5652_v38 = vcombine.low %v8059_v56, %v8063_v30  ;;  %v9258_v17 = vcombine.low %v7970_v28, %v7976_v12  ;;  %v6846_v56 = vld [vmem:[%s7222_s15 + $0x3c] sm:$0xf]  ;;  %v9259_v19 = vshrl.u32 %v7843_v41, 16  ;;  %v9260_v28 = vshll.u32 %v7843_v41, 16  ;;  %v6850_v12 = vld [vmem:[%s7222_s15 + $0x58] sm:$0xf] }
  0xfb   : > { %v1922_v57 = vrot.slane %v1920_v27, 4  ;;  %v5638_v30 = vrot.slane %v6846_v56, 9  ;;  %v8116_v24 = vsel %vm7514_vm7, %v5637_v48, %v1920_v27  ;;  %v6848_v56 = vld [vmem:[%s7222_s15 + $0x48] sm:$0xf]  ;;  %v1941_v33 = vrot.slane %v6850_v12, 5 }
  0xfc   : > { %v4149_v15 = vrot.slane %v9259_v19, 4  ;;  %v4152_v23 = vrot.slane %v9260_v28, 5  ;;  %v8136_v19 = vld [vmem:[%s7222_s15 + $0x188] sm:$0x1]  ;;  %v6851_v28 = vld [vmem:[%s7222_s15 + $0x64] sm:$0xf] }
  0xfd   : > { %9262 = vst [vmem:[#allocation18_spill] sm:$0xff] %v8136_v19  ;;  %v8142_v6 = vsel %vm7514_vm7, %v5638_v30, %v1927_v18  ;;  %v6852_v12 = vld [vmem:[%s7222_s15 + $0x54] sm:$0xf]  ;;  %v4180_v41 = vshll.u32 %v7862_v54, 16  ;;  %v6853_v30 = vld [vmem:[%s7222_s15 + $0x5c] sm:$0x1] }
  0xfe   : > { %v5640_v48 = vrot.slane %v6852_v12, 9  ;;  %v4166_v53 = vshll.u32 %v8136_v19, 16 }
  0xff   : > { %6383 = vmatmul.mubr.msk.bf16.gmra.mrb[12].mxu0 %vm1365_vm3, %v5901_v14  ;;  %v5639_v14 = vrot.slane %v6848_v56, 9 }
 0x100   : > { %6229 = vmatmul.mubr.msk.bf16.gmra.mrb[28].mxu1 %vm1365_vm3, %v9257_v55  ;;  %6386 = vmatprep.mubr.msk.bf16.mxu0 %vm1365_vm3, %v9258_v17  ;;  %v1929_v55 = vrot.slane %v1927_v18, 4  ;;  %v8120_v17 = vsel %vm7514_vm7, %v1922_v57, %v1923_v11  ;;  %v1936_v11 = vrot.slane %v1934_v61, 4  ;;  %v6849_v57 = vld [vmem:[%s7222_s15 + $0x50] sm:$0x1]  ;;  %v8157_v18 = vld [vmem:[%s7222_s15 + $0x228] sm:$0xf] }
 0x101   : > { %6234 = vmatprep.mubr.msk.bf16.mxu1 %vm1365_vm3, %v5650_v49  ;;  %v9261_v49 = vshrl.u32 %v7846_v51, 16  ;;  %v1937_v56 = vrot.slane %v6849_v57, 5  ;;  %v8151_v57 = vsel %vm7514_vm7, %v5639_v14, %v1934_v61  ;;  %v9263_v61 = vcombine.low %v8014_v36, %v8020_v44 }
 0x102   : > { %v8146_v51 = vsel %vm7514_vm7, %v1929_v55, %v1930_v46  ;;  %v1944_v46 = vrot.slane %v6853_v30, 5  ;;  %v4153_v55 = vor.u32 %v4152_v23, %v4149_v15  ;;  %v8175_v23 = vld [vmem:[%s7222_s15 + $0x22c] sm:$0xf]  ;;  %v1943_v15 = vrot.slane %v1941_v33, 4  ;;  %v8184_v30 = vld [vmem:[%s7222_s15 + $0x234] sm:$0xf] }
 0x103   : > { %v4162_v27 = vrot.slane %v9261_v49, 4  ;;  %v1948_v49 = vrot.slane %v6851_v28, 5  ;;  %v8172_v14 = vsel %vm7514_vm7, %v1936_v11, %v1937_v56  ;;  %v9266_v36 = vshll.u32 %v7859_v13, 16  ;;  %v6855_v56 = vld [vmem:[%s7222_s15 + $0x68] sm:$0x1] }
 0x104   : > { %v1951_v19 = vrot.slane %v6855_v56, 5  ;;  %v6857_v56 = vld [vmem:[%s9207_s1 + $0x8] sm:$0x3]  ;;  %v5908_v34 = vcombine.low %v8157_v18, %v8175_v23 }
 0x105   : > { %v4163_v28 = vor.u32 %v4162_v27, %v8127_v9  ;;  %v9265_v27 = vshrl.u32 %v7859_v13, 16  ;;  %v4176_v44 = vrot.slane %v9266_v36, 5  ;;  %v1950_v11 = vrot.slane %v1948_v49, 4  ;;  %v8194_v13 = vld [vmem:[%s7222_s15 + $0x238] sm:$0xf] }
 0x106   : > { %v8197_v36 = vrot.slane %v4180_v41, 5  ;;  %v8218_v41 = vsel %vm7514_vm7, %v1943_v15, %v1944_v46  ;;  %v6858_v15 = vld [vmem:[%s7222_s15 + $0x7c] sm:$0xf] }
 0x107   : > { %6387 = vmatmul.mubr.msk.bf16.gmra.mrb[16].mxu0 %vm1365_vm3, %v9264_v50  ;;  %v4173_v12 = vrot.slane %v9265_v27, 4  ;;  %v9267_v27 = vcombine.low %v8029_v7, %v8032_v0  ;;  %v4164_v7 = vrot.slane %v4163_v28, 4  ;;  %v4168_v0 = vrot.slane %v4166_v53, 5  ;;  %v6862_v53 = vld [vmem:[%s7222_s15 + $0x8c] sm:$0x1] }
 0x108   : > { %6235 = vmatmul.mubr.msk.bf16.vlgmr.msra.gmra.mrb[0].mxu1 %vm1365_vm3, %v9263_v61  ;;  %v6854_v61 = vld [vmem:[%s7222_s15 + $0x60] sm:$0xf] }
 0x109   : > { %6267 = vmatpush3.bf16.msra.mxu1 %v8024_v59  ;;  %6238 = vmatprep.mubr.msk.bf16.mxu1 %vm1365_vm3, %v5652_v38  ;;  %v5641_v50 = vrot.slane %v6854_v61, 9  ;;  %v1957_v59 = vrot.slane %v1955_v3, 4  ;;  %v1958_v38 = vrot.slane %v7530_v21, 5  ;;  %v9268_v61 = vshrl.u32 %v7862_v54, 16 }
 0x10a   : > { %6390 = vmatprep.mubr.msk.bf16.mxu0 %vm1365_vm3, %v9267_v27  ;;  %6733 = vmatprep.subr.msk.bf16.mxu1 %vm1414_vm0, %v6857_v56  ;;  %v4154_v27 = vrot.slane %v4153_v55, 4  ;;  %v5655_v21 = vcombine.low %v8142_v6, %v8146_v51  ;;  %v8214_v54 = vsel %vm7514_vm7, %v5640_v48, %v1941_v33  ;;  %v5656_v55 = vcombine.low %v8151_v57, %v8172_v14  ;;  %v6859_v56 = vld [vmem:[%s7222_s15 + $0x78] sm:$0xf] }
 0x10b   : > { %v4186_v42 = vrot.slane %v9268_v61, 4  ;;  %v4177_v61 = vor.u32 %v4176_v44, %v4173_v12  ;;  %v8226_v28 = vsel %vm7514_vm7, %v5641_v50, %v1948_v49  ;;  %v8230_v33 = vsel %vm7514_vm7, %v1950_v11, %v1951_v19 }
 0x10c   : > { %v8234_v48 = vsel %vm7514_vm7, %v5642_v26, %v1955_v3  ;;  %v8238_v6 = vsel %vm7514_vm7, %v1957_v59, %v1958_v38  ;;  %v4190_v57 = vshll.u32 %v8208_v1, 16  ;;  %v5657_v49 = vcombine.low %v8214_v54, %v8218_v41 }
 0x10d   : > { %v4187_v51 = vor.u32 %v4186_v42, %v8197_v36  ;;  %v4159_v19 = vsel %vm7245_vm4, %v4154_v27, %v8127_v9  ;;  %v4169_v46 = vsel %vm7245_vm4, %v4164_v7, %v4168_v0  ;;  %v4204_v3 = vshll.u32 %v7868_v16, 16 }
 0x10e   : > { %v9269_v26 = vcombine.low %v8079_v32, %v8083_v22  ;;  %v9270_v42 = vcombine.low %v8040_v37, %v8045_v5  ;;  %v4178_v14 = vrot.slane %v4177_v61, 4  ;;  %v1962_v9 = vrot.slane %v6858_v15, 5  ;;  %v6860_v61 = vld [vmem:[%s7222_s15 + $0x80] sm:$0x1] }
 0x10f   : > { %v9271_v12 = vshrl.u32 %v7865_v43, 16  ;;  %v9272_v0 = vshll.u32 %v7865_v43, 16  ;;  %v9273_v32 = vcombine.low %v8116_v24, %v8120_v17  ;;  %v9274_v22 = vcombine.low %v8068_v25, %v8071_v10 }
 0x110   : > { %6239 = vmatmul.mubr.msk.bf16.gmra.mrb[4].mxu1 %vm1365_vm3, %v9269_v26  ;;  %6391 = vmatmul.mubr.msk.bf16.gmra.mrb[20].mxu0 %vm1365_vm3, %v9270_v42  ;;  %v8277_v43 = vsel %vm1414_vm0, %v7883_v2, 0  ;;  %v4228_v59 = vshll.u32 %v7892_v63, 16  ;;  %v8280_v24 = vcombine.low %v4159_v19, %v4169_v46  ;;  %v4188_v17 = vrot.slane %v4187_v51, 4  ;;  %v8285_v42 = vld [vmem:[%s7222_s15 + $0x1a0] sm:$0x1] }
 0x111   : > { %v4197_v7 = vrot.slane %v9271_v12, 4  ;;  %v4200_v44 = vrot.slane %v9272_v0, 5  ;;  %6242 = vmatprep.mubr.msk.bf16.mxu1 %vm1365_vm3, %v9273_v32  ;;  %6394 = vmatprep.mubr.msk.bf16.mxu0 %vm1365_vm3, %v9274_v22  ;;  %v4192_v38 = vrot.slane %v4190_v57, 5  ;;  %v5643_v27 = vrot.slane %v6859_v56, 9  ;;  %v8297_v32 = vld [vmem:[%s7222_s15 + $0x1ac] sm:$0x1] }
 0x112   : > { %v1965_v26 = vrot.slane %v6860_v61, 5  ;;  %v8287_v15 = vrot.slane %v4204_v3, 5  ;;  %v9275_v12 = vshrl.u32 %v7868_v16, 16  ;;  %v1969_v2 = vrot.slane %v7579_v40, 5 }
 0x113   : > { %v4183_v19 = vsel %vm7245_vm4, %v4178_v14, %v8197_v36  ;;  %v1964_v51 = vrot.slane %v1962_v9, 4  ;;  %v4201_v57 = vor.u32 %v4200_v44, %v4197_v7  ;;  %v4252_v46 = vshll.u32 %v7899_v45, 16 }
 0x114   : > { %v4210_v0 = vrot.slane %v9275_v12, 4  ;;  %v9276_v3 = vshrl.u32 %v7889_v58, 16  ;;  %v9277_v16 = vshll.u32 %v7889_v58, 16  ;;  %v8303_v61 = vrot.slane %v4228_v59, 5  ;;  %v6861_v58 = vld [vmem:[%s7222_s15 + $0x84] sm:$0xf] }
 0x115   : > { %v9278_v40 = vshrl.u32 %v7892_v63, 16  ;;  %v4193_v36 = vsel %vm7245_vm4, %v4188_v17, %v4192_v38  ;;  %v4214_v14 = vshll.u32 %v8285_v42, 16  ;;  %v9279_v7 = vshrl.u32 %v7896_v52, 16 }
 0x116   : > { %v4221_v22 = vrot.slane %v9276_v3, 4  ;;  %v4224_v56 = vrot.slane %v9277_v16, 5  ;;  %v9280_v11 = vshll.u32 %v7896_v52, 16  ;;  %v4211_v3 = vor.u32 %v4210_v0, %v8287_v15 }
 0x117   : > { %v4234_v12 = vrot.slane %v9278_v40, 4  ;;  %v4245_v44 = vrot.slane %v9279_v7, 4  ;;  %v5644_v16 = vrot.slane %v6861_v58, 9  ;;  %v1971_v59 = vrot.slane %v1969_v2, 4 }
 0x118   : > { %v4248_v50 = vrot.slane %v9280_v11, 5  ;;  %v1972_v63 = vrot.slane %v6862_v53, 5  ;;  %6243 = vmatmul.mubr.msk.bf16.gmra.mrb[8].mxu1 %vm1365_vm3, %v5655_v21  ;;  %v9281_v17 = vcombine.low %v8098_v62, %v8110_v47  ;;  %v8324_v38 = vsel %vm7514_vm7, %v5643_v27, %v1962_v9 }
 0x119   : > { %v4238_v52 = vshll.u32 %v8297_v32, 16  ;;  %v8327_v11 = vrot.slane %v4252_v46, 5  ;;  %v9282_v0 = vshrl.u32 %v7899_v45, 16  ;;  %6246 = vmatprep.mubr.msk.bf16.mxu1 %vm1365_vm3, %v5656_v55  ;;  %v8338_v21 = vsel %vm7514_vm7, %v1964_v51, %v1965_v26  ;;  %v8343_v46 = vld [vmem:[%s7222_s15 + $0x1b8] sm:$0x1] }
 0x11a   : > { %6395 = vmatmul.mubr.msk.bf16.gmra.mrb[24].mxu0 %vm1365_vm3, %v9281_v17  ;;  %v4225_v53 = vor.u32 %v4224_v56, %v4221_v22  ;;  %v4235_v9 = vor.u32 %v4234_v12, %v8303_v61  ;;  %v1976_v27 = vrot.slane %v7613_v4, 5  ;;  %v8345_v45 = vcombine.low %v4183_v19, %v4193_v36  ;;  %v6863_v22 = vld [vmem:[%s7222_s15 + $0x90] sm:$0xf] }
 0x11b   : > { %v4258_v40 = vrot.slane %v9282_v0, 4  ;;  %6398 = vmatprep.mubr.msk.bf16.mxu0 %vm1365_vm3, %v5908_v34  ;;  %v4202_v55 = vrot.slane %v4201_v57, 4  ;;  %v4216_v7 = vrot.slane %v4214_v14, 5  ;;  %v4249_v58 = vor.u32 %v4248_v50, %v4245_v44  ;;  %v6864_v14 = vld [vmem:[%s7222_s15 + $0x98] sm:$0x1] }
 0x11c   : > { %v4212_v17 = vrot.slane %v4211_v3, 4  ;;  %v8349_v34 = vsel %vm7514_vm7, %v5644_v16, %v1969_v2  ;;  %v8353_v26 = vsel %vm7514_vm7, %v1971_v59, %v1972_v63  ;;  %v1983_v51 = vrot.slane %v7636_v29, 5 }
 0x11d   : > { %v4240_v4 = vrot.slane %v4238_v52, 5  ;;  %v5645_v56 = vrot.slane %v6863_v22, 9  ;;  %v4259_v19 = vor.u32 %v4258_v40, %v8327_v11  ;;  %v4262_v57 = vshll.u32 %v8343_v46, 16  ;;  %v9289_v22 = vld [vmem:[#allocation5_spill] sm:$0xff] }
 0x11e   : > { %v4226_v12 = vrot.slane %v4225_v53, 4  ;;  %v4236_v50 = vrot.slane %v4235_v9, 4  ;;  %v1978_v36 = vrot.slane %v1976_v27, 4  ;;  %v1979_v2 = vrot.slane %v6864_v14, 5 }
 0x11f   : > { %v5660_v44 = vcombine.low %v8324_v38, %v8338_v21  ;;  %v4207_v29 = vsel %vm7245_vm4, %v4202_v55, %v8287_v15  ;;  %v4250_v3 = vrot.slane %v4249_v58, 4  ;;  %v5646_v16 = vrot.slane %v7633_v8, 9  ;;  %v8384_v21 = vld [vmem:[%s7222_s15 + $0x1c4] sm:$0x1] }
 0x120   : > { %v4217_v59 = vsel %vm7245_vm4, %v4212_v17, %v4216_v7  ;;  %v5661_v63 = vcombine.low %v8349_v34, %v8353_v26  ;;  %v1985_v52 = vrot.slane %v1983_v51, 4  ;;  %v1986_v0 = vrot.slane %v7644_v60, 5  ;;  %6247 = vmatmul.mubr.msk.bf16.gmra.mrb[12].mxu1 %vm1365_vm3, %v5657_v49 }
 0x121   : > { %v9283_v15 = vcombine.low %v8184_v30, %v8194_v13  ;;  %v8381_v8 = vsel %vm7514_vm7, %v5645_v56, %v1976_v27  ;;  %v4260_v38 = vrot.slane %v4259_v19, 4  ;;  %v4264_v40 = vrot.slane %v4262_v57, 5  ;;  %v9290_v57 = vld [vmem:[#allocation9_spill] sm:$0xff] }
 0x122   : > { %v4276_v60 = vshll.u32 %v7927_v35, 16  ;;  %v9284_v54 = vcombine.low %v8226_v28, %v8230_v33  ;;  %v4231_v41 = vsel %vm7245_vm4, %v4226_v12, %v8303_v61  ;;  %v4241_v49 = vsel %vm7245_vm4, %v4236_v50, %v4240_v4 }
 0x123   : > { %6399 = vmatmul.mubr.msk.bf16.gmra.mrb[28].mxu0 %vm1365_vm3, %v9283_v15  ;;  %v8400_v53 = vsel %vm7514_vm7, %v1978_v36, %v1979_v2  ;;  %v4300_v9 = vshll.u32 %v7940_v31, 16  ;;  %v4255_v28 = vsel %vm7245_vm4, %v4250_v3, %v8327_v11  ;;  %v8408_v33 = vsel %vm7514_vm7, %v5646_v16, %v1983_v51 }
 0x124   : > { %6250 = vmatprep.mubr.msk.bf16.mxu1 %vm1365_vm3, %v9284_v54  ;;  %6404 = vmatprep.mubr.msk.bf16.mxu0 %vm1365_vm3, %v8280_v24  ;;  %v9285_v24 = vld [vmem:[#allocation8_spill] sm:$0xff]  ;;  %v8416_v58 = vsel %vm7514_vm7, %v1985_v52, %v1986_v0  ;;  %v9288_v17 = vshrl.u32 %v7927_v35, 16  ;;  %v4286_v11 = vshll.u32 %v8384_v21, 16  ;;  %v1990_v56 = vrot.slane %v9289_v22, 5  ;;  %v9295_v54 = vld [vmem:[#allocation11_spill] sm:$0xff] }
 0x125   : > { %v9286_v27 = vshrl.u32 %v9285_v24, 16  ;;  %v9287_v55 = vshll.u32 %v9285_v24, 16  ;;  %v4265_v51 = vsel %vm7245_vm4, %v4260_v38, %v4264_v40  ;;  %v8424_v19 = vrot.slane %v4276_v60, 5  ;;  %v9294_v38 = vld [vmem:[#allocation4_spill] sm:$0xff]  ;;  %v8438_v60 = vld [vmem:[%s7222_s15 + $0x1d0] sm:$0x1] }
 0x126   : > { %v4282_v4 = vrot.slane %v9288_v17, 4  ;;  %v9291_v12 = vshrl.u32 %v9290_v57, 16  ;;  %v9292_v36 = vshll.u32 %v9290_v57, 16  ;;  %v5929_v2 = vcombine.low %v4207_v29, %v4217_v59 }
 0x127   : > { %v4269_v61 = vrot.slane %v9286_v27, 4  ;;  %v4272_v7 = vrot.slane %v9287_v55, 5  ;;  %v5662_v35 = vcombine.low %v8381_v8, %v8400_v53  ;;  %v8432_v3 = vrot.slane %v4300_v9, 5  ;;  %v9296_v8 = vld [vmem:[#allocation13_spill] sm:$0xff]  ;;  %v9298_v9 = vld [vmem:[#allocation6_spill] sm:$0xff] }
 0x128   : > { %v4293_v50 = vrot.slane %v9291_v12, 4  ;;  %v4296_v14 = vrot.slane %v9292_v36, 5  ;;  %v9293_v16 = vshrl.u32 %v7940_v31, 16  ;;  %v5930_v0 = vcombine.low %v4231_v41, %v4241_v49  ;;  %v8475_v12 = vld [vmem:[%s7222_s15 + $0x1e8] sm:$0x1] }
 0x129   : > { %v4273_v15 = vor.u32 %v4272_v7, %v4269_v61  ;;  %v5647_v40 = vrot.slane %v9294_v38, 9  ;;  %v4324_v24 = vshll.u32 %v9295_v54, 16  ;;  %v5931_v27 = vcombine.low %v4255_v28, %v4265_v51 }
 0x12a   : > { %v4306_v52 = vrot.slane %v9293_v16, 4  ;;  %v5663_v29 = vcombine.low %v8408_v33, %v8416_v58  ;;  %v8443_v59 = vrot.slane %v4286_v11, 5  ;;  %v4348_v53 = vshll.u32 %v9296_v8, 16 }
 0x12b   : > { %v9297_v31 = vcombine.low %v8234_v48, %v8238_v6  ;;  %6405 = vmatmul.mubr.msk.bf16.vlgmr.msra.gmra.mrb[0].mxu0 %vm1365_vm3, %v8345_v45  ;;  %v4283_v41 = vor.u32 %v4282_v4, %v8424_v19  ;;  %v1992_v49 = vrot.slane %v1990_v56, 4  ;;  %v1993_v28 = vrot.slane %v9298_v9, 5  ;;  %v9299_v6 = vld [vmem:[#allocation10_spill] sm:$0xff] }
 0x12c   : > { %v4297_v61 = vor.u32 %v4296_v14, %v4293_v50  ;;  %6437 = vmatpush3.bf16.msra.mxu0 %v8277_v43  ;;  %v4307_v55 = vor.u32 %v4306_v52, %v8432_v3  ;;  %v4310_v48 = vshll.u32 %v8438_v60, 16  ;;  %v9300_v7 = vshrl.u32 %v9299_v6, 16  ;;  %6408 = vmatprep.mubr.msk.bf16.mxu0 %vm1365_vm3, %v5929_v2  ;;  %v8468_v43 = vld [vmem:[%s7222_s15 + $0x1dc] sm:$0x1]  ;;  %v9303_v50 = vld [vmem:[#allocation12_spill] sm:$0xff] }
 0x12d   : > { %6251 = vmatmul.mubr.msk.bf16.gmra.mrb[16].mxu1 %vm1365_vm3, %v9297_v31  ;;  %v9301_v45 = vshll.u32 %v9299_v6, 16  ;;  %v4274_v4 = vrot.slane %v4273_v15, 4  ;;  %v8465_v22 = vsel %vm7514_vm7, %v5647_v40, %v1990_v56  ;;  %v9302_v51 = vshrl.u32 %v9295_v54, 16 }
 0x12e   : > { %6254 = vmatprep.mubr.msk.bf16.mxu1 %vm1365_vm3, %v5660_v44  ;;  %v4317_v17 = vrot.slane %v9300_v7, 4  ;;  %v8470_v44 = vrot.slane %v4324_v24, 5  ;;  %v9304_v36 = vshrl.u32 %v9303_v50, 16  ;;  %v9305_v2 = vshll.u32 %v9303_v50, 16  ;;  %v9307_v24 = vld [vmem:[#allocation7_spill] sm:$0xff] }
 0x12f   : > { %v4320_v11 = vrot.slane %v9301_v45, 5  ;;  %v4330_v57 = vrot.slane %v9302_v51, 4  ;;  %v8481_v52 = vrot.slane %v4348_v53, 5  ;;  %v9306_v56 = vshrl.u32 %v9296_v8, 16  ;;  %v6865_v8 = vld [vmem:[%s7222_s15 + $0xb4] sm:$0xf] }
 0x130   : > { %v4341_v14 = vrot.slane %v9304_v36, 4  ;;  %v4344_v16 = vrot.slane %v9305_v2, 5  ;;  %v4284_v38 = vrot.slane %v4283_v41, 4  ;;  %v8487_v40 = vsel %vm7514_vm7, %v1992_v49, %v1993_v28 }
 0x131   : > { %v4354_v15 = vrot.slane %v9306_v56, 4  ;;  %v4298_v54 = vrot.slane %v4297_v61, 4  ;;  %v1997_v31 = vrot.slane %v9307_v24, 5  ;;  %v4308_v9 = vrot.slane %v4307_v55, 4 }
 0x132   : > { %v4312_v6 = vrot.slane %v4310_v48, 5  ;;  %v4321_v7 = vor.u32 %v4320_v11, %v4317_v17  ;;  %v4334_v45 = vshll.u32 %v8468_v43, 16  ;;  %v4279_v53 = vsel %vm7245_vm4, %v4274_v4, %v8424_v19  ;;  %v9308_v48 = vld [vmem:[#allocation15_spill] sm:$0xff] }
 0x133   : > { %v5648_v51 = vrot.slane %v6865_v8, 9  ;;  %v4331_v41 = vor.u32 %v4330_v57, %v8470_v44  ;;  %v4358_v49 = vshll.u32 %v8475_v12, 16  ;;  %v5664_v28 = vcombine.low %v8465_v22, %v8487_v40  ;;  %6409 = vmatmul.mubr.msk.bf16.gmra.mrb[4].mxu0 %vm1365_vm3, %v5930_v0  ;;  %v6866_v22 = vld [vmem:[%s7222_s15 + $0xbc] sm:$0x1]  ;;  %v9309_v0 = vld [vmem:[#allocation17_spill] sm:$0xff]  ;;  %v9314_v8 = vld [vmem:[#allocation16_spill] sm:$0xff] }
 0x134   : > { %v4345_v61 = vor.u32 %v4344_v16, %v4341_v14  ;;  %v4355_v55 = vor.u32 %v4354_v15, %v8481_v52  ;;  %v4372_v17 = vshll.u32 %v9308_v48, 16  ;;  %v4289_v19 = vsel %vm7245_vm4, %v4284_v38, %v8443_v59  ;;  %6412 = vmatprep.mubr.msk.bf16.mxu0 %vm1365_vm3, %v5931_v27  ;;  %v9310_v14 = vld [vmem:[#allocation14_spill] sm:$0xff]  ;;  %v8523_v38 = vld [vmem:[%s7222_s15 + $0x1f4] sm:$0x1] }
 0x135   : > { %6255 = vmatmul.mubr.msk.bf16.gmra.mrb[20].mxu1 %vm1365_vm3, %v5661_v63  ;;  %v4303_v11 = vsel %vm7245_vm4, %v4298_v54, %v8432_v3  ;;  %v1999_v4 = vrot.slane %v1997_v31, 4  ;;  %v2000_v57 = vrot.slane %v6866_v22, 5  ;;  %v4313_v34 = vsel %vm7245_vm4, %v4308_v9, %v4312_v6 }
 0x136   : > { %6258 = vmatprep.mubr.msk.bf16.mxu1 %vm1365_vm3, %v5662_v35  ;;  %v4322_v26 = vrot.slane %v4321_v7, 4  ;;  %v4336_v63 = vrot.slane %v4334_v45, 5  ;;  %v4396_v59 = vshll.u32 %v9309_v0, 16  ;;  %v4332_v50 = vrot.slane %v4331_v41, 4  ;;  %v8534_v45 = vld [vmem:[%s7222_s15 + $0x200] sm:$0x1] }
 0x137   : > { %v4360_v36 = vrot.slane %v4358_v49, 5  ;;  %v9311_v3 = vshrl.u32 %v9310_v14, 16  ;;  %v9312_v16 = vshll.u32 %v9310_v14, 16  ;;  %v4346_v15 = vrot.slane %v4345_v61, 4 }
 0x138   : > { %v4356_v35 = vrot.slane %v4355_v55, 4  ;;  %v8525_v27 = vrot.slane %v4372_v17, 5  ;;  %v9313_v40 = vshrl.u32 %v9308_v48, 16  ;;  %v5932_v24 = vcombine.low %v4279_v53, %v4289_v19 }
 0x139   : > { %v4365_v2 = vrot.slane %v9311_v3, 4  ;;  %v4368_v56 = vrot.slane %v9312_v16, 5  ;;  %v5933_v9 = vcombine.low %v4303_v11, %v4313_v34  ;;  %v1998_v6 = vsel %vm7514_vm7, %v5648_v51, %v1997_v31 }
 0x13a   : > { %v4378_v54 = vrot.slane %v9313_v40, 4  ;;  %v2001_v7 = vsel %vm7514_vm7, %v1999_v4, %v2000_v57  ;;  %v9315_v41 = vshrl.u32 %v9314_v8, 16  ;;  %v9316_v61 = vshll.u32 %v9314_v8, 16 }
 0x13b   : > { %v8540_v48 = vrot.slane %v4396_v59, 5  ;;  %v9317_v53 = vshrl.u32 %v9309_v0, 16  ;;  %v4327_v31 = vsel %vm7245_vm4, %v4322_v26, %v8470_v44  ;;  %v4337_v51 = vsel %vm7245_vm4, %v4332_v50, %v4336_v63  ;;  %6413 = vmatmul.mubr.msk.bf16.gmra.mrb[8].mxu0 %vm1365_vm3, %v5932_v24  ;;  %v6867_v26 = vld [vmem:[%s7222_s15 + $0xc0] sm:$0xf] }
 0x13c   : > { %v4389_v49 = vrot.slane %v9315_v41, 4  ;;  %v4392_v55 = vrot.slane %v9316_v61, 5  ;;  %v4369_v19 = vor.u32 %v4368_v56, %v4365_v2  ;;  %v4382_v11 = vshll.u32 %v8523_v38, 16  ;;  %6416 = vmatprep.mubr.msk.bf16.mxu0 %vm1365_vm3, %v5933_v9  ;;  %v8585_v61 = vld [vmem:[%s7222_s15 + $0x218] sm:$0x1] }
 0x13d   : > { %v4402_v17 = vrot.slane %v9317_v53, 4  ;;  %v4351_v4 = vsel %vm7245_vm4, %v4346_v15, %v8481_v52  ;;  %v4361_v22 = vsel %vm7245_vm4, %v4356_v35, %v4360_v36  ;;  %v4379_v57 = vor.u32 %v4378_v54, %v8525_v27  ;;  %6259 = vmatmul.mubr.msk.bf16.gmra.mrb[24].mxu1 %vm1365_vm3, %v5663_v29  ;;  %v6868_v52 = vld [vmem:[%s7222_s15 + $0xc4] sm:$0xf]  ;;  %v8576_v54 = vld [vmem:[%s7222_s15 + $0x20c] sm:$0x1] }
 0x13e   : > { %v4406_v34 = vshll.u32 %v8534_v45, 16  ;;  %v4438_v0 = vshll.u32 %v8068_v25, 16  ;;  %v4448_v44 = vshrl.u32 %v8071_v10, 16  ;;  %v5731_v63 = vcombine.low %v6867_v26, %v6868_v52  ;;  %6262 = vmatprep.mubr.msk.bf16.mxu1 %vm1365_vm3, %v5664_v28  ;;  %v6869_v26 = vld [vmem:[%s7222_s15 + $0xcc] sm:$0xf] }
 0x13f   : > { %v4420_v59 = vshll.u32 %v8045_v5, 16  ;;  %v5665_v50 = vcombine.low %v1998_v6, %v2001_v7  ;;  %v4393_v36 = vor.u32 %v4392_v55, %v4389_v49  ;;  %v4403_v14 = vor.u32 %v4402_v17, %v8540_v48  ;;  %v6870_v52 = vld [vmem:[%s7222_s15 + $0xd0] sm:$0xf] }
 0x140   : > { %v4444_v33 = vshll.u32 %v8071_v10, 16  ;;  %v5934_v58 = vcombine.low %v4327_v31, %v4337_v51  ;;  %v5935_v29 = vcombine.low %v4351_v4, %v4361_v22  ;;  %v4370_v3 = vrot.slane %v4369_v19, 4 }
 0x141   : > { %v4384_v2 = vrot.slane %v4382_v11, 5  ;;  %v4380_v16 = vrot.slane %v4379_v57, 4  ;;  %v4408_v56 = vrot.slane %v4406_v34, 5  ;;  %v9318_v15 = vshrl.u32 %v8040_v37, 16 }
 0x142   : > { %v9319_v28 = vshll.u32 %v8040_v37, 16  ;;  %v8578_v24 = vrot.slane %v4420_v59, 5  ;;  %v9320_v9 = vshrl.u32 %v8045_v5, 16  ;;  %v9321_v6 = vshrl.u32 %v8068_v25, 16 }
 0x143   : > { %v4413_v35 = vrot.slane %v9318_v15, 4  ;;  %v4440_v8 = vrot.slane %v4438_v0, 5  ;;  %v4394_v41 = vrot.slane %v4393_v36, 4  ;;  %v4404_v49 = vrot.slane %v4403_v14, 4  ;;  %6417 = vmatmul.mubr.msk.bf16.gmra.mrb[12].mxu0 %vm1365_vm3, %v5934_v58 }
 0x144   : > { %v4416_v40 = vrot.slane %v9319_v28, 5  ;;  %v4426_v10 = vrot.slane %v9320_v9, 4  ;;  %v4437_v7 = vrot.slane %v9321_v6, 4  ;;  %v8587_v55 = vrot.slane %v4444_v33, 5  ;;  %6420 = vmatprep.mubr.msk.bf16.mxu0 %vm1365_vm3, %v5935_v29 }
 0x145   : > { %v4450_v53 = vrot.slane %v4448_v44, 4  ;;  %v4459_v37 = vshrl.u32 %v8098_v62, 16  ;;  %v4462_v17 = vshll.u32 %v8098_v62, 16  ;;  %v4472_v31 = vshrl.u32 %v8110_v47, 16  ;;  %6263 = vmatmul.mubr.msk.bf16.gmra.mrb[28].mxu1 %vm1365_vm3, %v5665_v50  ;;  %v6871_v50 = vld [vmem:[%s7222_s15 + $0xd8] sm:$0xf] }
 0x146   : > { %v4483_v5 = vshrl.u32 %v8157_v18, 16  ;;  %v4486_v51 = vshll.u32 %v8157_v18, 16  ;;  %v4375_v25 = vsel %vm7245_vm4, %v4370_v3, %v8525_v27  ;;  %v4417_v19 = vor.u32 %v4416_v40, %v4413_v35  ;;  %6268 = vmatprep.mubr.msk.bf16.mxu1 %vm1365_vm3, %v5731_v63  ;;  %v6872_v63 = vld [vmem:[%s7222_s15 + $0xdc] sm:$0xf]  ;;  %v8622_v40 = vld [vmem:[%s7222_s15 + $0x224] sm:$0x1] }
 0x147   : > { %v4430_v11 = vshll.u32 %v8576_v54, 16  ;;  %v4385_v62 = vsel %vm7245_vm4, %v4380_v16, %v4384_v2  ;;  %v4427_v18 = vor.u32 %v4426_v10, %v8578_v24  ;;  %v4441_v4 = vor.u32 %v4440_v8, %v4437_v7 }
 0x148   : > { %v4454_v22 = vshll.u32 %v8585_v61, 16  ;;  %v4399_v27 = vsel %vm7245_vm4, %v4394_v41, %v8540_v48  ;;  %v4409_v57 = vsel %vm7245_vm4, %v4404_v49, %v4408_v56  ;;  %v4451_v34 = vor.u32 %v4450_v53, %v8587_v55  ;;  %v8629_v41 = vld [vmem:[%s7222_s15 + $0x230] sm:$0x1] }
 0x149   : > { %v4468_v0 = vshll.u32 %v8110_v47, 16  ;;  %v4496_v44 = vshrl.u32 %v8175_v23, 16  ;;  %v5732_v59 = vcombine.low %v6869_v26, %v6870_v52  ;;  %v5733_v36 = vcombine.low %v6871_v50, %v6872_v63 }
 0x14a   : > { %v4492_v14 = vshll.u32 %v8175_v23, 16  ;;  %v5936_v33 = vcombine.low %v4375_v25, %v4385_v62  ;;  %v4418_v48 = vrot.slane %v4417_v19, 4  ;;  %v4432_v58 = vrot.slane %v4430_v11, 5  ;;  %v6873_v62 = vld [vmem:[%s7222_s15 + $0xe4] sm:$0xf] }
 0x14b   : > { %v4461_v29 = vrot.slane %v4459_v37, 4  ;;  %v5937_v3 = vcombine.low %v4399_v27, %v4409_v57  ;;  %v4428_v2 = vrot.slane %v4427_v18, 4  ;;  %v4442_v16 = vrot.slane %v4441_v4, 4  ;;  %v6874_v18 = vld [vmem:[%s7222_s15 + $0xe8] sm:$0xf] }
 0x14c   : > { %v4456_v47 = vrot.slane %v4454_v22, 5  ;;  %v4452_v56 = vrot.slane %v4451_v34, 4  ;;  %v4464_v15 = vrot.slane %v4462_v17, 5  ;;  %v8619_v35 = vrot.slane %v4468_v0, 5  ;;  %6421 = vmatmul.mubr.msk.bf16.gmra.mrb[16].mxu0 %vm1365_vm3, %v5936_v33  ;;  %v6875_v57 = vld [vmem:[%s7222_s15 + $0xf0] sm:$0xf] }
 0x14d   : > { %v4474_v28 = vrot.slane %v4472_v31, 4  ;;  %v4485_v9 = vrot.slane %v4483_v5, 4  ;;  %v4488_v10 = vrot.slane %v4486_v51, 5  ;;  %v8624_v6 = vrot.slane %v4492_v14, 5  ;;  %6269 = vmatmul.mubr.msk.bf16.vlgmr.msra.gmra.mrb[0].mxu1 %vm1365_vm3, %v5732_v59  ;;  %6424 = vmatprep.mubr.msk.bf16.mxu0 %vm1365_vm3, %v5937_v3  ;;  %v6876_v34 = vld [vmem:[%s7222_s15 + $0xf4] sm:$0xf] }
 0x14e   : > { %v4498_v23 = vrot.slane %v4496_v44, 4  ;;  %v4507_v7 = vshrl.u32 %v8184_v30, 16  ;;  %v4510_v8 = vshll.u32 %v8184_v30, 16  ;;  %v4520_v49 = vshrl.u32 %v8194_v13, 16  ;;  %v9322_v30 = vld [vmem:[#allocation3_spill] sm:$0xff]  ;;  %6272 = vmatprep.mubr.msk.bf16.mxu1 %vm1365_vm3, %v5733_v36 }
 0x14f   : > { %v4423_v53 = vsel %vm7245_vm4, %v4418_v48, %v8578_v24  ;;  %v4433_v37 = vsel %vm7245_vm4, %v4428_v2, %v4432_v58  ;;  %v4516_v17 = vshll.u32 %v8194_v13, 16  ;;  %6471 = vmatpush3.bf16.msra.mxu1 %v9322_v30  ;;  %v4447_v31 = vsel %vm7245_vm4, %v4442_v16, %v8587_v55  ;;  %v8659_v36 = vld [vmem:[%s7222_s15 + $0x23c] sm:$0x1]  ;;  %v8662_v58 = vld [vmem:[%s7222_s15 + $0x12c] sm:$0xf] }
 0x150   : > { %v4465_v5 = vor.u32 %v4464_v15, %v4461_v29  ;;  %v4475_v51 = vor.u32 %v4474_v28, %v8619_v35  ;;  %v4478_v24 = vshll.u32 %v8622_v40, 16  ;;  %v4457_v13 = vsel %vm7245_vm4, %v4452_v56, %v4456_v47 }
 0x151   : > { %v4489_v25 = vor.u32 %v4488_v10, %v4485_v9  ;;  %v4499_v19 = vor.u32 %v4498_v23, %v8624_v6  ;;  %v4502_v11 = vshll.u32 %v8629_v41, 16  ;;  %v5734_v55 = vcombine.low %v6873_v62, %v6874_v18  ;;  %v6878_v10 = vld [vmem:[%s7222_s15 + $0x184] sm:$0xf] }
 0x152   : > { %v4509_v4 = vrot.slane %v4507_v7, 4  ;;  %v4512_v22 = vrot.slane %v4510_v8, 5  ;;  %v5938_v27 = vcombine.low %v4423_v53, %v4433_v37  ;;  %v5735_v0 = vcombine.low %v6875_v57, %v6876_v34  ;;  %v6880_v8 = vld [vmem:[%s7222_s15 + $0x100] sm:$0xf]  ;;  %v6881_v37 = vld [vmem:[%s7222_s15 + $0x190] sm:$0xf] }
 0x153   : > { %v8656_v44 = vrot.slane %v4516_v17, 5  ;;  %v4522_v26 = vrot.slane %v4520_v49, 4  ;;  %v5939_v52 = vcombine.low %v4447_v31, %v4457_v13  ;;  %v4466_v59 = vrot.slane %v4465_v5, 4  ;;  %v6882_v5 = vld [vmem:[%s7222_s15 + $0x19c] sm:$0xf] }
 0x154   : > { %v4476_v50 = vrot.slane %v4475_v51, 4  ;;  %v4480_v63 = vrot.slane %v4478_v24, 5  ;;  %v4490_v14 = vrot.slane %v4489_v25, 4  ;;  %v4500_v33 = vrot.slane %v4499_v19, 4  ;;  %6425 = vmatmul.mubr.msk.bf16.gmra.mrb[20].mxu0 %vm1365_vm3, %v5938_v27  ;;  %v8690_v24 = vld [vmem:[%s7222_s15 + $0x130] sm:$0xf] }
 0x155   : > { %v4504_v48 = vrot.slane %v4502_v11, 5  ;;  %v2888_v29 = vshrl.u32 %v8662_v58, 16  ;;  %v4513_v3 = vor.u32 %v4512_v22, %v4509_v4  ;;  %6273 = vmatmul.mubr.msk.bf16.gmra.mrb[4].mxu1 %vm1365_vm3, %v5734_v55  ;;  %v4523_v2 = vor.u32 %v4522_v26, %v8656_v44  ;;  %6428 = vmatprep.mubr.msk.bf16.mxu0 %vm1365_vm3, %v5939_v52  ;;  %v6884_v19 = vld [vmem:[%s7222_s15 + $0x108] sm:$0xf]  ;;  %v6885_v11 = vld [vmem:[%s7222_s15 + $0x10c] sm:$0xf] }
 0x156   : > { %v4526_v16 = vshll.u32 %v8659_v36, 16  ;;  %6276 = vmatprep.mubr.msk.bf16.mxu1 %vm1365_vm3, %v5735_v0  ;;  %v4471_v47 = vsel %vm7245_vm4, %v4466_v59, %v8619_v35  ;;  %v4481_v56 = vsel %vm7245_vm4, %v4476_v50, %v4480_v63  ;;  %v2891_v15 = vshll.u32 %v8662_v58, 16  ;;  %v6879_v35 = vld [vmem:[%s7222_s15 + $0xfc] sm:$0xf]  ;;  %v6886_v55 = vld [vmem:[%s7222_s15 + $0x180] sm:$0xf] }
 0x157   : > { %v4495_v28 = vsel %vm7245_vm4, %v4490_v14, %v8624_v6  ;;  %v4505_v9 = vsel %vm7245_vm4, %v4500_v33, %v4504_v48  ;;  %v4842_v23 = vrot.slane %v6878_v10, 5  ;;  %v8683_v7 = vrot.slane %v2888_v29, 4  ;;  %v9323_v27 = vld [vmem:[#allocation18_spill] sm:$0xff]  ;;  %v6887_v34 = vld [vmem:[%s7222_s15 + $0x18c] sm:$0xf] }
 0x158   : > { %v5736_v49 = vcombine.low %v6879_v35, %v6880_v8  ;;  %v4514_v53 = vrot.slane %v4513_v3, 4  ;;  %v4849_v17 = vrot.slane %v6881_v37, 5  ;;  %v5940_v30 = vcombine.low %v4471_v47, %v4481_v56  ;;  %v6888_v50 = vld [vmem:[%s7222_s15 + $0x198] sm:$0xf]  ;;  %v6889_v29 = vld [vmem:[%s7222_s15 + $0x1a8] sm:$0xf] }
 0x159   : > { %v4524_v6 = vrot.slane %v4523_v2, 4  ;;  %v4528_v31 = vrot.slane %v4526_v16, 5  ;;  %v4856_v51 = vrot.slane %v6882_v5, 5  ;;  %v2897_v13 = vshll.u32 %v8690_v24, 16  ;;  %v6890_v16 = vld [vmem:[%s7222_s15 + $0x134] sm:$0x1] }
 0x15a   : > { %v2901_v25 = vshrl.u32 %v8690_v24, 16  ;;  %v5737_v62 = vcombine.low %v6884_v19, %v6885_v11  ;;  %v5941_v18 = vcombine.low %v4495_v28, %v4505_v9  ;;  %v5959_v4 = vrot.slane %v6886_v55, 9  ;;  %v6891_v56 = vld [vmem:[%s7222_s15 + $0x114] sm:$0xf]  ;;  %v6892_v28 = vld [vmem:[%s7222_s15 + $0x118] sm:$0xf] }
 0x15b   : > { %v4844_v22 = vrot.slane %v4842_v23, 4  ;;  %v4845_v57 = vrot.slane %v9323_v27, 5  ;;  %v5960_v0 = vrot.slane %v6887_v34, 9  ;;  %v4519_v26 = vsel %vm7245_vm4, %v4514_v53, %v8656_v44  ;;  %v6893_v53 = vld [vmem:[%s7222_s15 + $0x1a4] sm:$0xf] }
 0x15c   : > { %v4851_v52 = vrot.slane %v4849_v17, 4  ;;  %v4852_v59 = vrot.slane %v8208_v1, 5  ;;  %v5961_v63 = vrot.slane %v6888_v50, 9  ;;  %6429 = vmatmul.mubr.msk.bf16.gmra.mrb[24].mxu0 %vm1365_vm3, %v5940_v30  ;;  %v4529_v14 = vsel %vm7245_vm4, %v4524_v6, %v4528_v31  ;;  %v6894_v6 = vld [vmem:[%s7222_s15 + $0x1b4] sm:$0xf] }
 0x15d   : > { %6277 = vmatmul.mubr.msk.bf16.gmra.mrb[8].mxu1 %vm1365_vm3, %v5736_v49  ;;  %v4858_v33 = vrot.slane %v4856_v51, 4  ;;  %v4859_v48 = vrot.slane %v8285_v42, 5  ;;  %v4863_v3 = vrot.slane %v6889_v29, 5  ;;  %v8710_v44 = vrot.slane %v2891_v15, 5  ;;  %6432 = vmatprep.mubr.msk.bf16.mxu0 %vm1365_vm3, %v5941_v18  ;;  %v8753_v18 = vld [vmem:[%s7222_s15 + $0x138] sm:$0xf] }
 0x15e   : > { %v8712_v1 = vrot.slane %v2897_v13, 5  ;;  %v8714_v2 = vrot.slane %v2901_v25, 4  ;;  %v2907_v47 = vshll.u32 %v6890_v16, 16  ;;  %6280 = vmatprep.mubr.msk.bf16.mxu1 %vm1365_vm3, %v5737_v62  ;;  %v5738_v42 = vcombine.low %v6891_v56, %v6892_v28  ;;  %v6896_v13 = vld [vmem:[%s7222_s15 + $0x124] sm:$0xf] }
 0x15f   : > { %v4843_v15 = vsel %vm7514_vm7, %v5959_v4, %v4842_v23  ;;  %v4846_v9 = vsel %vm7514_vm7, %v4844_v22, %v4845_v57  ;;  %v8727_v10 = vsel %vm7514_vm7, %v5960_v0, %v4849_v17  ;;  %v5942_v35 = vcombine.low %v4519_v26, %v4529_v14  ;;  %v8761_v4 = vld [vmem:[%s7222_s15 + $0x144] sm:$0xf]  ;;  %v8764_v22 = vld [vmem:[%s7222_s15 + $0x148] sm:$0xf]  ;;  %v8769_v57 = vld [vmem:[%s7222_s15 + $0x150] sm:$0xf] }
 0x160   : > { %v8731_v8 = vsel %vm7514_vm7, %v4851_v52, %v4852_v59  ;;  %v8735_v49 = vsel %vm7514_vm7, %v5961_v63, %v4856_v51  ;;  %v5962_v23 = vrot.slane %v6893_v53, 9  ;;  %v8740_v37 = vsel %vm7514_vm7, %v4858_v33, %v4859_v48  ;;  %v6895_v51 = vld [vmem:[%s7222_s15 + $0x120] sm:$0xf]  ;;  %v8772_v34 = vld [vmem:[%s7222_s15 + $0x154] sm:$0xf] }
 0x161   : > { %v4865_v17 = vrot.slane %v4863_v3, 4  ;;  %v4866_v30 = vrot.slane %v8297_v32, 5  ;;  %v4870_v31 = vrot.slane %v6894_v6, 5  ;;  %v8744_v5 = vrot.slane %v2907_v47, 5  ;;  %v8756_v32 = vld [vmem:[%s7222_s15 + $0x13c] sm:$0xf] }
 0x162   : > { %v5739_v25 = vcombine.low %v6895_v51, %v6896_v13  ;;  %v5976_v19 = vcombine.low %v4843_v15, %v4846_v9  ;;  %v5740_v11 = vcombine.low %v8662_v58, %v8690_v24  ;;  %v5977_v62 = vcombine.low %v8727_v10, %v8731_v8  ;;  %v6903_v59 = vld [vmem:[%s7222_s15 + $0x1b0] sm:$0xf]  ;;  %v6904_v63 = vld [vmem:[%s7222_s15 + $0x1c0] sm:$0xf]  ;;  %v6906_v47 = vld [vmem:[%s7222_s15 + $0x1bc] sm:$0xf] }
 0x163   : > { %v5741_v55 = vcombine.low %v8753_v18, %v8756_v32  ;;  %v5742_v27 = vcombine.low %v8761_v4, %v8764_v22  ;;  %v5743_v0 = vcombine.low %v8769_v57, %v8772_v34  ;;  %v5978_v26 = vcombine.low %v8735_v49, %v8740_v37  ;;  %v8796_v9 = vld [vmem:[%s7222_s15 + $0x160] sm:$0xf]  ;;  %v8805_v53 = vld [vmem:[%s7222_s15 + $0x16c] sm:$0xf]  ;;  %v6917_v24 = vld [vmem:[%s7222_s15 + $0x128] sm:$0x1] }
 0x164   : > { %v8780_v52 = vsel %vm7514_vm7, %v5962_v23, %v4863_v3  ;;  %v5963_v50 = vrot.slane %v6903_v59, 9  ;;  %v4877_v14 = vrot.slane %v6904_v63, 5  ;;  %6433 = vmatmul.mubr.msk.bf16.gmra.mrb[28].mxu0 %vm1365_vm3, %v5942_v35  ;;  %v8788_v33 = vsel %vm7514_vm7, %v4865_v17, %v4866_v30  ;;  %v6905_v3 = vld [vmem:[%s7222_s15 + $0x1cc] sm:$0xf]  ;;  %v8799_v35 = vld [vmem:[%s7222_s15 + $0x15c] sm:$0xf] }
 0x165   : > { %6281 = vmatmul.mubr.msk.bf16.gmra.mrb[12].mxu1 %vm1365_vm3, %v5738_v42  ;;  %v4872_v48 = vrot.slane %v4870_v31, 4  ;;  %v4873_v29 = vrot.slane %v8343_v46, 5  ;;  %v4884_v16 = vrot.slane %v6905_v3, 5  ;;  %6438 = vmatprep.mubr.msk.bf16.mxu0 %vm1365_vm3, %v5976_v19  ;;  %v5964_v56 = vrot.slane %v6906_v47, 9  ;;  %v8808_v23 = vld [vmem:[%s7222_s15 + $0x168] sm:$0xf] }
 0x166   : > { %6284 = vmatprep.mubr.msk.bf16.mxu1 %vm1365_vm3, %v5739_v25  ;;  %v2864_v28 = vshrl.u32 %v6895_v51, 16  ;;  %v2867_v42 = vshll.u32 %v6895_v51, 16  ;;  %v2873_v15 = vshll.u32 %v6896_v13, 16  ;;  %v4880_v49 = vrot.slane %v8384_v21, 5  ;;  %v6911_v25 = vld [vmem:[%s7222_s15 + $0x1c8] sm:$0xf] }
 0x167   : > { %v2877_v17 = vshrl.u32 %v6896_v13, 16  ;;  %v5979_v30 = vcombine.low %v8780_v52, %v8788_v33  ;;  %v8816_v6 = vsel %vm7514_vm7, %v5963_v50, %v4870_v31  ;;  %v4879_v51 = vrot.slane %v4877_v14, 4  ;;  %v6912_v63 = vld [vmem:[%s7222_s15 + $0x1d8] sm:$0xf]  ;;  %v6913_v46 = vld [vmem:[%s7222_s15 + $0x1e4] sm:$0xf] }
 0x168   : > { %v5965_v19 = vrot.slane %v6911_v25, 9  ;;  %v8821_v21 = vsel %vm7514_vm7, %v4872_v48, %v4873_v29  ;;  %v4886_v59 = vrot.slane %v4884_v16, 4  ;;  %v4887_v13 = vrot.slane %v8438_v60, 5  ;;  %v6918_v8 = vld [vmem:[%s7222_s15 + $0x1e0] sm:$0xf] }
 0x169   : > { %v4891_v3 = vrot.slane %v6912_v63, 5  ;;  %v8827_v47 = vsel %vm7514_vm7, %v5964_v56, %v4877_v14  ;;  %v2866_v31 = vrot.slane %v2864_v28, 4  ;;  %v2869_v50 = vrot.slane %v2867_v42, 5  ;;  %v8843_v56 = vld [vmem:[%s7222_s15 + $0x178] sm:$0xf] }
 0x16a   : > { %v8829_v37 = vrot.slane %v2873_v15, 5  ;;  %v2879_v25 = vrot.slane %v2877_v17, 4  ;;  %v4898_v48 = vrot.slane %v6913_v46, 5  ;;  %v2894_v29 = vor.u32 %v8710_v44, %v8683_v7  ;;  %v8846_v28 = vld [vmem:[%s7222_s15 + $0x174] sm:$0xf] }
 0x16b   : > { %v2904_v60 = vor.u32 %v8714_v2, %v8712_v1  ;;  %v5980_v63 = vcombine.low %v8816_v6, %v8821_v21  ;;  %v8840_v14 = vsel %vm7514_vm7, %v4879_v51, %v4880_v49  ;;  %v5746_v42 = vcombine.low %v8846_v28, %v8843_v56  ;;  %v6916_v7 = vld [vmem:[%s7222_s15 + $0x1d4] sm:$0xf]  ;;  %v6920_v52 = vld [vmem:[%s7222_s15 + $0x1ec] sm:$0xf] }
 0x16c   : > { %v5966_v44 = vrot.slane %v6916_v7, 9  ;;  %6439 = vmatmul.mubr.msk.bf16.vlgmr.msra.gmra.mrb[0].mxu0 %vm1365_vm3, %v5977_v62  ;;  %v8861_v2 = vsel %vm7514_vm7, %v5965_v19, %v4884_v16  ;;  %v8865_v15 = vsel %vm7514_vm7, %v4886_v59, %v4887_v13  ;;  %v4893_v46 = vrot.slane %v4891_v3, 4 }
 0x16d   : > { %6285 = vmatmul.mubr.msk.bf16.gmra.mrb[16].mxu1 %vm1365_vm3, %v5740_v11  ;;  %v4894_v49 = vrot.slane %v8468_v43, 5  ;;  %6442 = vmatprep.mubr.msk.bf16.mxu0 %vm1365_vm3, %v5978_v26  ;;  %v2870_v58 = vor.u32 %v2869_v50, %v2866_v31  ;;  %v2883_v10 = vshll.u32 %v6917_v24, 16  ;;  %v5967_v11 = vrot.slane %v6918_v8, 9  ;;  %v6921_v8 = vld [vmem:[%s7222_s15 + $0x140] sm:$0x1] }
 0x16e   : > { %6288 = vmatprep.mubr.msk.bf16.mxu1 %vm1365_vm3, %v5741_v55  ;;  %v4901_v62 = vrot.slane %v8475_v12, 5  ;;  %v2880_v16 = vor.u32 %v2879_v25, %v8829_v37  ;;  %v4900_v17 = vrot.slane %v4898_v48, 4  ;;  %v2895_v6 = vrot.slane %v2894_v29, 4 }
 0x16f   : > { %v2905_v43 = vrot.slane %v2904_v60, 4  ;;  %v2912_v51 = vshrl.u32 %v8753_v18, 16  ;;  %v2915_v19 = vshll.u32 %v8753_v18, 16  ;;  %v2921_v55 = vshll.u32 %v8756_v32, 16 }
 0x170   : > { %v2925_v26 = vshrl.u32 %v8756_v32, 16  ;;  %v5981_v21 = vcombine.low %v8827_v47, %v8840_v14  ;;  %v5982_v12 = vcombine.low %v8861_v2, %v8865_v15  ;;  %v8887_v59 = vsel %vm7514_vm7, %v5966_v44, %v4891_v3  ;;  %v6919_v32 = vld [vmem:[%s7222_s15 + $0x1f0] sm:$0xf] }
 0x171   : > { %v8891_v13 = vsel %vm7514_vm7, %v4893_v46, %v4894_v49  ;;  %v2871_v31 = vrot.slane %v2870_v58, 4  ;;  %v2885_v18 = vrot.slane %v2883_v10, 5  ;;  %v8895_v50 = vsel %vm7514_vm7, %v5967_v11, %v4898_v48 }
 0x172   : > { %v4905_v25 = vrot.slane %v6919_v32, 5  ;;  %v2881_v47 = vrot.slane %v2880_v16, 4  ;;  %v8900_v29 = vsel %vm7514_vm7, %v4900_v17, %v4901_v62  ;;  %v2900_v3 = vsel %vm7245_vm4, %v2895_v6, %v8712_v1 }
 0x173   : > { %v2910_v60 = vsel %vm7245_vm4, %v2905_v43, %v8744_v5  ;;  %v2914_v14 = vrot.slane %v2912_v51, 4  ;;  %v2917_v7 = vrot.slane %v2915_v19, 5  ;;  %v8908_v48 = vrot.slane %v2921_v55, 5 }
 0x174   : > { %v2927_v44 = vrot.slane %v2925_v26, 4  ;;  %6443 = vmatmul.mubr.msk.bf16.gmra.mrb[4].mxu0 %vm1365_vm3, %v5979_v30  ;;  %v2936_v1 = vshrl.u32 %v8761_v4, 16  ;;  %v2939_v46 = vshll.u32 %v8761_v4, 16  ;;  %v2945_v5 = vshll.u32 %v8764_v22, 16 }
 0x175   : > { %6289 = vmatmul.mubr.msk.bf16.gmra.mrb[20].mxu1 %vm1365_vm3, %v5742_v27  ;;  %v2949_v49 = vshrl.u32 %v8764_v22, 16  ;;  %6446 = vmatprep.mubr.msk.bf16.mxu0 %vm1365_vm3, %v5980_v63  ;;  %v5983_v27 = vcombine.low %v8887_v59, %v8891_v13  ;;  %v2876_v4 = vsel %vm7245_vm4, %v2871_v31, %v8829_v37  ;;  %v5968_v33 = vrot.slane %v6920_v52, 9  ;;  %v6922_v37 = vld [vmem:[%s7222_s15 + $0x1fc] sm:$0xf]  ;;  %v6923_v31 = vld [vmem:[%s7222_s15 + $0x1f8] sm:$0xf] }
 0x176   : > { %6292 = vmatprep.mubr.msk.bf16.mxu1 %vm1365_vm3, %v5743_v0  ;;  %v4908_v30 = vrot.slane %v8523_v38, 5  ;;  %v2886_v22 = vsel %vm7245_vm4, %v2881_v47, %v2885_v18  ;;  %v5984_v58 = vcombine.low %v8895_v50, %v8900_v29  ;;  %v8938_v0 = vcombine.low %v2900_v3, %v2910_v60 }
 0x177   : > { %v4907_v63 = vrot.slane %v4905_v25, 4  ;;  %v2918_v24 = vor.u32 %v2917_v7, %v2914_v14  ;;  %v2928_v10 = vor.u32 %v2927_v44, %v8908_v48  ;;  %v2931_v11 = vshll.u32 %v6921_v8, 16  ;;  %v6924_v14 = vld [vmem:[%s7222_s15 + $0x14c] sm:$0x1] }
 0x178   : > { %v4912_v62 = vrot.slane %v6922_v37, 5  ;;  %v2938_v16 = vrot.slane %v2936_v1, 4  ;;  %v2941_v38 = vrot.slane %v2939_v46, 5  ;;  %v8943_v17 = vrot.slane %v2945_v5, 5 }
 0x179   : > { %v2951_v6 = vrot.slane %v2949_v49, 4  ;;  %v5772_v43 = vcombine.low %v2876_v4, %v2886_v22  ;;  %v8947_v51 = vsel %vm7514_vm7, %v5968_v33, %v4905_v25  ;;  %v2960_v19 = vshrl.u32 %v8769_v57, 16  ;;  %v6926_v49 = vld [vmem:[%s7222_s15 + $0x208] sm:$0xf] }
 0x17a   : > { %v2963_v55 = vshll.u32 %v8769_v57, 16  ;;  %v8953_v26 = vsel %vm7514_vm7, %v4907_v63, %v4908_v30  ;;  %v5969_v18 = vrot.slane %v6923_v31, 9  ;;  %v2969_v32 = vshll.u32 %v8772_v34, 16 }
 0x17b   : > { %v2973_v47 = vshrl.u32 %v8772_v34, 16  ;;  %v8958_v3 = vrot.slane %v2918_v24, 4  ;;  %v4914_v25 = vrot.slane %v4912_v62, 4  ;;  %v4915_v60 = vrot.slane %v8534_v45, 5  ;;  %v6925_v45 = vld [vmem:[%s7222_s15 + $0x204] sm:$0xf] }
 0x17c   : > { %v2955_v7 = vshll.u32 %v6924_v14, 16  ;;  %v9324_v57 = vcombine.low %v8799_v35, %v8796_v9  ;;  %6447 = vmatmul.mubr.msk.bf16.gmra.mrb[8].mxu0 %vm1365_vm3, %v5981_v21  ;;  %v8967_v44 = vrot.slane %v2928_v10, 4  ;;  %v8969_v1 = vrot.slane %v2931_v11, 5  ;;  %v6927_v10 = vld [vmem:[%s7222_s15 + $0x214] sm:$0xf] }
 0x17d   : > { %v2942_v34 = vor.u32 %v2941_v38, %v2938_v16  ;;  %v2952_v46 = vor.u32 %v2951_v6, %v8943_v17  ;;  %v9325_v5 = vcombine.low %v8808_v23, %v8805_v53  ;;  %6450 = vmatprep.mubr.msk.bf16.mxu0 %vm1365_vm3, %v5982_v12  ;;  %v5970_v21 = vrot.slane %v6925_v45, 9 }
 0x17e   : > { %6293 = vmatmul.mubr.msk.bf16.gmra.mrb[24].mxu1 %vm1365_vm3, %v9324_v57  ;;  %v4919_v4 = vrot.slane %v6926_v49, 5  ;;  %v2962_v52 = vrot.slane %v2960_v19, 4  ;;  %v2965_v33 = vrot.slane %v2963_v55, 5  ;;  %v5985_v30 = vcombine.low %v8947_v51, %v8953_v26  ;;  %v6928_v19 = vld [vmem:[%s7222_s15 + $0x158] sm:$0x1] }
 0x17f   : > { %6296 = vmatprep.mubr.msk.bf16.mxu1 %vm1365_vm3, %v9325_v5  ;;  %v8986_v22 = vsel %vm7514_vm7, %v5969_v18, %v4912_v62  ;;  %v8988_v63 = vrot.slane %v2969_v32, 5  ;;  %v2975_v24 = vrot.slane %v2973_v47, 4  ;;  %v2924_v2 = vsel %vm7245_vm4, %v8958_v3, %v8908_v48  ;;  %v6929_v18 = vld [vmem:[%s7222_s15 + $0x210] sm:$0xf] }
 0x180   : > { %v8996_v15 = vsel %vm7514_vm7, %v4914_v25, %v4915_v60  ;;  %v2957_v12 = vrot.slane %v2955_v7, 5  ;;  %v4926_v8 = vrot.slane %v6927_v10, 5  ;;  %v2934_v11 = vsel %vm7245_vm4, %v8967_v44, %v8969_v1 }
 0x181   : > { %v2943_v37 = vrot.slane %v2942_v34, 4  ;;  %v2953_v62 = vrot.slane %v2952_v46, 4  ;;  %v4922_v16 = vrot.slane %v8576_v54, 5  ;;  %v9006_v38 = vsel %vm7514_vm7, %v5970_v21, %v4919_v4 }
 0x182   : > { %v4921_v48 = vrot.slane %v4919_v4, 4  ;;  %v2966_v6 = vor.u32 %v2965_v33, %v2962_v52  ;;  %v2979_v55 = vshll.u32 %v6928_v19, 16  ;;  %v2976_v31 = vor.u32 %v2975_v24, %v8988_v63  ;;  %v6930_v24 = vld [vmem:[%s7222_s15 + $0x164] sm:$0x1] }
 0x183   : > { %v5971_v32 = vrot.slane %v6929_v18, 9  ;;  %v2984_v47 = vshrl.u32 %v8799_v35, 16  ;;  %v2987_v3 = vshll.u32 %v8799_v35, 16  ;;  %v4928_v25 = vrot.slane %v4926_v8, 4 }
 0x184   : > { %v4929_v60 = vrot.slane %v8585_v61, 5  ;;  %v2993_v54 = vshll.u32 %v8796_v9, 16  ;;  %v2997_v14 = vshrl.u32 %v8796_v9, 16  ;;  %6451 = vmatmul.mubr.msk.bf16.gmra.mrb[12].mxu0 %vm1365_vm3, %v5983_v27  ;;  %v3008_v7 = vshrl.u32 %v8808_v23, 16 }
 0x185   : > { %v3011_v35 = vshll.u32 %v8808_v23, 16  ;;  %v3017_v61 = vshll.u32 %v8805_v53, 16  ;;  %v3021_v57 = vshrl.u32 %v8805_v53, 16  ;;  %6454 = vmatprep.mubr.msk.bf16.mxu0 %vm1365_vm3, %v5984_v58  ;;  %v2948_v9 = vsel %vm7245_vm4, %v2943_v37, %v8943_v17 }
 0x186   : > { %6297 = vmatmul.mubr.msk.bf16.gmra.mrb[28].mxu1 %vm1365_vm3, %v5746_v42  ;;  %v2958_v42 = vsel %vm7245_vm4, %v2953_v62, %v2957_v12  ;;  %v9040_v23 = vsel %vm7514_vm7, %v4921_v48, %v4922_v16  ;;  %v2981_v59 = vrot.slane %v2979_v55, 5  ;;  %v2967_v53 = vrot.slane %v2966_v6, 4 }
 0x187   : > { %6318 = vmatprep.mubr.msk.bf16.mxu1 %vm1365_vm3, %v5772_v43  ;;  %v2977_v13 = vrot.slane %v2976_v31, 4  ;;  %v2986_v27 = vrot.slane %v2984_v47, 4  ;;  %v2989_v43 = vrot.slane %v2987_v3, 5  ;;  %v9044_v50 = vsel %vm7514_vm7, %v5971_v32, %v4926_v8  ;;  %v6932_v8 = vld [vmem:[%s7222_s15 + $0x170] sm:$0x1] }
 0x188   : > { %v9048_v29 = vsel %vm7514_vm7, %v4928_v25, %v4929_v60  ;;  %v9050_v58 = vrot.slane %v2993_v54, 5  ;;  %v2999_v17 = vrot.slane %v2997_v14, 4  ;;  %v3010_v44 = vrot.slane %v3008_v7, 4  ;;  %v6935_v3 = vld [vmem:[%s7222_s15 + $0x228] sm:$0xf] }
 0x189   : > { %v3013_v1 = vrot.slane %v3011_v35, 5  ;;  %v9052_v34 = vrot.slane %v3017_v61, 5  ;;  %v3023_v46 = vrot.slane %v3021_v57, 4  ;;  %v5774_v5 = vcombine.low %v2924_v2, %v2934_v11 }
 0x18a   : > { %v5986_v45 = vcombine.low %v8986_v22, %v8996_v15  ;;  %v5775_v21 = vcombine.low %v2948_v9, %v2958_v42  ;;  %v5987_v49 = vcombine.low %v9006_v38, %v9040_v23  ;;  %v2972_v4 = vsel %vm7245_vm4, %v2967_v53, %v8988_v63  ;;  %v6931_v15 = vld [vmem:[%s7222_s15 + $0x220] sm:$0xf]  ;;  %v6933_v63 = vld [vmem:[%s7222_s15 + $0x21c] sm:$0xf]  ;;  %v6934_v38 = vld [vmem:[%s7222_s15 + $0x22c] sm:$0xf] }
 0x18b   : > { %v2982_v52 = vsel %vm7245_vm4, %v2977_v13, %v2981_v59  ;;  %v2990_v33 = vor.u32 %v2989_v43, %v2986_v27  ;;  %v3003_v12 = vshll.u32 %v6930_v24, 16  ;;  %v5988_v2 = vcombine.low %v9044_v50, %v9048_v29  ;;  %v6936_v53 = vld [vmem:[%s7222_s15 + $0x17c] sm:$0x1]  ;;  %v6937_v29 = vld [vmem:[%s7222_s15 + $0x238] sm:$0xf] }
 0x18c   : > { %v3000_v22 = vor.u32 %v2999_v17, %v9050_v58  ;;  %v4933_v10 = vrot.slane %v6931_v15, 5  ;;  %v3027_v11 = vshll.u32 %v6932_v8, 16  ;;  %6455 = vmatmul.mubr.msk.bf16.gmra.mrb[16].mxu0 %vm1365_vm3, %v5985_v30  ;;  %v5972_v37 = vrot.slane %v6933_v63, 9 }
 0x18d   : > { %v3014_v62 = vor.u32 %v3013_v1, %v3010_v44  ;;  %v3024_v16 = vor.u32 %v3023_v46, %v9052_v34  ;;  %v4940_v48 = vrot.slane %v6934_v38, 5  ;;  %6458 = vmatprep.mubr.msk.bf16.mxu0 %vm1365_vm3, %v5986_v45  ;;  %v3032_v6 = vshrl.u32 %v8846_v28, 16 }
 0x18e   : > { %6319 = vmatmul.mubr.msk.bf16.vlgmr.msra.gmra.mrb[16].mxu1 %vm1365_vm3, %v8938_v0  ;;  %v3035_v0 = vshll.u32 %v8846_v28, 16  ;;  %v3041_v51 = vshll.u32 %v8843_v56, 16  ;;  %v3045_v26 = vshrl.u32 %v8843_v56, 16  ;;  %v5776_v30 = vcombine.low %v2972_v4, %v2982_v52 }
 0x18f   : > { %6322 = vmatprep.mubr.msk.bf16.mxu1 %vm1365_vm3, %v5774_v5  ;;  %v2991_v19 = vrot.slane %v2990_v33, 4  ;;  %v3005_v55 = vrot.slane %v3003_v12, 5  ;;  %v4936_v31 = vrot.slane %v8622_v40, 5  ;;  %v3001_v18 = vrot.slane %v3000_v22, 4  ;;  %v6938_v5 = vld [vmem:[%s7222_s15 + $0x234] sm:$0xf]  ;;  %s870_s15 = scalar_lea.vmem %s9209_s3, %s5566_s12 }
 0x190   : > { %v4935_v32 = vrot.slane %v4933_v10, 4  ;;  %v3029_v47 = vrot.slane %v3027_v11, 5  ;;  %v5973_v25 = vrot.slane %v6935_v3, 9  ;;  %v3015_v60 = vrot.slane %v3014_v62, 4 }
 0x191   : > { %v3025_v54 = vrot.slane %v3024_v16, 4  ;;  %v4942_v14 = vrot.slane %v4940_v48, 4  ;;  %v4943_v28 = vrot.slane %v8629_v41, 5  ;;  %v3034_v7 = vrot.slane %v3032_v6, 4 }
 0x192   : > { %v3037_v35 = vrot.slane %v3035_v0, 5  ;;  %v3043_v61 = vrot.slane %v3041_v51, 5  ;;  %v3047_v56 = vrot.slane %v3045_v26, 4  ;;  %v2996_v57 = vsel %vm7245_vm4, %v2991_v19, %v9050_v58 }
 0x193   : > { %v3006_v40 = vsel %vm7245_vm4, %v3001_v18, %v3005_v55  ;;  %v4934_v9 = vsel %vm7514_vm7, %v5972_v37, %v4933_v10  ;;  %v4937_v42 = vsel %vm7514_vm7, %v4935_v32, %v4936_v31  ;;  %v3020_v41 = vsel %vm7245_vm4, %v3015_v60, %v9052_v34 }
 0x194   : > { %6459 = vmatmul.mubr.msk.bf16.gmra.mrb[20].mxu0 %vm1365_vm3, %v5987_v49  ;;  %v4941_v23 = vsel %vm7514_vm7, %v5973_v25, %v4940_v48  ;;  %v4944_v59 = vsel %vm7514_vm7, %v4942_v14, %v4943_v28  ;;  %v3051_v13 = vshll.u32 %v6936_v53, 16  ;;  %v3030_v27 = vsel %vm7245_vm4, %v3025_v54, %v3029_v47 }
 0x195   : > { %6462 = vmatprep.mubr.msk.bf16.mxu0 %vm1365_vm3, %v5988_v2  ;;  %v3038_v43 = vor.u32 %v3037_v35, %v3034_v7  ;;  %v3048_v50 = vor.u32 %v3047_v56, %v3043_v61  ;;  %v4947_v58 = vrot.slane %v6937_v29, 5  ;;  %v5777_v17 = vcombine.low %v2996_v57, %v3006_v40 }
 0x196   : > { %6323 = vmatmul.mubr.msk.bf16.gmra.mrb[20].mxu1 %vm1365_vm3, %v5775_v21  ;;  %v5989_v44 = vcombine.low %v4934_v9, %v4937_v42  ;;  %v5778_v1 = vcombine.low %v3020_v41, %v3030_v27  ;;  %v5990_v34 = vcombine.low %v4941_v23, %v4944_v59  ;;  %v3053_v46 = vrot.slane %v3051_v13, 5 }
 0x197   : > { %6326 = vmatprep.mubr.msk.bf16.mxu1 %vm1365_vm3, %v5776_v30  ;;  %v5974_v45 = vrot.slane %v6938_v5, 9  ;;  %v3039_v21 = vrot.slane %v3038_v43, 4  ;;  %v3049_v49 = vrot.slane %v3048_v50, 4  ;;  %v4949_v4 = vrot.slane %v4947_v58, 4 }
 0x198   : > { %v4950_v52 = vrot.slane %v8659_v36, 5 }
 0x199   : > { %v4948_v33 = vsel %vm7514_vm7, %v5974_v45, %v4947_v58  ;;  %v3044_v24 = vsel %vm7245_vm4, %v3039_v21, %v3043_v61  ;;  %v3054_v12 = vsel %vm7245_vm4, %v3049_v49, %v3053_v46 }
 0x19a   : > { %v4951_v36 = vsel %vm7514_vm7, %v4949_v4, %v4950_v52  ;;  %v5779_v2 = vcombine.low %v3044_v24, %v3054_v12 }
 0x19b   : > { %v5991_v22 = vcombine.low %v4948_v33, %v4951_v36 }
 0x19c   : > { %6463 = vmatmul.mubr.msk.bf16.gmra.mrb[24].mxu0 %vm1365_vm3, %v5989_v44 }
 0x19d   : > { %6466 = vmatprep.mubr.msk.bf16.mxu0 %vm1365_vm3, %v5990_v34 }
 0x19e   : > { %6327 = vmatmul.mubr.msk.bf16.gmra.mrb[24].mxu1 %vm1365_vm3, %v5777_v17 }
 0x19f   : > { %6330 = vmatprep.mubr.msk.bf16.mxu1 %vm1365_vm3, %v5778_v1 }
 0x1a4   : > { %6467 = vmatmul.mubr.msk.bf16.gmra.mrb[28].mxu0 %vm1365_vm3, %v5991_v22 }
 0x1a6   : > { %6331 = vmatmul.mubr.msk.bf16.gmra.mrb[28].mxu1 %vm1365_vm3, %v5779_v2 }
 0x220   : > { %v6270_v15 = vpop.f32.mrb[0].mxu1 }
 0x221   : > { %v2512_v10 = vpop.f32.mrb[1].mxu1 }
 0x222   : > { %v6271_v8 = vpop.f32.mrb[2].mxu1 }
 0x223   : > { %v2515_v11 = vpop.f32.mrb[3].mxu1 }
 0x228   : > { %v6274_v63 = vpop.f32.mrb[4].mxu1 }
 0x229   : > { %v2528_v37 = vpop.f32.mrb[5].mxu1 }
 0x22a   : > { %v6275_v62 = vpop.f32.mrb[6].mxu1 }
 0x22b   : > { %v2531_v39 = vpop.f32.mrb[7].mxu1 }
 0x230   : > { %v6278_v16 = vpop.f32.mrb[8].mxu1 }
 0x231   : > { %v2544_v38 = vpop.f32.mrb[9].mxu1 }
 0x232   : > { %v6279_v20 = vpop.f32.mrb[10].mxu1 }
 0x233   : > { %v9127_v48 = vpop.f32.mrb[11].mxu1 }
 0x238   : > { %v9130_v6 = vpop.f32.mrb[12].mxu1 }
 0x239   : > { %v9132_v0 = vpop.f32.mrb[13].mxu1 }
 0x23a   : > { %v9137_v51 = vpop.f32.mrb[14].mxu1 }
 0x23b   : > { %v9139_v26 = vpop.f32.mrb[15].mxu1 }
 0x23f   : > { %v6440_v30 = vpop.f32.mrb[0].mxu0 }
 0x240   : > { %v6472_v19 = vadd.f32 %v6440_v30, %v6270_v15  ;;  %v5087_v55 = vpop.f32.mrb[1].mxu0 }
 0x241   : > { %v6473_v31 = vadd.f32 %v5087_v55, %v2512_v10  ;;  %v6441_v18 = vpop.f32.mrb[2].mxu0 }
 0x242   : > { %5248 = vst [vmem:[%s9145_s11 + $0x10] sm:$0xff] %v6472_v19  ;;  %v6474_v32 = vadd.f32 %v6441_v18, %v6271_v8  ;;  %v5090_v47 = vpop.f32.mrb[3].mxu0  ;;  %v5317_v14 = vmul.f32 %v6472_v19, %v6472_v19 }
 0x243   : > { %5246 = vst [vmem:[%s9145_s11] sm:$0xff] %v6473_v31  ;;  %v6475_v3 = vadd.f32 %v5090_v47, %v2515_v11  ;;  %v5315_v25 = vmul.f32 %v6473_v31, %v6473_v31 }
 0x244   : > { %5249 = vst [vmem:[%s9145_s11 + $0x18] sm:$0xff] %v6474_v32  ;;  %v5318_v57 = vmul.f32 %v6474_v32, %v6474_v32 }
 0x245   : > { %5247 = vst [vmem:[%s9145_s11 + $0x8] sm:$0xff] %v6475_v3  ;;  %v5278_v60 = vadd.f32 %v6475_v3, %v6473_v31  ;;  %v5316_v54 = vmul.f32 %v6475_v3, %v6475_v3 }
 0x247   : > { %v5279_v28 = vadd.f32 %v6472_v19, %v5278_v60  ;;  %v5347_v7 = vadd.f32 %v5316_v54, %v5315_v25  ;;  %v6444_v35 = vpop.f32.mrb[4].mxu0 }
 0x248   : > { %v6476_v61 = vadd.f32 %v6444_v35, %v6274_v63  ;;  %v5103_v56 = vpop.f32.mrb[5].mxu0 }
 0x249   : > { %v5348_v40 = vadd.f32 %v5347_v7, %v5317_v14  ;;  %v6477_v9 = vadd.f32 %v5103_v56, %v2528_v37  ;;  %v5280_v42 = vadd.f32 %v6474_v32, %v5279_v28  ;;  %v6445_v41 = vpop.f32.mrb[6].mxu0 }
 0x24a   : > { %5252 = vst [vmem:[%s9145_s11 + $0x30] sm:$0xff] %v6476_v61  ;;  %v6478_v23 = vadd.f32 %v6445_v41, %v6275_v62  ;;  %v5106_v59 = vpop.f32.mrb[7].mxu0  ;;  %v5321_v17 = vmul.f32 %v6476_v61, %v6476_v61 }
 0x24b   : > { %5250 = vst [vmem:[%s9145_s11 + $0x20] sm:$0xff] %v6477_v9  ;;  %v5281_v53 = vadd.f32 %v6477_v9, %v5280_v42  ;;  %v5319_v13 = vmul.f32 %v6477_v9, %v6477_v9  ;;  %v5349_v27 = vadd.f32 %v5348_v40, %v5318_v57  ;;  %v6479_v43 = vadd.f32 %v5106_v59, %v2531_v39 }
 0x24c   : > { %5253 = vst [vmem:[%s9145_s11 + $0x38] sm:$0xff] %v6478_v23  ;;  %v5322_v45 = vmul.f32 %v6478_v23, %v6478_v23 }
 0x24d   : > { %v5350_v50 = vadd.f32 %v5349_v27, %v5319_v13  ;;  %5251 = vst [vmem:[%s9145_s11 + $0x28] sm:$0xff] %v6479_v43  ;;  %v5282_v29 = vadd.f32 %v6479_v43, %v5281_v53  ;;  %v5320_v58 = vmul.f32 %v6479_v43, %v6479_v43 }
 0x24f   : > { %v5283_v44 = vadd.f32 %v6476_v61, %v5282_v29  ;;  %v5351_v1 = vadd.f32 %v5350_v50, %v5320_v58  ;;  %v6448_v34 = vpop.f32.mrb[8].mxu0 }
 0x250   : > { %v6480_v46 = vadd.f32 %v6448_v34, %v6278_v16  ;;  %v5119_v5 = vpop.f32.mrb[9].mxu0 }
 0x251   : > { %v5352_v21 = vadd.f32 %v5351_v1, %v5321_v17  ;;  %v6481_v49 = vadd.f32 %v5119_v5, %v2544_v38  ;;  %v5284_v4 = vadd.f32 %v6478_v23, %v5283_v44  ;;  %v6449_v52 = vpop.f32.mrb[10].mxu0 }
 0x252   : > { %5256 = vst [vmem:[%s9145_s11 + $0x50] sm:$0xff] %v6480_v46  ;;  %v6482_v33 = vadd.f32 %v6449_v52, %v6279_v20  ;;  %v5122_v24 = vpop.f32.mrb[11].mxu0  ;;  %v5325_v11 = vmul.f32 %v6480_v46, %v6480_v46 }
 0x253   : > { %5254 = vst [vmem:[%s9145_s11 + $0x40] sm:$0xff] %v6481_v49  ;;  %v5285_v12 = vadd.f32 %v6481_v49, %v5284_v4  ;;  %v5323_v36 = vmul.f32 %v6481_v49, %v6481_v49  ;;  %v5353_v2 = vadd.f32 %v5352_v21, %v5322_v45  ;;  %v6483_v22 = vadd.f32 %v5122_v24, %v9127_v48 }
 0x254   : > { %5257 = vst [vmem:[%s9145_s11 + $0x58] sm:$0xff] %v6482_v33  ;;  %v5326_v38 = vmul.f32 %v6482_v33, %v6482_v33 }
 0x255   : > { %v5354_v15 = vadd.f32 %v5353_v2, %v5323_v36  ;;  %5255 = vst [vmem:[%s9145_s11 + $0x48] sm:$0xff] %v6483_v22  ;;  %v5286_v10 = vadd.f32 %v6483_v22, %v5285_v12  ;;  %v5324_v8 = vmul.f32 %v6483_v22, %v6483_v22 }
 0x257   : > { %v5287_v63 = vadd.f32 %v6480_v46, %v5286_v10  ;;  %v5355_v37 = vadd.f32 %v5354_v15, %v5324_v8  ;;  %v6452_v62 = vpop.f32.mrb[12].mxu0 }
 0x258   : > { %v6484_v39 = vadd.f32 %v6452_v62, %v9130_v6  ;;  %v5135_v16 = vpop.f32.mrb[13].mxu0 }
 0x259   : > { %v5356_v20 = vadd.f32 %v5355_v37, %v5325_v11  ;;  %v6485_v48 = vadd.f32 %v5135_v16, %v9132_v0  ;;  %v5288_v30 = vadd.f32 %v6482_v33, %v5287_v63  ;;  %v6453_v19 = vpop.f32.mrb[14].mxu0 }
 0x25a   : > { %5260 = vst [vmem:[%s9145_s11 + $0x70] sm:$0xff] %v6484_v39  ;;  %v6486_v55 = vadd.f32 %v6453_v19, %v9137_v51  ;;  %v5138_v31 = vpop.f32.mrb[15].mxu0  ;;  %v5329_v54 = vmul.f32 %v6484_v39, %v6484_v39 }
 0x25b   : > { %5258 = vst [vmem:[%s9145_s11 + $0x60] sm:$0xff] %v6485_v48  ;;  %v5289_v18 = vadd.f32 %v6485_v48, %v5288_v30  ;;  %v5327_v32 = vmul.f32 %v6485_v48, %v6485_v48  ;;  %v5357_v47 = vadd.f32 %v5356_v20, %v5326_v38  ;;  %v6487_v3 = vadd.f32 %v5138_v31, %v9139_v26 }
 0x25c   : > { %5261 = vst [vmem:[%s9145_s11 + $0x78] sm:$0xff] %v6486_v55  ;;  %v5330_v56 = vmul.f32 %v6486_v55, %v6486_v55 }
 0x25d   : > { %v5358_v6 = vadd.f32 %v5357_v47, %v5327_v32  ;;  %5259 = vst [vmem:[%s9145_s11 + $0x68] sm:$0xff] %v6487_v3  ;;  %v5290_v25 = vadd.f32 %v6487_v3, %v5289_v18  ;;  %v5328_v60 = vmul.f32 %v6487_v3, %v6487_v3 }
 0x25f   : > { %v5291_v0 = vadd.f32 %v6484_v39, %v5290_v25  ;;  %v5359_v14 = vadd.f32 %v5358_v6, %v5328_v60  ;;  %v6456_v7 = vpop.f32.mrb[16].mxu0 }
 0x260   : > { %v5151_v61 = vpop.f32.mrb[17].mxu0 }
 0x261   : > { %v6320_v28 = vpop.f32.mrb[16].mxu1  ;;  %v5360_v57 = vadd.f32 %v5359_v14, %v5329_v54  ;;  %v5292_v40 = vadd.f32 %v6486_v55, %v5291_v0  ;;  %v6457_v42 = vpop.f32.mrb[18].mxu0 }
 0x262   : > { %v6488_v51 = vadd.f32 %v6456_v7, %v6320_v28  ;;  %v3254_v35 = vpop.f32.mrb[17].mxu1  ;;  %v5154_v59 = vpop.f32.mrb[19].mxu0 }
 0x263   : > { %v6489_v26 = vadd.f32 %v5151_v61, %v3254_v35  ;;  %v6321_v9 = vpop.f32.mrb[18].mxu1  ;;  %v5361_v27 = vadd.f32 %v5360_v57, %v5330_v56 }
 0x264   : > { %5264 = vst [vmem:[%s9145_s11 + $0x90] sm:$0xff] %v6488_v51  ;;  %v6490_v41 = vadd.f32 %v6457_v42, %v6321_v9  ;;  %v3257_v23 = vpop.f32.mrb[19].mxu1  ;;  %v5333_v17 = vmul.f32 %v6488_v51, %v6488_v51 }
 0x265   : > { %5262 = vst [vmem:[%s9145_s11 + $0x80] sm:$0xff] %v6489_v26  ;;  %v5293_v53 = vadd.f32 %v6489_v26, %v5292_v40  ;;  %v5331_v13 = vmul.f32 %v6489_v26, %v6489_v26  ;;  %v6491_v43 = vadd.f32 %v5154_v59, %v3257_v23 }
 0x266   : > { %5265 = vst [vmem:[%s9145_s11 + $0x98] sm:$0xff] %v6490_v41  ;;  %v5334_v49 = vmul.f32 %v6490_v41, %v6490_v41 }
 0x267   : > { %v5362_v50 = vadd.f32 %v5361_v27, %v5331_v13  ;;  %5263 = vst [vmem:[%s9145_s11 + $0x88] sm:$0xff] %v6491_v43  ;;  %v5294_v29 = vadd.f32 %v6491_v43, %v5293_v53  ;;  %v5332_v58 = vmul.f32 %v6491_v43, %v6491_v43  ;;  %v6460_v46 = vpop.f32.mrb[20].mxu0 }
 0x268   : > { %v5167_v21 = vpop.f32.mrb[21].mxu0 }
 0x269   : > { %v5295_v44 = vadd.f32 %v6488_v51, %v5294_v29  ;;  %v5363_v1 = vadd.f32 %v5362_v50, %v5332_v58  ;;  %v6324_v34 = vpop.f32.mrb[20].mxu1  ;;  %v6461_v12 = vpop.f32.mrb[22].mxu0 }
 0x26a   : > { %v6492_v5 = vadd.f32 %v6460_v46, %v6324_v34  ;;  %v3270_v45 = vpop.f32.mrb[21].mxu1  ;;  %v5170_v22 = vpop.f32.mrb[23].mxu0 }
 0x26b   : > { %v5364_v4 = vadd.f32 %v5363_v1, %v5333_v17  ;;  %v6493_v52 = vadd.f32 %v5167_v21, %v3270_v45  ;;  %v5296_v33 = vadd.f32 %v6490_v41, %v5295_v44  ;;  %v6325_v24 = vpop.f32.mrb[22].mxu1 }
 0x26c   : > { %5268 = vst [vmem:[%s9145_s11 + $0xb0] sm:$0xff] %v6492_v5  ;;  %v6494_v36 = vadd.f32 %v6461_v12, %v6325_v24  ;;  %v3273_v2 = vpop.f32.mrb[23].mxu1  ;;  %v5337_v39 = vmul.f32 %v6492_v5, %v6492_v5 }
 0x26d   : > { %5266 = vst [vmem:[%s9145_s11 + $0xa0] sm:$0xff] %v6493_v52  ;;  %v5297_v15 = vadd.f32 %v6493_v52, %v5296_v33  ;;  %v5335_v10 = vmul.f32 %v6493_v52, %v6493_v52  ;;  %v5365_v8 = vadd.f32 %v5364_v4, %v5334_v49  ;;  %v6495_v11 = vadd.f32 %v5170_v22, %v3273_v2 }
 0x26e   : > { %5269 = vst [vmem:[%s9145_s11 + $0xb8] sm:$0xff] %v6494_v36  ;;  %v5338_v31 = vmul.f32 %v6494_v36, %v6494_v36 }
 0x26f   : > { %v5366_v63 = vadd.f32 %v5365_v8, %v5335_v10  ;;  %5267 = vst [vmem:[%s9145_s11 + $0xa8] sm:$0xff] %v6495_v11  ;;  %v5298_v37 = vadd.f32 %v6495_v11, %v5297_v15  ;;  %v5336_v62 = vmul.f32 %v6495_v11, %v6495_v11  ;;  %v6464_v48 = vpop.f32.mrb[24].mxu0 }
 0x270   : > { %v5183_v55 = vpop.f32.mrb[25].mxu0 }
 0x271   : > { %v5299_v16 = vadd.f32 %v6492_v5, %v5298_v37  ;;  %v5367_v38 = vadd.f32 %v5366_v63, %v5336_v62  ;;  %v6328_v20 = vpop.f32.mrb[24].mxu1  ;;  %v6465_v6 = vpop.f32.mrb[26].mxu0 }
 0x272   : > { %v6496_v30 = vadd.f32 %v6464_v48, %v6328_v20  ;;  %v3286_v19 = vpop.f32.mrb[25].mxu1  ;;  %v5186_v54 = vpop.f32.mrb[27].mxu0 }
 0x273   : > { %v5368_v18 = vadd.f32 %v5367_v38, %v5337_v39  ;;  %v6497_v32 = vadd.f32 %v5183_v55, %v3286_v19  ;;  %v5300_v47 = vadd.f32 %v6494_v36, %v5299_v16  ;;  %v6329_v3 = vpop.f32.mrb[26].mxu1 }
 0x274   : > { %5272 = vst [vmem:[%s9145_s11 + $0xd0] sm:$0xff] %v6496_v30  ;;  %v6498_v25 = vadd.f32 %v6465_v6, %v6329_v3  ;;  %v3289_v60 = vpop.f32.mrb[27].mxu1  ;;  %v5341_v56 = vmul.f32 %v6496_v30, %v6496_v30 }
 0x275   : > { %5270 = vst [vmem:[%s9145_s11 + $0xc0] sm:$0xff] %v6497_v32  ;;  %v5301_v0 = vadd.f32 %v6497_v32, %v5300_v47  ;;  %v5339_v14 = vmul.f32 %v6497_v32, %v6497_v32  ;;  %v5369_v28 = vadd.f32 %v5368_v18, %v5338_v31  ;;  %v6499_v7 = vadd.f32 %v5186_v54, %v3289_v60 }
 0x276   : > { %5273 = vst [vmem:[%s9145_s11 + $0xd8] sm:$0xff] %v6498_v25  ;;  %v5342_v59 = vmul.f32 %v6498_v25, %v6498_v25 }
 0x277   : > { %v5370_v51 = vadd.f32 %v5369_v28, %v5339_v14  ;;  %5271 = vst [vmem:[%s9145_s11 + $0xc8] sm:$0xff] %v6499_v7  ;;  %v5302_v35 = vadd.f32 %v6499_v7, %v5301_v0  ;;  %v5340_v61 = vmul.f32 %v6499_v7, %v6499_v7  ;;  %v6468_v9 = vpop.f32.mrb[28].mxu0 }
 0x278   : > { %v5199_v23 = vpop.f32.mrb[29].mxu0 }
 0x279   : > { %v5303_v57 = vadd.f32 %v6496_v30, %v5302_v35  ;;  %v5371_v26 = vadd.f32 %v5370_v51, %v5340_v61  ;;  %v6332_v40 = vpop.f32.mrb[28].mxu1  ;;  %v6469_v50 = vpop.f32.mrb[30].mxu0 }
 0x27a   : > { %v6500_v42 = vadd.f32 %v6468_v9, %v6332_v40  ;;  %v3302_v41 = vpop.f32.mrb[29].mxu1  ;;  %v5202_v17 = vpop.f32.mrb[31].mxu0 }
 0x27b   : > { %v5372_v53 = vadd.f32 %v5371_v26, %v5341_v56  ;;  %v6501_v13 = vadd.f32 %v5199_v23, %v3302_v41  ;;  %v5304_v27 = vadd.f32 %v6498_v25, %v5303_v57  ;;  %v6333_v43 = vpop.f32.mrb[30].mxu1 }
 0x27c   : > { %5276 = vst [vmem:[%s9145_s11 + $0xf0] sm:$0xff] %v6500_v42  ;;  %v6502_v29 = vadd.f32 %v6469_v50, %v6333_v43  ;;  %v3305_v58 = vpop.f32.mrb[31].mxu1  ;;  %v5345_v49 = vmul.f32 %v6500_v42, %v6500_v42 }
 0x27d   : > { %5274 = vst [vmem:[%s9145_s11 + $0xe0] sm:$0xff] %v6501_v13  ;;  %v5305_v44 = vadd.f32 %v6501_v13, %v5304_v27  ;;  %v5343_v1 = vmul.f32 %v6501_v13, %v6501_v13  ;;  %v5373_v34 = vadd.f32 %v5372_v53, %v5342_v59  ;;  %v6503_v46 = vadd.f32 %v5202_v17, %v3305_v58 }
 0x27e   : > { %5277 = vst [vmem:[%s9145_s11 + $0xf8] sm:$0xff] %v6502_v29  ;;  %v5346_v33 = vmul.f32 %v6502_v29, %v6502_v29 }
 0x27f   : > { %v5374_v5 = vadd.f32 %v5373_v34, %v5343_v1  ;;  %5275 = vst [vmem:[%s9145_s11 + $0xe8] sm:$0xff] %v6503_v46  ;;  %v5306_v45 = vadd.f32 %v6503_v46, %v5305_v44  ;;  %v5344_v21 = vmul.f32 %v6503_v46, %v6503_v46 }
 0x281   : > { %v5307_v4 = vadd.f32 %v6500_v42, %v5306_v45  ;;  %v5375_v52 = vadd.f32 %v5374_v5, %v5344_v21 }
 0x283   : > { %v5308_v24 = vadd.f32 %v6502_v29, %v5307_v4  ;;  %v5376_v12 = vadd.f32 %v5375_v52, %v5345_v49 }
 0x285   : > { %v5309_v36 = vrot.slane %v5308_v24, 4  ;;  %v5377_v2 = vadd.f32 %v5376_v12, %v5346_v33 }
 0x287   : > { %v5310_v22 = vadd.f32 %v5309_v36, %v5308_v24  ;;  %v5378_v15 = vrot.slane %v5377_v2, 4 }
 0x289   : > { %v5311_v10 = vrot.slane %v5310_v22, 2  ;;  %v5379_v8 = vadd.f32 %v5378_v15, %v5377_v2 }
 0x28b   : > { %v5312_v11 = vadd.f32 %v5311_v10, %v5310_v22  ;;  %v5380_v63 = vrot.slane %v5379_v8, 2 }
 0x28d   : > { %v5313_v37 = vrot.slane %v5312_v11, 1  ;;  %v5381_v62 = vadd.f32 %v5380_v63, %v5379_v8 }
 0x28f   : > { %v5314_v39 = vadd.f32 %v5313_v37, %v5312_v11  ;;  %v5382_v16 = vrot.slane %v5381_v62, 1 }
 0x291   : > { %v5383_v38 = vadd.f32 %v5382_v16, %v5381_v62  ;;  %5384 = vst [vmem:[%s870_s15] sm:$0xff] %v5314_v39 }
 0x293   : > { %5385 = vst [vmem:[%s877_s24] sm:$0xff] %v5383_v38 }
 0x294 PF: > { %s15_s19 = sadd.s32 1, %s6977_s19   ;;  %s9326_s15 = smov %s6965_s16 }
 0x295   : > { %p12_p10 = scmp.ge.s32.totalorder %s15_s19, 4   ;;  %s9327_s16 = smov %s7039_s23 }
 0x296   : > { %s9328_s17 = smov %s6973_s18  ;;  %s9329_s18 = smov %s9331_s20 }
 0x297   :  { %14 = sbr.rel (!%p12_p10) target bundleno = 3 (0x3), region = 138 }

</bundles_post_ra>
